<compile_context>
chip_gen: v7x
topology: tpu7x:2x2x1
jax: 0.10.0
libtpu: 0.0.40
codegen_flags: <defaults>
</compile_context>

<pallas_src>
import functools

import jax
import jax.numpy as jnp
from jax import lax
from jax.experimental import pallas as pl
from jax.experimental.pallas import tpu as pltpu

EPS = 1e-5


def _row_tile(total, cap=1024):
    """Largest multiple-of-8 divisor of `total` <= min(cap, total//2); else total."""
    target = min(cap, max(8, total // 2))
    for cand in range(min(target, total), 7, -1):
        if total % cand == 0 and cand % 8 == 0:
            return cand
    return total


# ------------------------------ stage kernels ------------------------------
def _conv1_kernel(x_ref, w1_ref, t1_ref, st_ref, *, cdt):
    # 1x1 conv == channel matmul; emit per-tile partial BN stats (sum, sum_sq).
    t = jnp.dot(x_ref[...].astype(cdt), w1_ref[...],
                preferred_element_type=jnp.float32)
    t1_ref[...] = t
    st_ref[:, 0:1, :] = jnp.sum(t, axis=0, keepdims=True)[None]
    st_ref[:, 1:2, :] = jnp.sum(t * t, axis=0, keepdims=True)[None]


def _conv2_kernel(t1_ref, s1_ref, b1_ref, w2_ref, t2_ref, st_ref,
                  pad_ref, col_ref, *, cdt):
    # bn1 + relu, then 3x3 conv (stride=1, pad=1) as a single im2col matmul
    # with K = 9*P (one MXU call instead of 9 K=P matmuls).
    _, H, W, P = t1_ref.shape
    a = jnp.maximum(t1_ref[...] * s1_ref[...] + b1_ref[...], 0.0)
    a = a.reshape(H, W, P).astype(cdt)

    # halo-only zeroing of the (H+2, W+2, P) padded buffer (interior is
    # fully overwritten below).
    pad_ref[0:1, :, :] = jnp.zeros((1, W + 2, P), cdt)
    pad_ref[H + 1:H + 2, :, :] = jnp.zeros((1, W + 2, P), cdt)
    pad_ref[1:H + 1, 0:1, :] = jnp.zeros((H, 1, P), cdt)
    pad_ref[1:H + 1, W + 1:W + 2, :] = jnp.zeros((H, 1, P), cdt)
    pad_ref[1:H + 1, 1:W + 1, :] = a

    # Build the im2col patch matrix once: (H*W, 9*P), tap order (dh, dw, cin)
    # matching w2 reshaped from HWIO (3,3,P,P) -> (9P, P).
    for k in range(9):
        dh, dw = k // 3, k % 3
        col_ref[:, k * P:(k + 1) * P] = (
            pad_ref[dh:dh + H, dw:dw + W, :].reshape(H * W, P))

    conv = jnp.dot(col_ref[...], w2_ref[...],
                   preferred_element_type=jnp.float32)          # (H*W, P)
    t2_ref[...] = conv.reshape(1, H, W, P)
    st_ref[:, 0:1, :] = jnp.sum(conv, axis=0, keepdims=True)[None]
    st_ref[:, 1:2, :] = jnp.sum(conv * conv, axis=0, keepdims=True)[None]


def _conv3_kernel(t2_ref, s2_ref, b2_ref, w3_ref, t3_ref, st_ref, *, cdt):
    # bn2 + relu, then 1x1 conv (matmul); emit per-tile partial BN stats.
    a = jnp.maximum(t2_ref[...] * s2_ref[...] + b2_ref[...], 0.0)
    t = jnp.dot(a.astype(cdt), w3_ref[...], preferred_element_type=jnp.float32)
    t3_ref[...] = t
    st_ref[:, 0:1, :] = jnp.sum(t, axis=0, keepdims=True)[None]
    st_ref[:, 1:2, :] = jnp.sum(t * t, axis=0, keepdims=True)[None]


def _bn3_residual_relu_kernel(t3_ref, x_ref, s3_ref, b3_ref, o_ref):
    # bn3 + residual add + relu on a lane-dense (rows, W*C) slab.
    o_ref[...] = jnp.maximum(
        t3_ref[...] * s3_ref[...] + b3_ref[...] + x_ref[...], 0.0)


def _bn_affine(stats, gamma, beta, count):
    # Fold global batch-norm into scale/shift. Single-pass stats:
    # var = E[x^2] - mean^2 (biased, like train-mode nn.BatchNorm2d).
    s = jnp.sum(stats[:, 0, :], axis=0)
    sq = jnp.sum(stats[:, 1, :], axis=0)
    mean = s / count
    var = sq / count - mean * mean
    scale = gamma.astype(jnp.float32) * lax.rsqrt(var + EPS)
    shift = beta.astype(jnp.float32) - mean * scale
    return scale.reshape(1, -1), shift.reshape(1, -1)


# --------------------------------- wrapper ---------------------------------
def bottleneck(x_nhwc, w1, w2_hwio, w3, g1, b1, g2, b2, g3, b3,
               *, compute_dtype=jnp.float32):
    """Bottleneck forward (stride=1, downsample=None); NHWC in / NHWC out."""
    N, H, W, Cin = x_nhwc.shape
    P = w1.shape[1]
    Cout = w3.shape[1]
    assert Cin == Cout == 4 * P, "residual add requires inplanes == planes * 4"
    R = N * H * W
    cdt = compute_dtype

    cparams = pltpu.CompilerParams(
        dimension_semantics=("parallel",),       # megacore split on v7x
        vmem_limit_bytes=48 * 1024 * 1024,
    )

    x_nhwc = x_nhwc.astype(jnp.float32)
    xf = x_nhwc.reshape(R, Cin)
    w1c = w1.astype(cdt)
    w2c = w2_hwio.reshape(9 * P, P).astype(cdt)  # (dh, dw, cin) major->minor
    w3c = w3.astype(cdt)

    # ------- stage 1: conv1 (1x1) + partial stats, tiled over rows --------
    tr = _row_tile(R)
    n1 = R // tr
    t1, st1 = pl.pallas_call(
        functools.partial(_conv1_kernel, cdt=cdt),
        grid=(n1,),
        in_specs=[pl.BlockSpec((tr, Cin), lambda i: (i, 0)),
                  pl.BlockSpec((Cin, P), lambda i: (0, 0))],
        out_specs=(pl.BlockSpec((tr, P), lambda i: (i, 0)),
                   pl.BlockSpec((1, 2, P), lambda i: (i, 0, 0))),
        out_shape=(jax.ShapeDtypeStruct((R, P), jnp.float32),
                   jax.ShapeDtypeStruct((n1, 2, P), jnp.float32)),
        compiler_params=cparams,
    )(xf, w1c)
    s1, sh1 = _bn_affine(st1, g1, b1, R)

    # ------- stage 2: bn1+relu -> conv2 (3x3) + partial stats, per image ---
    t2, st2 = pl.pallas_call(
        functools.partial(_conv2_kernel, cdt=cdt),
        grid=(N,),
        in_specs=[pl.BlockSpec((1, H, W, P), lambda n: (n, 0, 0, 0)),
                  pl.BlockSpec((1, P), lambda n: (0, 0)),
                  pl.BlockSpec((1, P), lambda n: (0, 0)),
                  pl.BlockSpec((9 * P, P), lambda n: (0, 0))],
        out_specs=(pl.BlockSpec((1, H, W, P), lambda n: (n, 0, 0, 0)),
                   pl.BlockSpec((1, 2, P), lambda n: (n, 0, 0))),
        out_shape=(jax.ShapeDtypeStruct((N, H, W, P), jnp.float32),
                   jax.ShapeDtypeStruct((N, 2, P), jnp.float32)),
        scratch_shapes=[pltpu.VMEM((H + 2, W + 2, P), cdt),
                        pltpu.VMEM((H * W, 9 * P), cdt)],
        compiler_params=cparams,
    )(t1.reshape(N, H, W, P), s1, sh1, w2c)
    s2, sh2 = _bn_affine(st2, g2, b2, R)

    # ------- stage 3: bn2+relu -> conv3 (1x1) + partial stats, row tiles ---
    n3 = R // tr
    t3, st3 = pl.pallas_call(
        functools.partial(_conv3_kernel, cdt=cdt),
        grid=(n3,),
        in_specs=[pl.BlockSpec((tr, P), lambda i: (i, 0)),
                  pl.BlockSpec((1, P), lambda i: (0, 0)),
                  pl.BlockSpec((1, P), lambda i: (0, 0)),
                  pl.BlockSpec((P, Cout), lambda i: (0, 0))],
        out_specs=(pl.BlockSpec((tr, Cout), lambda i: (i, 0)),
                   pl.BlockSpec((1, 2, Cout), lambda i: (i, 0, 0))),
        out_shape=(jax.ShapeDtypeStruct((R, Cout), jnp.float32),
                   jax.ShapeDtypeStruct((n3, 2, Cout), jnp.float32)),
        compiler_params=cparams,
    )(t2.reshape(R, P), s2, sh2, w3c)
    s3, sh3 = _bn_affine(st3, g3, b3, R)

    # ------- stage 4: bn3 + residual + relu, lane-dense (N*H, W*C) ---------
    WC = W * Cout
    rows = N * H
    tr4 = _row_tile(rows)
    n4 = rows // tr4
    y2d = pl.pallas_call(
        _bn3_residual_relu_kernel,
        grid=(n4,),
        in_specs=[pl.BlockSpec((tr4, WC), lambda i: (i, 0)),
                  pl.BlockSpec((tr4, WC), lambda i: (i, 0)),
                  pl.BlockSpec((1, WC), lambda i: (0, 0)),
                  pl.BlockSpec((1, WC), lambda i: (0, 0))],
        out_specs=pl.BlockSpec((tr4, WC), lambda i: (i, 0)),
        out_shape=jax.ShapeDtypeStruct((rows, WC), jnp.float32),
        compiler_params=cparams,
    )(t3.reshape(rows, WC), xf.reshape(rows, WC),
      jnp.tile(s3, (1, W)), jnp.tile(sh3, (1, W)))

    return y2d.reshape(N, H, W, Cout)


# ---------------------------- pure-JAX reference ----------------------------
def ref_forward(x_nhwc, w1, w2_hwio, w3, g1, b1, g2, b2, g3, b3):
    dn = ('NHWC', 'HWIO', 'NHWC')

    def bn(t, g, b):
        mean = jnp.mean(t, axis=(0, 1, 2), keepdims=True)
        var = jnp.mean(jnp.square(t - mean), axis=(0, 1, 2), keepdims=True)
        return (t - mean) * lax.rsqrt(var + EPS) * g + b

    t = lax.conv_general_dilated(x_nhwc, w1[None, None], (1, 1), 'VALID',
                                 dimension_numbers=dn)
    t = jnp.maximum(bn(t, g1, b1), 0.0)
    t = lax.conv_general_dilated(t, w2_hwio, (1, 1), 'SAME',
                                 dimension_numbers=dn)
    t = jnp.maximum(bn(t, g2, b2), 0.0)
    t = lax.conv_general_dilated(t, w3[None, None], (1, 1), 'VALID',
                                 dimension_numbers=dn)
    t = bn(t, g3, b3)
    return jnp.maximum(t + x_nhwc, 0.0)


if __name__ == "__main__":
    key = jax.random.PRNGKey(0)
    N, H, W, planes = 2, 16, 16, 4
    inplanes = planes * 4  # expansion = 4 so the residual add is shape-valid

    ks = jax.random.split(key, 10)
    x_nchw = jax.random.normal(ks[0], (N, inplanes, H, W), jnp.float32)
    x = jnp.transpose(x_nchw, (0, 2, 3, 1))  # NCHW -> NHWC

    # conv weights (PyTorch OIHW maps to: w1 = W[:, :, 0, 0].T, w2 = permute(2,3,1,0), ...)
    w1 = 0.1 * jax.random.normal(ks[1], (inplanes, planes), jnp.float32)
    w2 = 0.1 * jax.random.normal(ks[2], (3, 3, planes, planes), jnp.float32)
    w3 = 0.1 * jax.random.normal(ks[3], (planes, planes * 4), jnp.float32)
    g1 = 1.0 + 0.1 * jax.random.normal(ks[4], (planes,), jnp.float32)
    b1 = 0.1 * jax.random.normal(ks[5], (planes,), jnp.float32)
    g2 = 1.0 + 0.1 * jax.random.normal(ks[6], (planes,), jnp.float32)
    b2 = 0.1 * jax.random.normal(ks[7], (planes,), jnp.float32)
    g3 = 1.0 + 0.1 * jax.random.normal(ks[8], (planes * 4,), jnp.float32)
    b3 = 0.1 * jax.random.normal(ks[9], (planes * 4,), jnp.float32)

    fwd = jax.jit(bottleneck)
    out = fwd(x, w1, w2, w3, g1, b1, g2, b2, g3, b3)
    out = jax.block_until_ready(out)

    ref = ref_forward(x, w1, w2, w3, g1, b1, g2, b2, g3, b3)
    assert out.shape == (N, H, W, planes * 4)
    err = float(jnp.max(jnp.abs(out - ref)))
    assert err < 2e-3, err

    print("KERNEL_OK")
</pallas_src>

<mosaic_0001>
module attributes {stable_mosaic.version = 11 : i64} {
  func.func @_conv1_kernel(%arg0: i32, %arg1: memref<256x16xf32, #tpu.memory_space<vmem>>, %arg2: memref<16x4xf32, #tpu.memory_space<vmem>>, %arg3: memref<256x4xf32, #tpu.memory_space<vmem>>, %arg4: memref<1x2x4xf32, #tpu.memory_space<vmem>>) attributes {dimension_semantics = [#tpu.dimension_semantics<parallel>], iteration_bounds = array<i64: 2>, scalar_prefetch = 0 : i64, scratch_operands = 0 : i64, tpu.core_type = #tpu.core_type<tc>, window_params = [{transform_indices = @transform_0, window_bounds = array<i64: 256, 16>}, {pipeline_mode = #tpu.pipeline_mode<synchronous>, transform_indices = @transform_1, window_bounds = array<i64: 16, 4>}, {transform_indices = @transform_2, window_bounds = array<i64: 256, 4>}, {transform_indices = @transform_3, window_bounds = array<i64: 1, 2, 4>}]} {
    %c0 = arith.constant 0 : index
    %c0_0 = arith.constant 0 : index
    %0 = vector.load %arg1[%c0, %c0_0] : memref<256x16xf32, #tpu.memory_space<vmem>>, vector<256x16xf32>
    %c0_1 = arith.constant 0 : index
    %c0_2 = arith.constant 0 : index
    %1 = vector.load %arg2[%c0_1, %c0_2] : memref<16x4xf32, #tpu.memory_space<vmem>>, vector<16x4xf32>
    %cst = arith.constant dense<0.000000e+00> : vector<256x4xf32>
    %2 = tpu.matmul %0, %1, %cst {dimension_numbers = #tpu.dot_dimension_numbers<[1], [0], [0], [1], [0, 0, 1, 1], [], []>} : vector<256x16xf32>, vector<16x4xf32>, vector<256x4xf32> -> vector<256x4xf32>
    %c0_3 = arith.constant 0 : index
    %c0_4 = arith.constant 0 : index
    %3 = vector.load %arg3[%c0_3, %c0_4] : memref<256x4xf32, #tpu.memory_space<vmem>>, vector<256x4xf32>
    tpu.vector_store %arg3[%c0_3, %c0_4], %2 {strides = array<i32>} : memref<256x4xf32, #tpu.memory_space<vmem>>, vector<256x4xf32>,
    %cst_5 = arith.constant dense<0.000000e+00> : vector<4xf32>
    %4 = vector.multi_reduction <add>, %2, %cst_5 [0] : vector<256x4xf32> to vector<4xf32>
    %5 = vector.shape_cast %4 : vector<4xf32> to vector<1x4xf32>
    %6 = vector.shape_cast %5 : vector<1x4xf32> to vector<1x1x4xf32>
    %c0_6 = arith.constant 0 : index
    %c0_7 = arith.constant 0 : index
    %c0_8 = arith.constant 0 : index
    %7 = vector.load %arg4[%c0_6, %c0_7, %c0_8] : memref<1x2x4xf32, #tpu.memory_space<vmem>>, vector<1x1x4xf32>
    tpu.vector_store %arg4[%c0_6, %c0_7, %c0_8], %6 {strides = array<i32>} : memref<1x2x4xf32, #tpu.memory_space<vmem>>, vector<1x1x4xf32>,
    %8 = arith.mulf %2, %2 : vector<256x4xf32>
    %cst_9 = arith.constant dense<0.000000e+00> : vector<4xf32>
    %9 = vector.multi_reduction <add>, %8, %cst_9 [0] : vector<256x4xf32> to vector<4xf32>
    %10 = vector.shape_cast %9 : vector<4xf32> to vector<1x4xf32>
    %11 = vector.shape_cast %10 : vector<1x4xf32> to vector<1x1x4xf32>
    %c0_10 = arith.constant 0 : index
    %c1 = arith.constant 1 : index
    %c0_11 = arith.constant 0 : index
    %12 = vector.load %arg4[%c0_10, %c1, %c0_11] : memref<1x2x4xf32, #tpu.memory_space<vmem>>, vector<1x1x4xf32>
    tpu.vector_store %arg4[%c0_10, %c1, %c0_11], %11 {strides = array<i32>} : memref<1x2x4xf32, #tpu.memory_space<vmem>>, vector<1x1x4xf32>,
    return
  }
  func.func @transform_0(%arg0: i32) -> (i32, i32) {
    %c0_i32 = arith.constant 0 : i32
    %c0_i32_0 = arith.constant 0 : i32
    return %arg0, %c0_i32 : i32, i32
  }
  func.func @transform_1(%arg0: i32) -> (i32, i32) {
    %c0_i32 = arith.constant 0 : i32
    %c0_i32_0 = arith.constant 0 : i32
    %c0_i32_1 = arith.constant 0 : i32
    return %c0_i32, %c0_i32_0 : i32, i32
  }
  func.func @transform_2(%arg0: i32) -> (i32, i32) {
    %c0_i32 = arith.constant 0 : i32
    %c0_i32_0 = arith.constant 0 : i32
    return %arg0, %c0_i32 : i32, i32
  }
  func.func @transform_3(%arg0: i32) -> (i32, i32, i32) {
    %c0_i32 = arith.constant 0 : i32
    %c0_i32_0 = arith.constant 0 : i32
    %c0_i32_1 = arith.constant 0 : i32
    return %arg0, %c0_i32, %c0_i32_0 : i32, i32, i32
  }
}

module attributes {stable_mosaic.version = 11 : i64} {
  func.func @_conv2_kernel(%arg0: i32, %arg1: memref<1x16x16x4xf32, #tpu.memory_space<vmem>>, %arg2: memref<1x4xf32, #tpu.memory_space<vmem>>, %arg3: memref<1x4xf32, #tpu.memory_space<vmem>>, %arg4: memref<36x4xf32, #tpu.memory_space<vmem>>, %arg5: memref<1x16x16x4xf32, #tpu.memory_space<vmem>>, %arg6: memref<1x2x4xf32, #tpu.memory_space<vmem>>, %arg7: memref<18x18x4xf32, #tpu.memory_space<vmem>>, %arg8: memref<256x36xf32, #tpu.memory_space<vmem>>) attributes {dimension_semantics = [#tpu.dimension_semantics<parallel>], iteration_bounds = array<i64: 2>, scalar_prefetch = 0 : i64, scratch_operands = 2 : i64, tpu.core_type = #tpu.core_type<tc>, window_params = [{transform_indices = @transform_0, window_bounds = array<i64: 1, 16, 16, 4>}, {pipeline_mode = #tpu.pipeline_mode<synchronous>, transform_indices = @transform_1, window_bounds = array<i64: 1, 4>}, {pipeline_mode = #tpu.pipeline_mode<synchronous>, transform_indices = @transform_2, window_bounds = array<i64: 1, 4>}, {pipeline_mode = #tpu.pipeline_mode<synchronous>, transform_indices = @transform_3, window_bounds = array<i64: 36, 4>}, {transform_indices = @transform_4, window_bounds = array<i64: 1, 16, 16, 4>}, {transform_indices = @transform_5, window_bounds = array<i64: 1, 2, 4>}]} {
    %c0 = arith.constant 0 : index
    %c0_0 = arith.constant 0 : index
    %c0_1 = arith.constant 0 : index
    %c0_2 = arith.constant 0 : index
    %0 = vector.load %arg1[%c0, %c0_0, %c0_1, %c0_2] : memref<1x16x16x4xf32, #tpu.memory_space<vmem>>, vector<1x16x16x4xf32>
    %c0_3 = arith.constant 0 : index
    %c0_4 = arith.constant 0 : index
    %1 = vector.load %arg2[%c0_3, %c0_4] : memref<1x4xf32, #tpu.memory_space<vmem>>, vector<1x4xf32>
    %2 = vector.shape_cast %1 : vector<1x4xf32> to vector<1x1x1x4xf32>
    %3 = vector.broadcast %2 : vector<1x1x1x4xf32> to vector<1x16x16x4xf32>
    %4 = arith.mulf %0, %3 : vector<1x16x16x4xf32>
    %c0_5 = arith.constant 0 : index
    %c0_6 = arith.constant 0 : index
    %5 = vector.load %arg3[%c0_5, %c0_6] : memref<1x4xf32, #tpu.memory_space<vmem>>, vector<1x4xf32>
    %6 = vector.shape_cast %5 : vector<1x4xf32> to vector<1x1x1x4xf32>
    %7 = vector.broadcast %6 : vector<1x1x1x4xf32> to vector<1x16x16x4xf32>
    %8 = arith.addf %4, %7 : vector<1x16x16x4xf32>
    %cst = arith.constant 0.000000e+00 : f32
    %9 = vector.broadcast %cst : f32 to vector<1x16x16x4xf32>
    %10 = arith.maximumf %8, %9 : vector<1x16x16x4xf32>
    %11 = vector.shape_cast %10 : vector<1x16x16x4xf32> to vector<16x16x4xf32>
    %cst_7 = arith.constant 0.000000e+00 : f32
    %12 = vector.broadcast %cst_7 : f32 to vector<1x18x4xf32>
    %c0_8 = arith.constant 0 : index
    %c0_9 = arith.constant 0 : index
    %c0_10 = arith.constant 0 : index
    %13 = vector.load %arg7[%c0_8, %c0_9, %c0_10] : memref<18x18x4xf32, #tpu.memory_space<vmem>>, vector<1x18x4xf32>
    tpu.vector_store %arg7[%c0_8, %c0_9, %c0_10], %12 {strides = array<i32>} : memref<18x18x4xf32, #tpu.memory_space<vmem>>, vector<1x18x4xf32>,
    %cst_11 = arith.constant 0.000000e+00 : f32
    %14 = vector.broadcast %cst_11 : f32 to vector<1x18x4xf32>
    %c17 = arith.constant 17 : index
    %c0_12 = arith.constant 0 : index
    %c0_13 = arith.constant 0 : index
    %15 = vector.load %arg7[%c17, %c0_12, %c0_13] : memref<18x18x4xf32, #tpu.memory_space<vmem>>, vector<1x18x4xf32>
    tpu.vector_store %arg7[%c17, %c0_12, %c0_13], %14 {strides = array<i32>} : memref<18x18x4xf32, #tpu.memory_space<vmem>>, vector<1x18x4xf32>,
    %cst_14 = arith.constant 0.000000e+00 : f32
    %16 = vector.broadcast %cst_14 : f32 to vector<16x1x4xf32>
    %c1 = arith.constant 1 : index
    %c0_15 = arith.constant 0 : index
    %c0_16 = arith.constant 0 : index
    %17 = vector.load %arg7[%c1, %c0_15, %c0_16] : memref<18x18x4xf32, #tpu.memory_space<vmem>>, vector<16x1x4xf32>
    tpu.vector_store %arg7[%c1, %c0_15, %c0_16], %16 {strides = array<i32>} : memref<18x18x4xf32, #tpu.memory_space<vmem>>, vector<16x1x4xf32>,
    %cst_17 = arith.constant 0.000000e+00 : f32
    %18 = vector.broadcast %cst_17 : f32 to vector<16x1x4xf32>
    %c1_18 = arith.constant 1 : index
    %c17_19 = arith.constant 17 : index
    %c0_20 = arith.constant 0 : index
    %19 = vector.load %arg7[%c1_18, %c17_19, %c0_20] : memref<18x18x4xf32, #tpu.memory_space<vmem>>, vector<16x1x4xf32>
    tpu.vector_store %arg7[%c1_18, %c17_19, %c0_20], %18 {strides = array<i32>} : memref<18x18x4xf32, #tpu.memory_space<vmem>>, vector<16x1x4xf32>,
    %c1_21 = arith.constant 1 : index
    %c1_22 = arith.constant 1 : index
    %c0_23 = arith.constant 0 : index
    %20 = vector.load %arg7[%c1_21, %c1_22, %c0_23] : memref<18x18x4xf32, #tpu.memory_space<vmem>>, vector<16x16x4xf32>
    tpu.vector_store %arg7[%c1_21, %c1_22, %c0_23], %11 {strides = array<i32>} : memref<18x18x4xf32, #tpu.memory_space<vmem>>, vector<16x16x4xf32>,
    %c0_24 = arith.constant 0 : index
    %c0_25 = arith.constant 0 : index
    %c0_26 = arith.constant 0 : index
    %21 = vector.load %arg7[%c0_24, %c0_25, %c0_26] : memref<18x18x4xf32, #tpu.memory_space<vmem>>, vector<16x16x4xf32>
    %22 = vector.shape_cast %21 : vector<16x16x4xf32> to vector<256x4xf32>
    %c0_27 = arith.constant 0 : index
    %c0_28 = arith.constant 0 : index
    %23 = vector.load %arg8[%c0_27, %c0_28] : memref<256x36xf32, #tpu.memory_space<vmem>>, vector<256x4xf32>
    tpu.vector_store %arg8[%c0_27, %c0_28], %22 {strides = array<i32>} : memref<256x36xf32, #tpu.memory_space<vmem>>, vector<256x4xf32>,
    %c0_29 = arith.constant 0 : index
    %c1_30 = arith.constant 1 : index
    %c0_31 = arith.constant 0 : index
    %24 = vector.load %arg7[%c0_29, %c1_30, %c0_31] : memref<18x18x4xf32, #tpu.memory_space<vmem>>, vector<16x16x4xf32>
    %25 = vector.shape_cast %24 : vector<16x16x4xf32> to vector<256x4xf32>
    %c0_32 = arith.constant 0 : index
    %c4 = arith.constant 4 : index
    %26 = vector.load %arg8[%c0_32, %c4] : memref<256x36xf32, #tpu.memory_space<vmem>>, vector<256x4xf32>
    tpu.vector_store %arg8[%c0_32, %c4], %25 {strides = array<i32>} : memref<256x36xf32, #tpu.memory_space<vmem>>, vector<256x4xf32>,
    %c0_33 = arith.constant 0 : index
    %c2 = arith.constant 2 : index
    %c0_34 = arith.constant 0 : index
    %27 = vector.load %arg7[%c0_33, %c2, %c0_34] : memref<18x18x4xf32, #tpu.memory_space<vmem>>, vector<16x16x4xf32>
    %28 = vector.shape_cast %27 : vector<16x16x4xf32> to vector<256x4xf32>
    %c0_35 = arith.constant 0 : index
    %c8 = arith.constant 8 : index
    %29 = vector.load %arg8[%c0_35, %c8] : memref<256x36xf32, #tpu.memory_space<vmem>>, vector<256x4xf32>
    tpu.vector_store %arg8[%c0_35, %c8], %28 {strides = array<i32>} : memref<256x36xf32, #tpu.memory_space<vmem>>, vector<256x4xf32>,
    %c1_36 = arith.constant 1 : index
    %c0_37 = arith.constant 0 : index
    %c0_38 = arith.constant 0 : index
    %30 = vector.load %arg7[%c1_36, %c0_37, %c0_38] : memref<18x18x4xf32, #tpu.memory_space<vmem>>, vector<16x16x4xf32>
    %31 = vector.shape_cast %30 : vector<16x16x4xf32> to vector<256x4xf32>
    %c0_39 = arith.constant 0 : index
    %c12 = arith.constant 12 : index
    %32 = vector.load %arg8[%c0_39, %c12] : memref<256x36xf32, #tpu.memory_space<vmem>>, vector<256x4xf32>
    tpu.vector_store %arg8[%c0_39, %c12], %31 {strides = array<i32>} : memref<256x36xf32, #tpu.memory_space<vmem>>, vector<256x4xf32>,
    %c1_40 = arith.constant 1 : index
    %c1_41 = arith.constant 1 : index
    %c0_42 = arith.constant 0 : index
    %33 = vector.load %arg7[%c1_40, %c1_41, %c0_42] : memref<18x18x4xf32, #tpu.memory_space<vmem>>, vector<16x16x4xf32>
    %34 = vector.shape_cast %33 : vector<16x16x4xf32> to vector<256x4xf32>
    %c0_43 = arith.constant 0 : index
    %c16 = arith.constant 16 : index
    %35 = vector.load %arg8[%c0_43, %c16] : memref<256x36xf32, #tpu.memory_space<vmem>>, vector<256x4xf32>
    tpu.vector_store %arg8[%c0_43, %c16], %34 {strides = array<i32>} : memref<256x36xf32, #tpu.memory_space<vmem>>, vector<256x4xf32>,
    %c1_44 = arith.constant 1 : index
    %c2_45 = arith.constant 2 : index
    %c0_46 = arith.constant 0 : index
    %36 = vector.load %arg7[%c1_44, %c2_45, %c0_46] : memref<18x18x4xf32, #tpu.memory_space<vmem>>, vector<16x16x4xf32>
    %37 = vector.shape_cast %36 : vector<16x16x4xf32> to vector<256x4xf32>
    %c0_47 = arith.constant 0 : index
    %c20 = arith.constant 20 : index
    %38 = vector.load %arg8[%c0_47, %c20] : memref<256x36xf32, #tpu.memory_space<vmem>>, vector<256x4xf32>
    tpu.vector_store %arg8[%c0_47, %c20], %37 {strides = array<i32>} : memref<256x36xf32, #tpu.memory_space<vmem>>, vector<256x4xf32>,
    %c2_48 = arith.constant 2 : index
    %c0_49 = arith.constant 0 : index
    %c0_50 = arith.constant 0 : index
    %39 = vector.load %arg7[%c2_48, %c0_49, %c0_50] : memref<18x18x4xf32, #tpu.memory_space<vmem>>, vector<16x16x4xf32>
    %40 = vector.shape_cast %39 : vector<16x16x4xf32> to vector<256x4xf32>
    %c0_51 = arith.constant 0 : index
    %c24 = arith.constant 24 : index
    %41 = vector.load %arg8[%c0_51, %c24] : memref<256x36xf32, #tpu.memory_space<vmem>>, vector<256x4xf32>
    tpu.vector_store %arg8[%c0_51, %c24], %40 {strides = array<i32>} : memref<256x36xf32, #tpu.memory_space<vmem>>, vector<256x4xf32>,
    %c2_52 = arith.constant 2 : index
    %c1_53 = arith.constant 1 : index
    %c0_54 = arith.constant 0 : index
    %42 = vector.load %arg7[%c2_52, %c1_53, %c0_54] : memref<18x18x4xf32, #tpu.memory_space<vmem>>, vector<16x16x4xf32>
    %43 = vector.shape_cast %42 : vector<16x16x4xf32> to vector<256x4xf32>
    %c0_55 = arith.constant 0 : index
    %c28 = arith.constant 28 : index
    %44 = vector.load %arg8[%c0_55, %c28] : memref<256x36xf32, #tpu.memory_space<vmem>>, vector<256x4xf32>
    tpu.vector_store %arg8[%c0_55, %c28], %43 {strides = array<i32>} : memref<256x36xf32, #tpu.memory_space<vmem>>, vector<256x4xf32>,
    %c2_56 = arith.constant 2 : index
    %c2_57 = arith.constant 2 : index
    %c0_58 = arith.constant 0 : index
    %45 = vector.load %arg7[%c2_56, %c2_57, %c0_58] : memref<18x18x4xf32, #tpu.memory_space<vmem>>, vector<16x16x4xf32>
    %46 = vector.shape_cast %45 : vector<16x16x4xf32> to vector<256x4xf32>
    %c0_59 = arith.constant 0 : index
    %c32 = arith.constant 32 : index
    %47 = vector.load %arg8[%c0_59, %c32] : memref<256x36xf32, #tpu.memory_space<vmem>>, vector<256x4xf32>
    tpu.vector_store %arg8[%c0_59, %c32], %46 {strides = array<i32>} : memref<256x36xf32, #tpu.memory_space<vmem>>, vector<256x4xf32>,
    %c0_60 = arith.constant 0 : index
    %c0_61 = arith.constant 0 : index
    %48 = vector.load %arg8[%c0_60, %c0_61] : memref<256x36xf32, #tpu.memory_space<vmem>>, vector<256x36xf32>
    %c0_62 = arith.constant 0 : index
    %c0_63 = arith.constant 0 : index
    %49 = vector.load %arg4[%c0_62, %c0_63] : memref<36x4xf32, #tpu.memory_space<vmem>>, vector<36x4xf32>
    %cst_64 = arith.constant dense<0.000000e+00> : vector<256x4xf32>
    %50 = tpu.matmul %48, %49, %cst_64 {dimension_numbers = #tpu.dot_dimension_numbers<[1], [0], [0], [1], [0, 0, 1, 1], [], []>} : vector<256x36xf32>, vector<36x4xf32>, vector<256x4xf32> -> vector<256x4xf32>
    %51 = vector.shape_cast %50 : vector<256x4xf32> to vector<1x16x16x4xf32>
    %c0_65 = arith.constant 0 : index
    %c0_66 = arith.constant 0 : index
    %c0_67 = arith.constant 0 : index
    %c0_68 = arith.constant 0 : index
    %52 = vector.load %arg5[%c0_65, %c0_66, %c0_67, %c0_68] : memref<1x16x16x4xf32, #tpu.memory_space<vmem>>, vector<1x16x16x4xf32>
    tpu.vector_store %arg5[%c0_65, %c0_66, %c0_67, %c0_68], %51 {strides = array<i32>} : memref<1x16x16x4xf32, #tpu.memory_space<vmem>>, vector<1x16x16x4xf32>,
    %cst_69 = arith.constant dense<0.000000e+00> : vector<4xf32>
    %53 = vector.multi_reduction <add>, %50, %cst_69 [0] : vector<256x4xf32> to vector<4xf32>
    %54 = vector.shape_cast %53 : vector<4xf32> to vector<1x4xf32>
    %55 = vector.shape_cast %54 : vector<1x4xf32> to vector<1x1x4xf32>
    %c0_70 = arith.constant 0 : index
    %c0_71 = arith.constant 0 : index
    %c0_72 = arith.constant 0 : index
    %56 = vector.load %arg6[%c0_70, %c0_71, %c0_72] : memref<1x2x4xf32, #tpu.memory_space<vmem>>, vector<1x1x4xf32>
    tpu.vector_store %arg6[%c0_70, %c0_71, %c0_72], %55 {strides = array<i32>} : memref<1x2x4xf32, #tpu.memory_space<vmem>>, vector<1x1x4xf32>,
    %57 = arith.mulf %50, %50 : vector<256x4xf32>
    %cst_73 = arith.constant dense<0.000000e+00> : vector<4xf32>
    %58 = vector.multi_reduction <add>, %57, %cst_73 [0] : vector<256x4xf32> to vector<4xf32>
    %59 = vector.shape_cast %58 : vector<4xf32> to vector<1x4xf32>
    %60 = vector.shape_cast %59 : vector<1x4xf32> to vector<1x1x4xf32>
    %c0_74 = arith.constant 0 : index
    %c1_75 = arith.constant 1 : index
    %c0_76 = arith.constant 0 : index
    %61 = vector.load %arg6[%c0_74, %c1_75, %c0_76] : memref<1x2x4xf32, #tpu.memory_space<vmem>>, vector<1x1x4xf32>
    tpu.vector_store %arg6[%c0_74, %c1_75, %c0_76], %60 {strides = array<i32>} : memref<1x2x4xf32, #tpu.memory_space<vmem>>, vector<1x1x4xf32>,
    return
  }
  func.func @transform_0(%arg0: i32) -> (i32, i32, i32, i32) {
    %c0_i32 = arith.constant 0 : i32
    %c0_i32_0 = arith.constant 0 : i32
    %c0_i32_1 = arith.constant 0 : i32
    %c0_i32_2 = arith.constant 0 : i32
    return %arg0, %c0_i32, %c0_i32_0, %c0_i32_1 : i32, i32, i32, i32
  }
  func.func @transform_1(%arg0: i32) -> (i32, i32) {
    %c0_i32 = arith.constant 0 : i32
    %c0_i32_0 = arith.constant 0 : i32
    %c0_i32_1 = arith.constant 0 : i32
    return %c0_i32, %c0_i32_0 : i32, i32
  }
  func.func @transform_2(%arg0: i32) -> (i32, i32) {
    %c0_i32 = arith.constant 0 : i32
    %c0_i32_0 = arith.constant 0 : i32
    %c0_i32_1 = arith.constant 0 : i32
    return %c0_i32, %c0_i32_0 : i32, i32
  }
  func.func @transform_3(%arg0: i32) -> (i32, i32) {
    %c0_i32 = arith.constant 0 : i32
    %c0_i32_0 = arith.constant 0 : i32
    %c0_i32_1 = arith.constant 0 : i32
    return %c0_i32, %c0_i32_0 : i32, i32
  }
  func.func @transform_4(%arg0: i32) -> (i32, i32, i32, i32) {
    %c0_i32 = arith.constant 0 : i32
    %c0_i32_0 = arith.constant 0 : i32
    %c0_i32_1 = arith.constant 0 : i32
    %c0_i32_2 = arith.constant 0 : i32
    return %arg0, %c0_i32, %c0_i32_0, %c0_i32_1 : i32, i32, i32, i32
  }
  func.func @transform_5(%arg0: i32) -> (i32, i32, i32) {
    %c0_i32 = arith.constant 0 : i32
    %c0_i32_0 = arith.constant 0 : i32
    %c0_i32_1 = arith.constant 0 : i32
    return %arg0, %c0_i32, %c0_i32_0 : i32, i32, i32
  }
}

module attributes {stable_mosaic.version = 11 : i64} {
  func.func @_conv3_kernel(%arg0: i32, %arg1: memref<256x4xf32, #tpu.memory_space<vmem>>, %arg2: memref<1x4xf32, #tpu.memory_space<vmem>>, %arg3: memref<1x4xf32, #tpu.memory_space<vmem>>, %arg4: memref<4x16xf32, #tpu.memory_space<vmem>>, %arg5: memref<256x16xf32, #tpu.memory_space<vmem>>, %arg6: memref<1x2x16xf32, #tpu.memory_space<vmem>>) attributes {dimension_semantics = [#tpu.dimension_semantics<parallel>], iteration_bounds = array<i64: 2>, scalar_prefetch = 0 : i64, scratch_operands = 0 : i64, tpu.core_type = #tpu.core_type<tc>, window_params = [{transform_indices = @transform_0, window_bounds = array<i64: 256, 4>}, {pipeline_mode = #tpu.pipeline_mode<synchronous>, transform_indices = @transform_1, window_bounds = array<i64: 1, 4>}, {pipeline_mode = #tpu.pipeline_mode<synchronous>, transform_indices = @transform_2, window_bounds = array<i64: 1, 4>}, {pipeline_mode = #tpu.pipeline_mode<synchronous>, transform_indices = @transform_3, window_bounds = array<i64: 4, 16>}, {transform_indices = @transform_4, window_bounds = array<i64: 256, 16>}, {transform_indices = @transform_5, window_bounds = array<i64: 1, 2, 16>}]} {
    %c0 = arith.constant 0 : index
    %c0_0 = arith.constant 0 : index
    %0 = vector.load %arg1[%c0, %c0_0] : memref<256x4xf32, #tpu.memory_space<vmem>>, vector<256x4xf32>
    %c0_1 = arith.constant 0 : index
    %c0_2 = arith.constant 0 : index
    %1 = vector.load %arg2[%c0_1, %c0_2] : memref<1x4xf32, #tpu.memory_space<vmem>>, vector<1x4xf32>
    %2 = vector.broadcast %1 : vector<1x4xf32> to vector<256x4xf32>
    %3 = arith.mulf %0, %2 : vector<256x4xf32>
    %c0_3 = arith.constant 0 : index
    %c0_4 = arith.constant 0 : index
    %4 = vector.load %arg3[%c0_3, %c0_4] : memref<1x4xf32, #tpu.memory_space<vmem>>, vector<1x4xf32>
    %5 = vector.broadcast %4 : vector<1x4xf32> to vector<256x4xf32>
    %6 = arith.addf %3, %5 : vector<256x4xf32>
    %cst = arith.constant 0.000000e+00 : f32
    %7 = vector.broadcast %cst : f32 to vector<256x4xf32>
    %8 = arith.maximumf %6, %7 : vector<256x4xf32>
    %c0_5 = arith.constant 0 : index
    %c0_6 = arith.constant 0 : index
    %9 = vector.load %arg4[%c0_5, %c0_6] : memref<4x16xf32, #tpu.memory_space<vmem>>, vector<4x16xf32>
    %cst_7 = arith.constant dense<0.000000e+00> : vector<256x16xf32>
    %10 = tpu.matmul %8, %9, %cst_7 {dimension_numbers = #tpu.dot_dimension_numbers<[1], [0], [0], [1], [0, 0, 1, 1], [], []>} : vector<256x4xf32>, vector<4x16xf32>, vector<256x16xf32> -> vector<256x16xf32>
    %c0_8 = arith.constant 0 : index
    %c0_9 = arith.constant 0 : index
    %11 = vector.load %arg5[%c0_8, %c0_9] : memref<256x16xf32, #tpu.memory_space<vmem>>, vector<256x16xf32>
    tpu.vector_store %arg5[%c0_8, %c0_9], %10 {strides = array<i32>} : memref<256x16xf32, #tpu.memory_space<vmem>>, vector<256x16xf32>,
    %cst_10 = arith.constant dense<0.000000e+00> : vector<16xf32>
    %12 = vector.multi_reduction <add>, %10, %cst_10 [0] : vector<256x16xf32> to vector<16xf32>
    %13 = vector.shape_cast %12 : vector<16xf32> to vector<1x16xf32>
    %14 = vector.shape_cast %13 : vector<1x16xf32> to vector<1x1x16xf32>
    %c0_11 = arith.constant 0 : index
    %c0_12 = arith.constant 0 : index
    %c0_13 = arith.constant 0 : index
    %15 = vector.load %arg6[%c0_11, %c0_12, %c0_13] : memref<1x2x16xf32, #tpu.memory_space<vmem>>, vector<1x1x16xf32>
    tpu.vector_store %arg6[%c0_11, %c0_12, %c0_13], %14 {strides = array<i32>} : memref<1x2x16xf32, #tpu.memory_space<vmem>>, vector<1x1x16xf32>,
    %16 = arith.mulf %10, %10 : vector<256x16xf32>
    %cst_14 = arith.constant dense<0.000000e+00> : vector<16xf32>
    %17 = vector.multi_reduction <add>, %16, %cst_14 [0] : vector<256x16xf32> to vector<16xf32>
    %18 = vector.shape_cast %17 : vector<16xf32> to vector<1x16xf32>
    %19 = vector.shape_cast %18 : vector<1x16xf32> to vector<1x1x16xf32>
    %c0_15 = arith.constant 0 : index
    %c1 = arith.constant 1 : index
    %c0_16 = arith.constant 0 : index
    %20 = vector.load %arg6[%c0_15, %c1, %c0_16] : memref<1x2x16xf32, #tpu.memory_space<vmem>>, vector<1x1x16xf32>
    tpu.vector_store %arg6[%c0_15, %c1, %c0_16], %19 {strides = array<i32>} : memref<1x2x16xf32, #tpu.memory_space<vmem>>, vector<1x1x16xf32>,
    return
  }
  func.func @transform_0(%arg0: i32) -> (i32, i32) {
    %c0_i32 = arith.constant 0 : i32
    %c0_i32_0 = arith.constant 0 : i32
    return %arg0, %c0_i32 : i32, i32
  }
  func.func @transform_1(%arg0: i32) -> (i32, i32) {
    %c0_i32 = arith.constant 0 : i32
    %c0_i32_0 = arith.constant 0 : i32
    %c0_i32_1 = arith.constant 0 : i32
    return %c0_i32, %c0_i32_0 : i32, i32
  }
  func.func @transform_2(%arg0: i32) -> (i32, i32) {
    %c0_i32 = arith.constant 0 : i32
    %c0_i32_0 = arith.constant 0 : i32
    %c0_i32_1 = arith.constant 0 : i32
    return %c0_i32, %c0_i32_0 : i32, i32
  }
  func.func @transform_3(%arg0: i32) -> (i32, i32) {
    %c0_i32 = arith.constant 0 : i32
    %c0_i32_0 = arith.constant 0 : i32
    %c0_i32_1 = arith.constant 0 : i32
    return %c0_i32, %c0_i32_0 : i32, i32
  }
  func.func @transform_4(%arg0: i32) -> (i32, i32) {
    %c0_i32 = arith.constant 0 : i32
    %c0_i32_0 = arith.constant 0 : i32
    return %arg0, %c0_i32 : i32, i32
  }
  func.func @transform_5(%arg0: i32) -> (i32, i32, i32) {
    %c0_i32 = arith.constant 0 : i32
    %c0_i32_0 = arith.constant 0 : i32
    %c0_i32_1 = arith.constant 0 : i32
    return %arg0, %c0_i32, %c0_i32_0 : i32, i32, i32
  }
}

module attributes {stable_mosaic.version = 11 : i64} {
  func.func @_bn3_residual_relu_kernel(%arg0: i32, %arg1: memref<16x256xf32, #tpu.memory_space<vmem>>, %arg2: memref<16x256xf32, #tpu.memory_space<vmem>>, %arg3: memref<1x256xf32, #tpu.memory_space<vmem>>, %arg4: memref<1x256xf32, #tpu.memory_space<vmem>>, %arg5: memref<16x256xf32, #tpu.memory_space<vmem>>) attributes {dimension_semantics = [#tpu.dimension_semantics<parallel>], iteration_bounds = array<i64: 2>, scalar_prefetch = 0 : i64, scratch_operands = 0 : i64, tpu.core_type = #tpu.core_type<tc>, window_params = [{transform_indices = @transform_0, window_bounds = array<i64: 16, 256>}, {transform_indices = @transform_1, window_bounds = array<i64: 16, 256>}, {pipeline_mode = #tpu.pipeline_mode<synchronous>, transform_indices = @transform_2, window_bounds = array<i64: 1, 256>}, {pipeline_mode = #tpu.pipeline_mode<synchronous>, transform_indices = @transform_3, window_bounds = array<i64: 1, 256>}, {transform_indices = @transform_4, window_bounds = array<i64: 16, 256>}]} {
    %c0 = arith.constant 0 : index
    %c0_0 = arith.constant 0 : index
    %0 = vector.load %arg1[%c0, %c0_0] : memref<16x256xf32, #tpu.memory_space<vmem>>, vector<16x256xf32>
    %c0_1 = arith.constant 0 : index
    %c0_2 = arith.constant 0 : index
    %1 = vector.load %arg3[%c0_1, %c0_2] : memref<1x256xf32, #tpu.memory_space<vmem>>, vector<1x256xf32>
    %2 = vector.broadcast %1 : vector<1x256xf32> to vector<16x256xf32>
    %3 = arith.mulf %0, %2 : vector<16x256xf32>
    %c0_3 = arith.constant 0 : index
    %c0_4 = arith.constant 0 : index
    %4 = vector.load %arg4[%c0_3, %c0_4] : memref<1x256xf32, #tpu.memory_space<vmem>>, vector<1x256xf32>
    %5 = vector.broadcast %4 : vector<1x256xf32> to vector<16x256xf32>
    %6 = arith.addf %3, %5 : vector<16x256xf32>
    %c0_5 = arith.constant 0 : index
    %c0_6 = arith.constant 0 : index
    %7 = vector.load %arg2[%c0_5, %c0_6] : memref<16x256xf32, #tpu.memory_space<vmem>>, vector<16x256xf32>
    %8 = arith.addf %6, %7 : vector<16x256xf32>
    %cst = arith.constant 0.000000e+00 : f32
    %9 = vector.broadcast %cst : f32 to vector<16x256xf32>
    %10 = arith.maximumf %8, %9 : vector<16x256xf32>
    %c0_7 = arith.constant 0 : index
    %c0_8 = arith.constant 0 : index
    %11 = vector.load %arg5[%c0_7, %c0_8] : memref<16x256xf32, #tpu.memory_space<vmem>>, vector<16x256xf32>
    tpu.vector_store %arg5[%c0_7, %c0_8], %10 {strides = array<i32>} : memref<16x256xf32, #tpu.memory_space<vmem>>, vector<16x256xf32>,
    return
  }
  func.func @transform_0(%arg0: i32) -> (i32, i32) {
    %c0_i32 = arith.constant 0 : i32
    %c0_i32_0 = arith.constant 0 : i32
    return %arg0, %c0_i32 : i32, i32
  }
  func.func @transform_1(%arg0: i32) -> (i32, i32) {
    %c0_i32 = arith.constant 0 : i32
    %c0_i32_0 = arith.constant 0 : i32
    return %arg0, %c0_i32 : i32, i32
  }
  func.func @transform_2(%arg0: i32) -> (i32, i32) {
    %c0_i32 = arith.constant 0 : i32
    %c0_i32_0 = arith.constant 0 : i32
    %c0_i32_1 = arith.constant 0 : i32
    return %c0_i32, %c0_i32_0 : i32, i32
  }
  func.func @transform_3(%arg0: i32) -> (i32, i32) {
    %c0_i32 = arith.constant 0 : i32
    %c0_i32_0 = arith.constant 0 : i32
    %c0_i32_1 = arith.constant 0 : i32
    return %c0_i32, %c0_i32_0 : i32, i32
  }
  func.func @transform_4(%arg0: i32) -> (i32, i32) {
    %c0_i32 = arith.constant 0 : i32
    %c0_i32_0 = arith.constant 0 : i32
    return %arg0, %c0_i32 : i32, i32
  }
}

</mosaic_0001>

<bundles_post_ra>
// kernel: bottleneck.4
= control target key start
LH: loop header
LB: loop body
LE: loop exit
PB: predicated region body
PF: predicated region fallthrough
CT: control target
= control target key end

     0   :  { %9 = vsyncpa [#allocation3], 0  ;;  %s1546_s0 = inlined_call_operand.hbm [shape: f32[512,16], index: 0, kind: input, shape index: {}]   ;;  %s1547_s1 = inlined_call_operand.vmem [shape: f32[16,4], index: 1, kind: input, shape index: {}]   ;;  %s1548_s2 = inlined_call_operand.vmem [shape: f32[512,4], index: 2, kind: output, shape index: {0}]   ;;  %s1549_s3 = inlined_call_operand.vmem [shape: f32[2,2,4], index: 3, kind: output, shape index: {1}]  }
   0x1   :  { %11 = vsyncpa [#allocation3 + $0x1], 0  ;;  %s1133_s12 = smov 0   ;;  %s1135_s13 = smov 0  }
   0x2   :  { %s1137_s14 = smov 0   ;;  %s1139_s15 = smov 0  }
   0x3 LB: > { %s1152_s16 = sadd.s32 4294967295, %s1108_s15   ;;  %s1155_s17 = sadd.s32 1, %s1108_s15   ;;  %s1108_s15 = sphi %s1139_s15, %s1556_s15   ;;  %s1104_s14 = sphi %s1137_s14, %s1555_s14   ;;  %s1100_s13 = sphi %s1135_s13, %s1554_s13   ;;  %s1096_s12 = sphi %s1133_s12, %s1553_s12  }
   0x4   : > { %s21_s18 = ssub.s32 %s1108_s15, %s1155_s17  ;;  %s24_s19 = sadd.s32 1, %s1104_s14 }
   0x5   : > { %p22_p0 = scmp.eq.s32.totalorder %s21_s18, 0  ;;  %p31_p1 = scmp.ne.s32.totalorder %s1104_s14, %s1100_s13 }
   0x6   : > { %p32_p2 = scmp.eq.s32.totalorder %s1108_s15, 0  ;;  %p37_p3 = scmp.ne.s32.totalorder %s1100_s13, %s1096_s12 }
   0x7   : > { %s1165_s20 = scalar_select %p22_p0, %s1104_s14, %s24_s19  }
   0x8   : > { %p33_p4 = por %p32_p2, %p31_p1  ;;  %p38_p5 = scmp.eq.s32.totalorder %s1152_s16, 0 }
   0x9   : > { %p1009_p6 = scmp.lt.s32.totalorder %s1108_s15, 2  ;;  %s137_s22 = sand.u32 1, %s1104_s14  }
   0xa   : > { %p1169_p7 = por %p38_p5, %p37_p3  ;;  %s868_s23 = sshll.u32 %s137_s22, 8 }
   0xb   : > { %s910_s24 = sshll.u32 %s1108_s15, 12  ;;  %s141_s28 = scalar_lea.vmem [#allocation2], %s868_s23 }
   0xc   : > { %s1178_s27 = scalar_lea.hbm %s1546_s0, %s910_s24  ;;  %s148_s29 = sshll.u32 %s141_s28, 4  ;;  %s1180_s29 = int_to_ptr.vmem [resolvable:$true] %s148_s29 }
   0xd   : > { %p1182_p8 = pnand %p1009_p6, %p33_p4  ;;  %s1187_s4 = scalar_lea.sflag [#allocation3], %s137_s22 }
   0xe   : > { %s1044_s5 = scalar_lea.hbm %s1178_s27, 4096  ;;  %s1049_s8 = scalar_lea.hbm %s1546_s0, 8192 }
   0xf   : > { %p1045_p10 = scmp.ne.s32.totalorder %s1178_s27, %s1044_s5  ;;  %p1046_p11 = pneg %p1182_p8 }
  0x10   : > { %p1050_p0 = scmp.lt.u32.totalorder %s1178_s27, %s1546_s0  ;;  %p1051_p1 = scmp.lt.u32.totalorder %s1049_s8, %s1044_s5 }
  0x11   : > { %p1047_p12 = pnand %p1046_p11, %p1045_p10  ;;  %p1053_p3 = scmp.lt.u32.totalorder %s1044_s5, %s1178_s27 }
  0x12   : > { %p1052_p2 = por %p1051_p1, %p1050_p0 }
  0x13   : > { %p1048_p13 = pneg %p1047_p12 }
  0x14   : > { %p1054_p4 = por %p1053_p3, %p1052_p2 }
  0x16   : > { %p1055_p5 = pnand %p1054_p4, %p1048_p13 }
  0x18   : > { %1058 = shalt.err (!%p1055_p5)
}
  0x19   : > { %s1059_s11 = scalar_lea.vmem %s1180_s29, 4096  ;;  %s1110_s12 = smov [#allocation2]  }
  0x1a   : > { %p1060_p6 = scmp.ne.s32.totalorder %s1180_s29, %s1059_s11  ;;  %s1064_s18 = sshll.u32 %s1110_s12, 4  ;;  %s1065_s18 = int_to_ptr.vmem [resolvable:$false] %s1064_s18 }
  0x1b   : > { %s1066_s19 = scalar_lea.vmem %s1065_s18, 8192  ;;  %p1067_p9 = scmp.lt.s32.totalorder %s1180_s29, %s1065_s18 }
  0x1c   : > { %p1062_p10 = pnand %p1060_p6, %p1046_p11  ;;  %p1068_p0 = scmp.lt.s32.totalorder %s1066_s19, %s1059_s11 }
  0x1e   : > { %p1063_p12 = pneg %p1062_p10  ;;  %p1069_p1 = por %p1068_p0, %p1067_p9 }
  0x20   : > { %p1070_p2 = pnand %p1069_p1, %p1063_p12 }
  0x22   : > { %1073 = shalt.err (!%p1070_p2)
}
  0x23   : > { %s1111_s22 = smov 128   ;;  %s1112_s23 = smov 8  }
  0x24   : > { %1008 = dma.hbm_to_vmem [thread:$0]  (!%p1182_p8), %s1178_s27, 4096, %s1180_s29, %s1187_s4, %s1111_s22, %s1111_s22, %s1112_s23  }
  0x25   : > { %p156_p11 = scmp.lt.s32.totalorder %s1108_s15, 3  ;;  %p1552_p13 = scmp.ge.s32.totalorder %s1108_s15, 1 }
  0x27   : > { %p157_p3 = pnand %p1552_p13, %p156_p11 }
  0x28   : > { %s162_s24 = sand.u32 (!%p157_p3), 1, %s1100_s13  }
  0x29   : > { %160 = sbr.rel (%p157_p3) target bundleno = 349 (0x15d), region = 28  ;;  %s872_s25 = sshll.u32 (!%p157_p3), %s162_s24, 8 }
  0x2a   : > { %s163_s26 = scalar_lea.sflag (!%p157_p3), [#allocation3], %s162_s24  ;;  %s1219_s28 = scalar_lea.vmem (!%p157_p3), [#allocation2], %s872_s25 }
  0x30   : > { %1091 = dma.done.wait (%p1169_p7), %s163_s26, 4096  }
  0x31   : > { %1093 = vsyncadd (%p1169_p7), %s163_s26, 4294963200  ;;  %vm238_vm0 = vcmask 130048   ;;  %v236_v0 = vld [vmem:[%s1547_s1] sm:$0xff]  ;;  %v237_v1 = vld [vmem:[%s1547_s1 + $0x8] sm:$0xff]  ;;  %s873_s21 = sshll.u32 %s1152_s16, 5  ;;  %vm560_vm1 = vcmask 31744  }
  0x32   : > { %v204_v2 = vld [vmem:[%s1219_s28] sm:$0xff]  ;;  %v997_v3 = vpack.c.bf16 %v237_v1, %v236_v0  ;;  %v205_v4 = vld [vmem:[%s1219_s28 + $0x8] sm:$0xff]  ;;  %v206_v5 = vld [vmem:[%s1219_s28 + $0x10] sm:$0xff]  ;;  %p195_p7 = scmp.lt.s32.totalorder %s873_s21, 63  ;;  %p200_p8 = scmp.lt.s32.totalorder %s1152_s16, 1  ;;  %vm662_vm2 = vcmask 24576  }
  0x33   : > { %949 = vmatprep.mubr.msk.f32.mxu0 %vm238_vm0, %v204_v2  ;;  %v220_v6 = vld [vmem:[%s1219_s28 + $0x80] sm:$0xff]  ;;  %v221_v7 = vld [vmem:[%s1219_s28 + $0x88] sm:$0xff]  ;;  %v222_v8 = vld [vmem:[%s1219_s28 + $0x90] sm:$0xff] }
  0x34   : > { %998 = vmatprep.subr.bf16.mxu0 %v997_v3  ;;  %1001 = vmatprep.subr.bf16.mxu1 %v997_v3  ;;  %v207_v9 = vld [vmem:[%s1219_s28 + $0x18] sm:$0xff]  ;;  %v208_v10 = vld [vmem:[%s1219_s28 + $0x20] sm:$0xff]  ;;  %v209_v13 = vld [vmem:[%s1219_s28 + $0x28] sm:$0xff]  ;;  %s1558_s21 = smov (!%p195_p7, %s873_s21), 63  ;;  %s1560_s16 = smov (!%p200_p8, %s1152_s16), 1 }
  0x35   : > { %1000 = vmatpush3.bf16.msra.mxu0 %v997_v3  ;;  %1002 = vmatpush3.bf16.msra.mxu1 %v997_v3  ;;  %v223_v11 = vld [vmem:[%s1219_s28 + $0x98] sm:$0xff]  ;;  %v224_v12 = vld [vmem:[%s1219_s28 + $0xa0] sm:$0xff]  ;;  %v210_v14 = vld [vmem:[%s1219_s28 + $0x30] sm:$0xff]  ;;  %s874_s4 = sshll.u32 %s1558_s21, 3  ;;  %s875_s8 = sshll.u32 %s1560_s16, 1 }
  0x36   : > { %973 = vmatprep.mubr.msk.f32.mxu1 %vm238_vm0, %v220_v6  ;;  %v225_v15 = vld [vmem:[%s1219_s28 + $0xa8] sm:$0xff]  ;;  %v226_v16 = vld [vmem:[%s1219_s28 + $0xb0] sm:$0xff]  ;;  %v211_v17 = vld [vmem:[%s1219_s28 + $0x38] sm:$0xff]  ;;  %s1299_s7 = scalar_lea.vmem %s1548_s2, %s874_s4  ;;  %s203_s11 = scalar_lea.vmem %s1549_s3, %s875_s8 }
  0x37   : > { %v212_v18 = vld [vmem:[%s1219_s28 + $0x40] sm:$0xff]  ;;  %v227_v19 = vld [vmem:[%s1219_s28 + $0xb8] sm:$0xff]  ;;  %v213_v21 = vld [vmem:[%s1219_s28 + $0x48] sm:$0xff] }
  0x38   : > { %950 = vmatmul.mubr.msk.f32.vlgmr.msra.gmra.mrb[0].mxu0 %vm238_vm0, %v205_v4  ;;  %974 = vmatmul.mubr.msk.f32.vlgmr.msra.gmra.mrb[0].mxu1 %vm238_vm0, %v221_v7  ;;  %v228_v20 = vld [vmem:[%s1219_s28 + $0xc0] sm:$0xff]  ;;  %v214_v22 = vld [vmem:[%s1219_s28 + $0x50] sm:$0xff]  ;;  %v229_v23 = vld [vmem:[%s1219_s28 + $0xc8] sm:$0xff] }
  0x39   : > { %952 = vmatprep.mubr.msk.f32.mxu0 %vm238_vm0, %v206_v5  ;;  %976 = vmatprep.mubr.msk.f32.mxu1 %vm238_vm0, %v222_v8  ;;  %v230_v24 = vld [vmem:[%s1219_s28 + $0xd0] sm:$0xff]  ;;  %v215_v25 = vld [vmem:[%s1219_s28 + $0x58] sm:$0xff]  ;;  %v216_v26 = vld [vmem:[%s1219_s28 + $0x60] sm:$0xff] }
  0x3a   : > { %v231_v27 = vld [vmem:[%s1219_s28 + $0xd8] sm:$0xff]  ;;  %v232_v28 = vld [vmem:[%s1219_s28 + $0xe0] sm:$0xff]  ;;  %v217_v29 = vld [vmem:[%s1219_s28 + $0x68] sm:$0xff] }
  0x3b   : > { %v218_v30 = vld [vmem:[%s1219_s28 + $0x70] sm:$0xff]  ;;  %v233_v31 = vld [vmem:[%s1219_s28 + $0xe8] sm:$0xff]  ;;  %v219_v33 = vld [vmem:[%s1219_s28 + $0x78] sm:$0xff] }
  0x3c   : > { %953 = vmatmul.mubr.msk.f32.gmra.mrb[2].mxu0 %vm238_vm0, %v207_v9  ;;  %977 = vmatmul.mubr.msk.f32.gmra.mrb[2].mxu1 %vm238_vm0, %v223_v11  ;;  %v234_v32 = vld [vmem:[%s1219_s28 + $0xf0] sm:$0xff]  ;;  %v235_v34 = vld [vmem:[%s1219_s28 + $0xf8] sm:$0xff] }
  0x3d   : > { %955 = vmatprep.mubr.msk.f32.mxu0 %vm238_vm0, %v208_v10  ;;  %979 = vmatprep.mubr.msk.f32.mxu1 %vm238_vm0, %v224_v12 }
  0x40   : > { %956 = vmatmul.mubr.msk.f32.gmra.mrb[4].mxu0 %vm238_vm0, %v209_v13  ;;  %980 = vmatmul.mubr.msk.f32.gmra.mrb[4].mxu1 %vm238_vm0, %v225_v15 }
  0x41   : > { %958 = vmatprep.mubr.msk.f32.mxu0 %vm238_vm0, %v210_v14  ;;  %982 = vmatprep.mubr.msk.f32.mxu1 %vm238_vm0, %v226_v16 }
  0x44   : > { %959 = vmatmul.mubr.msk.f32.gmra.mrb[6].mxu0 %vm238_vm0, %v211_v17  ;;  %983 = vmatmul.mubr.msk.f32.gmra.mrb[6].mxu1 %vm238_vm0, %v227_v19 }
  0x45   : > { %961 = vmatprep.mubr.msk.f32.mxu0 %vm238_vm0, %v212_v18  ;;  %985 = vmatprep.mubr.msk.f32.mxu1 %vm238_vm0, %v228_v20 }
  0x48   : > { %962 = vmatmul.mubr.msk.f32.gmra.mrb[8].mxu0 %vm238_vm0, %v213_v21  ;;  %986 = vmatmul.mubr.msk.f32.gmra.mrb[8].mxu1 %vm238_vm0, %v229_v23 }
  0x49   : > { %964 = vmatprep.mubr.msk.f32.mxu0 %vm238_vm0, %v214_v22  ;;  %988 = vmatprep.mubr.msk.f32.mxu1 %vm238_vm0, %v230_v24 }
  0x4c   : > { %965 = vmatmul.mubr.msk.f32.gmra.mrb[10].mxu0 %vm238_vm0, %v215_v25  ;;  %989 = vmatmul.mubr.msk.f32.gmra.mrb[10].mxu1 %vm238_vm0, %v231_v27 }
  0x4d   : > { %967 = vmatprep.mubr.msk.f32.mxu0 %vm238_vm0, %v216_v26  ;;  %991 = vmatprep.mubr.msk.f32.mxu1 %vm238_vm0, %v232_v28 }
  0x50   : > { %968 = vmatmul.mubr.msk.f32.gmra.mrb[12].mxu0 %vm238_vm0, %v217_v29  ;;  %992 = vmatmul.mubr.msk.f32.gmra.mrb[12].mxu1 %vm238_vm0, %v233_v31 }
  0x51   : > { %970 = vmatprep.mubr.msk.f32.mxu0 %vm238_vm0, %v218_v30  ;;  %994 = vmatprep.mubr.msk.f32.mxu1 %vm238_vm0, %v234_v32 }
  0x54   : > { %971 = vmatmul.mubr.msk.f32.gmra.mrb[14].mxu0 %vm238_vm0, %v219_v33  ;;  %995 = vmatmul.mubr.msk.f32.gmra.mrb[14].mxu1 %vm238_vm0, %v235_v34 }
 0x10b   : > { %v951_v35 = vpop.f32.mrb[0].mxu0  ;;  %v1304_v39 = vpop.f32.mrb[0].mxu1 }
 0x10c   : > { %562 = vst.msk [vmem:[%s1299_s7 + $0x8] sm:$0xff] %vm560_vm1, %v951_v35  ;;  %v594_v36 = vsel %vm560_vm1, %v951_v35, 0.0  ;;  %v665_v37 = vmul.f32 %v951_v35, %v951_v35  ;;  %v401_v38 = vpop.f32.mrb[1].mxu0  ;;  %578 = vst.msk [vmem:[%s1299_s7 + $0x88] sm:$0xff] %vm560_vm1, %v1304_v39  ;;  %v1312_v42 = vpop.f32.mrb[1].mxu1 }
 0x10d   : > { %561 = vst.msk [vmem:[%s1299_s7] sm:$0xff] %vm560_vm1, %v401_v38  ;;  %v593_v40 = vsel %vm560_vm1, %v401_v38, 0.0  ;;  %v664_v41 = vmul.f32 %v401_v38, %v401_v38  ;;  %577 = vst.msk [vmem:[%s1299_s7 + $0x80] sm:$0xff] %vm560_vm1, %v1312_v42 }
 0x10e   : > { %v697_v43 = vsel %vm560_vm1, %v665_v37, 0.0  ;;  %v595_v44 = vadd.f32 %v594_v36, %v593_v40 }
 0x10f   : > { %v696_v45 = vsel %vm560_vm1, %v664_v41, 0.0  ;;  %v954_v46 = vpop.f32.mrb[2].mxu0  ;;  %v1321_v49 = vpop.f32.mrb[2].mxu1 }
 0x110   : > { %v698_v47 = vadd.f32 %v697_v43, %v696_v45  ;;  %564 = vst.msk [vmem:[%s1299_s7 + $0x18] sm:$0xff] %vm560_vm1, %v954_v46  ;;  %v411_v48 = vpop.f32.mrb[3].mxu0  ;;  %v667_v50 = vmul.f32 %v954_v46, %v954_v46  ;;  %580 = vst.msk [vmem:[%s1299_s7 + $0x98] sm:$0xff] %vm560_vm1, %v1321_v49  ;;  %v1329_v53 = vpop.f32.mrb[3].mxu1  ;;  %v598_v55 = vsel %vm560_vm1, %v954_v46, 0.0 }
 0x111   : > { %563 = vst.msk [vmem:[%s1299_s7 + $0x10] sm:$0xff] %vm560_vm1, %v411_v48  ;;  %v596_v51 = vsel %vm560_vm1, %v411_v48, 0.0  ;;  %v666_v52 = vmul.f32 %v411_v48, %v411_v48  ;;  %579 = vst.msk [vmem:[%s1299_s7 + $0x90] sm:$0xff] %vm560_vm1, %v1329_v53 }
 0x112   : > { %v597_v54 = vadd.f32 %v596_v51, %v595_v44  ;;  %v701_v62 = vsel %vm560_vm1, %v667_v50, 0.0 }
 0x113   : > { %v699_v56 = vsel %vm560_vm1, %v666_v52, 0.0  ;;  %v957_v57 = vpop.f32.mrb[4].mxu0  ;;  %v1338_v61 = vpop.f32.mrb[4].mxu1 }
 0x114   : > { %v700_v58 = vadd.f32 %v699_v56, %v698_v47  ;;  %566 = vst.msk [vmem:[%s1299_s7 + $0x28] sm:$0xff] %vm560_vm1, %v957_v57  ;;  %v421_v59 = vpop.f32.mrb[5].mxu0  ;;  %v599_v60 = vadd.f32 %v598_v55, %v597_v54  ;;  %v669_v63 = vmul.f32 %v957_v57, %v957_v57  ;;  %582 = vst.msk [vmem:[%s1299_s7 + $0xa8] sm:$0xff] %vm560_vm1, %v1338_v61  ;;  %v1347_v2 = vpop.f32.mrb[5].mxu1  ;;  %v602_v5 = vsel %vm560_vm1, %v957_v57, 0.0 }
 0x115   : > { %565 = vst.msk [vmem:[%s1299_s7 + $0x20] sm:$0xff] %vm560_vm1, %v421_v59  ;;  %v600_v0 = vsel %vm560_vm1, %v421_v59, 0.0  ;;  %v668_v1 = vmul.f32 %v421_v59, %v421_v59  ;;  %581 = vst.msk [vmem:[%s1299_s7 + $0xa0] sm:$0xff] %vm560_vm1, %v1347_v2 }
 0x116   : > { %v601_v3 = vadd.f32 %v600_v0, %v599_v60  ;;  %v702_v4 = vadd.f32 %v701_v62, %v700_v58  ;;  %v705_v12 = vsel %vm560_vm1, %v669_v63, 0.0 }
 0x117   : > { %v703_v6 = vsel %vm560_vm1, %v668_v1, 0.0  ;;  %v960_v7 = vpop.f32.mrb[6].mxu0  ;;  %v1356_v11 = vpop.f32.mrb[6].mxu1 }
 0x118   : > { %v704_v8 = vadd.f32 %v703_v6, %v702_v4  ;;  %568 = vst.msk [vmem:[%s1299_s7 + $0x38] sm:$0xff] %vm560_vm1, %v960_v7  ;;  %v431_v9 = vpop.f32.mrb[7].mxu0  ;;  %v603_v10 = vadd.f32 %v602_v5, %v601_v3  ;;  %v671_v13 = vmul.f32 %v960_v7, %v960_v7  ;;  %584 = vst.msk [vmem:[%s1299_s7 + $0xb8] sm:$0xff] %vm560_vm1, %v1356_v11  ;;  %v1365_v16 = vpop.f32.mrb[7].mxu1  ;;  %v606_v19 = vsel %vm560_vm1, %v960_v7, 0.0 }
 0x119   : > { %567 = vst.msk [vmem:[%s1299_s7 + $0x30] sm:$0xff] %vm560_vm1, %v431_v9  ;;  %v604_v14 = vsel %vm560_vm1, %v431_v9, 0.0  ;;  %v670_v15 = vmul.f32 %v431_v9, %v431_v9  ;;  %583 = vst.msk [vmem:[%s1299_s7 + $0xb0] sm:$0xff] %vm560_vm1, %v1365_v16  ;;  %v680_v9 = vmul.f32 %v1312_v42, %v1312_v42 }
 0x11a   : > { %v605_v17 = vadd.f32 %v604_v14, %v603_v10  ;;  %v706_v18 = vadd.f32 %v705_v12, %v704_v8  ;;  %v709_v26 = vsel %vm560_vm1, %v671_v13, 0.0 }
 0x11b   : > { %v707_v20 = vsel %vm560_vm1, %v670_v15, 0.0  ;;  %v963_v21 = vpop.f32.mrb[8].mxu0  ;;  %v1374_v25 = vpop.f32.mrb[8].mxu1 }
 0x11c   : > { %v708_v22 = vadd.f32 %v707_v20, %v706_v18  ;;  %570 = vst.msk [vmem:[%s1299_s7 + $0x48] sm:$0xff] %vm560_vm1, %v963_v21  ;;  %v441_v23 = vpop.f32.mrb[9].mxu0  ;;  %v607_v24 = vadd.f32 %v606_v19, %v605_v17  ;;  %v673_v27 = vmul.f32 %v963_v21, %v963_v21  ;;  %586 = vst.msk [vmem:[%s1299_s7 + $0xc8] sm:$0xff] %vm560_vm1, %v1374_v25  ;;  %v1383_v30 = vpop.f32.mrb[9].mxu1  ;;  %v610_v33 = vsel %vm560_vm1, %v963_v21, 0.0 }
 0x11d   : > { %569 = vst.msk [vmem:[%s1299_s7 + $0x40] sm:$0xff] %vm560_vm1, %v441_v23  ;;  %v608_v28 = vsel %vm560_vm1, %v441_v23, 0.0  ;;  %v672_v29 = vmul.f32 %v441_v23, %v441_v23  ;;  %585 = vst.msk [vmem:[%s1299_s7 + $0xc0] sm:$0xff] %vm560_vm1, %v1383_v30 }
 0x11e   : > { %v609_v31 = vadd.f32 %v608_v28, %v607_v24  ;;  %v710_v32 = vadd.f32 %v709_v26, %v708_v22  ;;  %v713_v41 = vsel %vm560_vm1, %v673_v27, 0.0  ;;  %v624_v22 = vsel %vm560_vm1, %v1312_v42, 0.0 }
 0x11f   : > { %v711_v34 = vsel %vm560_vm1, %v672_v29, 0.0  ;;  %v966_v35 = vpop.f32.mrb[10].mxu0  ;;  %v1392_v40 = vpop.f32.mrb[10].mxu1  ;;  %v681_v27 = vmul.f32 %v1304_v39, %v1304_v39  ;;  %v727_v29 = vsel %vm560_vm1, %v680_v9, 0.0  ;;  %v689_v9 = vmul.f32 %v1374_v25, %v1374_v25 }
 0x120   : > { %v712_v36 = vadd.f32 %v711_v34, %v710_v32  ;;  %572 = vst.msk [vmem:[%s1299_s7 + $0x58] sm:$0xff] %vm560_vm1, %v966_v35  ;;  %v451_v37 = vpop.f32.mrb[11].mxu0  ;;  %v611_v38 = vadd.f32 %v610_v33, %v609_v31  ;;  %v675_v43 = vmul.f32 %v966_v35, %v966_v35  ;;  %588 = vst.msk [vmem:[%s1299_s7 + $0xd8] sm:$0xff] %vm560_vm1, %v1392_v40  ;;  %v1401_v46 = vpop.f32.mrb[11].mxu1  ;;  %v614_v50 = vsel %vm560_vm1, %v966_v35, 0.0 }
 0x121   : > { %571 = vst.msk [vmem:[%s1299_s7 + $0x50] sm:$0xff] %vm560_vm1, %v451_v37  ;;  %v612_v44 = vsel %vm560_vm1, %v451_v37, 0.0  ;;  %v674_v45 = vmul.f32 %v451_v37, %v451_v37  ;;  %587 = vst.msk [vmem:[%s1299_s7 + $0xd0] sm:$0xff] %vm560_vm1, %v1401_v46  ;;  %v682_v31 = vmul.f32 %v1329_v53, %v1329_v53  ;;  %v626_v34 = vsel %vm560_vm1, %v1304_v39, 0.0 }
 0x122   : > { %v613_v47 = vadd.f32 %v612_v44, %v611_v38  ;;  %v714_v48 = vadd.f32 %v713_v41, %v712_v36  ;;  %v717_v58 = vsel %vm560_vm1, %v675_v43, 0.0  ;;  %v628_v35 = vsel %vm560_vm1, %v1329_v53, 0.0 }
 0x123   : > { %v715_v51 = vsel %vm560_vm1, %v674_v45, 0.0  ;;  %v969_v52 = vpop.f32.mrb[12].mxu0  ;;  %v1410_v57 = vpop.f32.mrb[12].mxu1  ;;  %v729_v38 = vsel %vm560_vm1, %v681_v27, 0.0  ;;  %v683_v41 = vmul.f32 %v1321_v49, %v1321_v49  ;;  %v731_v43 = vsel %vm560_vm1, %v682_v31, 0.0 }
 0x124   : > { %v716_v54 = vadd.f32 %v715_v51, %v714_v48  ;;  %574 = vst.msk [vmem:[%s1299_s7 + $0x68] sm:$0xff] %vm560_vm1, %v969_v52  ;;  %v461_v55 = vpop.f32.mrb[13].mxu0  ;;  %v615_v56 = vadd.f32 %v614_v50, %v613_v47  ;;  %v677_v59 = vmul.f32 %v969_v52, %v969_v52  ;;  %590 = vst.msk [vmem:[%s1299_s7 + $0xe8] sm:$0xff] %vm560_vm1, %v1410_v57  ;;  %v1419_v63 = vpop.f32.mrb[13].mxu1  ;;  %v618_v3 = vsel %vm560_vm1, %v969_v52, 0.0 }
 0x125   : > { %573 = vst.msk [vmem:[%s1299_s7 + $0x60] sm:$0xff] %vm560_vm1, %v461_v55  ;;  %v616_v60 = vsel %vm560_vm1, %v461_v55, 0.0  ;;  %v676_v62 = vmul.f32 %v461_v55, %v461_v55  ;;  %589 = vst.msk [vmem:[%s1299_s7 + $0xe0] sm:$0xff] %vm560_vm1, %v1419_v63  ;;  %v684_v44 = vmul.f32 %v1347_v2, %v1347_v2  ;;  %v630_v39 = vsel %vm560_vm1, %v1321_v49, 0.0 }
 0x126   : > { %v617_v0 = vadd.f32 %v616_v60, %v615_v56  ;;  %v718_v1 = vadd.f32 %v717_v58, %v716_v54  ;;  %v721_v12 = vsel %vm560_vm1, %v677_v59, 0.0  ;;  %v632_v53 = vsel %vm560_vm1, %v1347_v2, 0.0 }
 0x127   : > { %v719_v4 = vsel %vm560_vm1, %v676_v62, 0.0  ;;  %v972_v5 = vpop.f32.mrb[14].mxu0  ;;  %v1430_v10 = vpop.f32.mrb[14].mxu1  ;;  %v733_v51 = vsel %vm560_vm1, %v683_v41, 0.0  ;;  %v685_v52 = vmul.f32 %v1338_v61, %v1338_v61  ;;  %v735_v54 = vsel %vm560_vm1, %v684_v44, 0.0 }
 0x128   : > { %v720_v6 = vadd.f32 %v719_v4, %v718_v1  ;;  %576 = vst.msk [vmem:[%s1299_s7 + $0x78] sm:$0xff] %vm560_vm1, %v972_v5  ;;  %v471_v7 = vpop.f32.mrb[15].mxu0  ;;  %v619_v8 = vadd.f32 %v618_v3, %v617_v0  ;;  %v679_v13 = vmul.f32 %v972_v5, %v972_v5  ;;  %592 = vst.msk [vmem:[%s1299_s7 + $0xf8] sm:$0xff] %vm560_vm1, %v1430_v10  ;;  %v1439_v17 = vpop.f32.mrb[15].mxu1  ;;  %v622_v20 = vsel %vm560_vm1, %v972_v5, 0.0 }
 0x129   : > { %575 = vst.msk [vmem:[%s1299_s7 + $0x70] sm:$0xff] %vm560_vm1, %v471_v7  ;;  %v620_v14 = vsel %vm560_vm1, %v471_v7, 0.0  ;;  %v678_v15 = vmul.f32 %v471_v7, %v471_v7  ;;  %591 = vst.msk [vmem:[%s1299_s7 + $0xf0] sm:$0xff] %vm560_vm1, %v1439_v17  ;;  %v695_v23 = vmul.f32 %v1430_v10, %v1430_v10  ;;  %v686_v55 = vmul.f32 %v1365_v16, %v1365_v16 }
 0x12a   : > { %v621_v18 = vadd.f32 %v620_v14, %v619_v8  ;;  %v722_v19 = vadd.f32 %v721_v12, %v720_v6  ;;  %v725_v28 = vsel %vm560_vm1, %v679_v13, 0.0  ;;  %v634_v49 = vsel %vm560_vm1, %v1338_v61, 0.0 }
 0x12b   : > { %v723_v21 = vsel %vm560_vm1, %v678_v15, 0.0  ;;  %v1457_v32 = vsel %vm560_vm1, %v695_v23, 0.0  ;;  %v636_v2 = vsel %vm560_vm1, %v1365_v16, 0.0  ;;  %v737_v62 = vsel %vm560_vm1, %v685_v52, 0.0 }
 0x12c   : > { %v623_v24 = vadd.f32 %v622_v20, %v621_v18  ;;  %v724_v26 = vadd.f32 %v723_v21, %v722_v19  ;;  %v687_v0 = vmul.f32 %v1356_v11, %v1356_v11  ;;  %v739_v1 = vsel %vm560_vm1, %v686_v55, 0.0 }
 0x12d   : > { %v688_v3 = vmul.f32 %v1383_v30, %v1383_v30  ;;  %v638_v61 = vsel %vm560_vm1, %v1356_v11, 0.0  ;;  %v640_v16 = vsel %vm560_vm1, %v1383_v30, 0.0  ;;  %v690_v13 = vmul.f32 %v1401_v46, %v1401_v46 }
 0x12e   : > { %v726_v33 = vadd.f32 %v725_v28, %v724_v26  ;;  %v625_v42 = vadd.f32 %v624_v22, %v623_v24  ;;  %v741_v8 = vsel %vm560_vm1, %v687_v0, 0.0  ;;  %v642_v11 = vsel %vm560_vm1, %v1374_v25, 0.0 }
 0x12f   : > { %v743_v12 = vsel %vm560_vm1, %v688_v3, 0.0  ;;  %v644_v30 = vsel %vm560_vm1, %v1401_v46, 0.0  ;;  %v745_v20 = vsel %vm560_vm1, %v689_v9, 0.0  ;;  %v691_v21 = vmul.f32 %v1392_v40, %v1392_v40 }
 0x130   : > { %v728_v36 = vadd.f32 %v727_v29, %v726_v33  ;;  %v627_v37 = vadd.f32 %v626_v34, %v625_v42  ;;  %v747_v22 = vsel %vm560_vm1, %v690_v13, 0.0  ;;  %v692_v23 = vmul.f32 %v1419_v63, %v1419_v63 }
 0x131   : > { %v646_v25 = vsel %vm560_vm1, %v1392_v40, 0.0  ;;  %v648_v46 = vsel %vm560_vm1, %v1419_v63, 0.0  ;;  %v749_v29 = vsel %vm560_vm1, %v691_v21, 0.0  ;;  %v693_v31 = vmul.f32 %v1410_v57, %v1410_v57 }
 0x132   : > { %v629_v45 = vadd.f32 %v628_v35, %v627_v37  ;;  %v730_v47 = vadd.f32 %v729_v38, %v728_v36  ;;  %v751_v33 = vsel %vm560_vm1, %v692_v23, 0.0  ;;  %v694_v42 = vmul.f32 %v1439_v17, %v1439_v17 }
 0x133   : > { %v650_v40 = vsel %vm560_vm1, %v1410_v57, 0.0  ;;  %v652_v63 = vsel %vm560_vm1, %v1439_v17, 0.0  ;;  %v753_v38 = vsel %vm560_vm1, %v693_v31, 0.0 }
 0x134   : > { %v732_v48 = vadd.f32 %v731_v43, %v730_v47  ;;  %v631_v50 = vadd.f32 %v630_v39, %v629_v45  ;;  %v755_v41 = vsel %vm560_vm1, %v694_v42, 0.0  ;;  %v654_v45 = vsel %vm560_vm1, %v1430_v10, 0.0 }
 0x136   : > { %v633_v56 = vadd.f32 %v632_v53, %v631_v50  ;;  %v734_v58 = vadd.f32 %v733_v51, %v732_v48 }
 0x138   : > { %v736_v59 = vadd.f32 %v735_v54, %v734_v58  ;;  %v635_v60 = vadd.f32 %v634_v49, %v633_v56 }
 0x13a   : > { %v637_v4 = vadd.f32 %v636_v2, %v635_v60  ;;  %v738_v5 = vadd.f32 %v737_v62, %v736_v59 }
 0x13c   : > { %v740_v6 = vadd.f32 %v739_v1, %v738_v5  ;;  %v639_v7 = vadd.f32 %v638_v61, %v637_v4 }
 0x13e   : > { %v641_v14 = vadd.f32 %v640_v16, %v639_v7  ;;  %v742_v15 = vadd.f32 %v741_v8, %v740_v6 }
 0x140   : > { %v744_v18 = vadd.f32 %v743_v12, %v742_v15  ;;  %v643_v19 = vadd.f32 %v642_v11, %v641_v14 }
 0x142   : > { %v645_v24 = vadd.f32 %v644_v30, %v643_v19  ;;  %v746_v26 = vadd.f32 %v745_v20, %v744_v18 }
 0x144   : > { %v748_v27 = vadd.f32 %v747_v22, %v746_v26  ;;  %v647_v28 = vadd.f32 %v646_v25, %v645_v24 }
 0x146   : > { %v649_v34 = vadd.f32 %v648_v46, %v647_v28  ;;  %v750_v35 = vadd.f32 %v749_v29, %v748_v27 }
 0x148   : > { %v752_v36 = vadd.f32 %v751_v33, %v750_v35  ;;  %v651_v37 = vadd.f32 %v650_v40, %v649_v34 }
 0x14a   : > { %v653_v43 = vadd.f32 %v652_v63, %v651_v37  ;;  %v754_v44 = vadd.f32 %v753_v38, %v752_v36 }
 0x14c   : > { %v655_v47 = vadd.f32 %v654_v45, %v653_v43  ;;  %v756_v39 = vadd.f32 %v755_v41, %v754_v44 }
 0x14e   : > { %v656_v53 = vrot.slane %v655_v47, 4  ;;  %v758_v57 = vadd.f32 %v1457_v32, %v756_v39 }
 0x150   : > { %v657_v48 = vadd.f32 %v656_v53, %v655_v47  ;;  %v759_v17 = vrot.slane %v758_v57, 4 }
 0x152   : > { %v658_v50 = vrot.slane %v657_v48, 2  ;;  %v760_v51 = vadd.f32 %v759_v17, %v758_v57 }
 0x154   : > { %v659_v52 = vadd.f32 %v658_v50, %v657_v48  ;;  %v761_v54 = vrot.slane %v760_v51, 2 }
 0x156   : > { %v660_v55 = vrot.slane %v659_v52, 1  ;;  %v762_v56 = vadd.f32 %v761_v54, %v760_v51 }
 0x158   : > { %v661_v10 = vadd.f32 %v660_v55, %v659_v52  ;;  %v763_v58 = vrot.slane %v762_v56, 1 }
 0x15a   : > { %663 = vst.msk [vmem:[%s203_s11] sm:$0x1] %vm662_vm2, %v661_v10  ;;  %v764_v49 = vadd.f32 %v763_v58, %v762_v56 }
 0x15c   : > { %765 = vst.msk [vmem:[%s203_s11 + $0x1] sm:$0x1] %vm662_vm2, %v764_v49 }
 0x15d PF: > { %p14_p9 = scmp.ge.s32.totalorder %s1155_s17, 4   ;;  %s1553_s12 = smov %s1100_s13 }
 0x15e   : > { %s1554_s13 = smov %s1104_s14  ;;  %s1555_s14 = smov %s1165_s20 }
 0x15f   : > { %s1556_s15 = smov %s1155_s17  ;;  %16 = sbr.rel (!%p14_p9) target bundleno = 3 (0x3), region = 80 }
 0x166   :  { %802 = vsyncpa [#allocation3], 1 }
 0x167   :  { %804 = vsyncpa [#allocation3 + $0x1], 1 }

// kernel: bottleneck.6
= control target key start
LH: loop header
LB: loop body
LE: loop exit
PB: predicated region body
PF: predicated region fallthrough
CT: control target
= control target key end

     0   :  { %s1179_s18 = smov 0   ;;  %s1556_s0 = inlined_call_operand.vmem [shape: f32[512,4], index: 0, kind: input, shape index: {}]   ;;  %s1557_s1 = inlined_call_operand.vmem [shape: f32[1,4], index: 1, kind: input, shape index: {}]   ;;  %s1558_s2 = inlined_call_operand.vmem [shape: f32[1,4], index: 2, kind: input, shape index: {}]   ;;  %s1559_s3 = inlined_call_operand.vmem [shape: f32[4,16], index: 3, kind: input, shape index: {}]   ;;  %s1560_s4 = inlined_call_operand.vmem [shape: f32[512,16], index: 4, kind: output, shape index: {0}]   ;;  %s1561_s5 = inlined_call_operand.vmem [shape: f32[2,2,16], index: 5, kind: output, shape index: {1}]  }
   0x1 LB: > { %s1185_s19 = sadd.s32 4294967295, %s1147_s18   ;;  %p1005_p0 = scmp.ge.s32.totalorder %s1147_s18, 1  ;;  %s1147_s18 = sphi %s1179_s18, %s16_s18  }
   0x2   : > { %p191_p1 = scmp.lt.s32.totalorder %s1147_s18, 3 }
   0x4   : > { %p192_p2 = pnand %p1005_p0, %p191_p1 }
   0x5   : > { %v381_v0 = vld [vmem:[%s1559_s3] sm:$0xf] (!%p192_p2)  ;;  %vm479_vm0 = vcmask (!%p192_p2), 1043456   ;;  %s1006_s22 = sshll.u32 (!%p192_p2), %s1185_s19, 5  ;;  %vm382_vm1 = vcmask (!%p192_p2), 31744   ;;  %vm708_vm2 = vcmask (!%p192_p2), 130048  }
   0x6   : > { %195 = sbr.rel (%p192_p2) target bundleno = 317 (0x13d), region = 36  ;;  %1081 = vmatprep.subr.msk.mxu0 (!%p192_p2), %vm479_vm0, %v381_v0  ;;  %p224_p3 = scmp.lt.s32.totalorder (!%p192_p2), %s1006_s22, 63  ;;  %1131 = vmatprep.subr.msk.mxu1 (!%p192_p2), %vm479_vm0, %v381_v0  ;;  %v1199_v1 = vld [vmem:[%s1557_s1] ss:$0 sm:$0xff] (!%p192_p2)  ;;  %vm810_vm3 = vcmask (!%p192_p2), 122880  }
   0x7   : > { %1082 = vmatpush3.msk.msra.mxu0 (!%p192_p2), %vm479_vm0, %v381_v0  ;;  %1132 = vmatpush3.msk.msra.mxu1 (!%p192_p2), %vm479_vm0, %v381_v0  ;;  %v1211_v2 = vld [vmem:[%s1558_s2] ss:$0 sm:$0xff] (!%p192_p2)  ;;  %p235_p4 = scmp.lt.s32.totalorder (!%p192_p2), %s1185_s19, 1 }
   0xd   : > { %s1563_s22 = smov (!%p224_p3, %s1006_s22), 63  ;;  %s1565_s19 = smov (!%p235_p4, %s1185_s19), 1 }
   0xe   : > { %s1007_s23 = sshll.u32 %s1563_s22, 3  ;;  %s1010_s9 = sshll.u32 %s1565_s19, 1 }
   0xf   : > { %s1206_s28 = scalar_lea.vmem %s1556_s0, %s1007_s23  ;;  %s1346_s8 = scalar_lea.vmem %s1560_s4, %s1007_s23 }
  0x10   : > { %v239_v3 = vld [vmem:[%s1206_s28] sm:$0xff]  ;;  %v240_v4 = vld [vmem:[%s1206_s28 + $0x8] sm:$0xff]  ;;  %v241_v5 = vld [vmem:[%s1206_s28 + $0x10] sm:$0xff]  ;;  %s238_s12 = scalar_lea.vmem %s1561_s5, %s1010_s9 }
  0x11   : > { %v278_v6 = vmul.f32 %v1199_v1, %v239_v3  ;;  %v279_v7 = vmul.f32 %v1199_v1, %v240_v4  ;;  %v280_v8 = vmul.f32 %v1199_v1, %v241_v5  ;;  %v242_v9 = vld [vmem:[%s1206_s28 + $0x18] sm:$0xff]  ;;  %v243_v10 = vld [vmem:[%s1206_s28 + $0x20] sm:$0xff]  ;;  %v244_v11 = vld [vmem:[%s1206_s28 + $0x28] sm:$0xff] }
  0x12   : > { %v281_v12 = vmul.f32 %v1199_v1, %v242_v9  ;;  %v282_v13 = vmul.f32 %v1199_v1, %v243_v10  ;;  %v245_v14 = vld [vmem:[%s1206_s28 + $0x30] sm:$0xff]  ;;  %v246_v15 = vld [vmem:[%s1206_s28 + $0x38] sm:$0xff]  ;;  %v283_v19 = vmul.f32 %v1199_v1, %v244_v11  ;;  %v247_v27 = vld [vmem:[%s1206_s28 + $0x40] sm:$0xff] }
  0x13   : > { %v317_v16 = vadd.f32 %v1211_v2, %v278_v6  ;;  %v318_v17 = vadd.f32 %v1211_v2, %v279_v7  ;;  %v319_v18 = vadd.f32 %v1211_v2, %v280_v8  ;;  %v284_v21 = vmul.f32 %v1199_v1, %v245_v14  ;;  %v248_v29 = vld [vmem:[%s1206_s28 + $0x48] sm:$0xff]  ;;  %v249_v34 = vld [vmem:[%s1206_s28 + $0x50] sm:$0xff]  ;;  %v250_v36 = vld [vmem:[%s1206_s28 + $0x58] sm:$0xff] }
  0x14   : > { %v320_v20 = vadd.f32 %v1211_v2, %v281_v12  ;;  %v285_v22 = vmul.f32 %v1199_v1, %v246_v15  ;;  %v321_v26 = vadd.f32 %v1211_v2, %v282_v13  ;;  %v322_v28 = vadd.f32 %v1211_v2, %v283_v19  ;;  %v255_v38 = vld [vmem:[%s1206_s28 + $0x80] sm:$0xff]  ;;  %v256_v39 = vld [vmem:[%s1206_s28 + $0x88] sm:$0xff]  ;;  %v257_v40 = vld [vmem:[%s1206_s28 + $0x90] sm:$0xff] }
  0x15   : > { %v349_v23 = vmax.f32 %v317_v16, 0.0  ;;  %v350_v24 = vmax.f32 %v318_v17, 0.0  ;;  %v351_v25 = vmax.f32 %v319_v18, 0.0  ;;  %v323_v31 = vadd.f32 %v1211_v2, %v284_v21  ;;  %v251_v42 = vld [vmem:[%s1206_s28 + $0x60] sm:$0xff]  ;;  %v258_v43 = vld [vmem:[%s1206_s28 + $0x98] sm:$0xff]  ;;  %v260_v53 = vld [vmem:[%s1206_s28 + $0xa8] sm:$0xff] }
  0x16   : > { %v352_v30 = vmax.f32 %v320_v20, 0.0  ;;  %v324_v32 = vadd.f32 %v1211_v2, %v285_v22  ;;  %v286_v33 = vmul.f32 %v1199_v1, %v247_v27  ;;  %v353_v35 = vmax.f32 %v321_v26, 0.0  ;;  %v259_v44 = vld [vmem:[%s1206_s28 + $0xa0] sm:$0xff]  ;;  %v261_v54 = vld [vmem:[%s1206_s28 + $0xb0] sm:$0xff]  ;;  %v252_v0 = vld [vmem:[%s1206_s28 + $0x68] sm:$0xff] }
  0x17   : > { %1083 = vmatprep.mubr.msk.f32.mxu0 %vm382_vm1, %v349_v23  ;;  %v287_v37 = vmul.f32 %v1199_v1, %v248_v29  ;;  %v288_v41 = vmul.f32 %v1199_v1, %v249_v34  ;;  %v354_v45 = vmax.f32 %v322_v28, 0.0  ;;  %v355_v46 = vmax.f32 %v323_v31, 0.0  ;;  %v253_v3 = vld [vmem:[%s1206_s28 + $0x70] sm:$0xff]  ;;  %v262_v11 = vld [vmem:[%s1206_s28 + $0xb8] sm:$0xff]  ;;  %v263_v12 = vld [vmem:[%s1206_s28 + $0xc0] sm:$0xff] }
  0x18   : > { %1084 = vmatmul.mubr.msk.f32.vlgmr.msra.gmra.mrb[0].mxu0 %vm382_vm1, %v350_v24  ;;  %v356_v47 = vmax.f32 %v324_v32, 0.0  ;;  %v325_v48 = vadd.f32 %v1211_v2, %v286_v33  ;;  %v289_v49 = vmul.f32 %v1199_v1, %v250_v36  ;;  %v294_v50 = vmul.f32 %v1199_v1, %v255_v38  ;;  %v254_v18 = vld [vmem:[%s1206_s28 + $0x78] sm:$0xff]  ;;  %v264_v26 = vld [vmem:[%s1206_s28 + $0xc8] sm:$0xff]  ;;  %v265_v27 = vld [vmem:[%s1206_s28 + $0xd0] sm:$0xff] }
  0x19   : > { %1086 = vmatprep.mubr.msk.f32.mxu0 %vm382_vm1, %v351_v25  ;;  %v295_v51 = vmul.f32 %v1199_v1, %v256_v39  ;;  %v296_v52 = vmul.f32 %v1199_v1, %v257_v40  ;;  %v326_v55 = vadd.f32 %v1211_v2, %v287_v37  ;;  %v290_v56 = vmul.f32 %v1199_v1, %v251_v42  ;;  %v266_v39 = vld [vmem:[%s1206_s28 + $0xd8] sm:$0xff]  ;;  %v267_v40 = vld [vmem:[%s1206_s28 + $0xe0] sm:$0xff] }
  0x1a   : > { %v297_v57 = vmul.f32 %v1199_v1, %v258_v43  ;;  %v298_v58 = vmul.f32 %v1199_v1, %v259_v44  ;;  %v327_v59 = vadd.f32 %v1211_v2, %v288_v41  ;;  %v333_v60 = vadd.f32 %v1211_v2, %v294_v50  ;;  %v268_v50 = vld [vmem:[%s1206_s28 + $0xe8] sm:$0xff] }
  0x1b   : > { %v334_v61 = vadd.f32 %v1211_v2, %v295_v51  ;;  %v335_v62 = vadd.f32 %v1211_v2, %v296_v52  ;;  %v357_v63 = vmax.f32 %v325_v48, 0.0  ;;  %v299_v5 = vmul.f32 %v1199_v1, %v260_v53  ;;  %v269_v51 = vld [vmem:[%s1206_s28 + $0xf0] sm:$0xff] }
  0x1c   : > { %1087 = vmatmul.mubr.msk.f32.gmra.mrb[2].mxu0 %vm382_vm1, %v352_v30  ;;  %v336_v4 = vadd.f32 %v1211_v2, %v297_v57  ;;  %v300_v6 = vmul.f32 %v1199_v1, %v261_v54  ;;  %v365_v7 = vmax.f32 %v333_v60, 0.0  ;;  %v337_v10 = vadd.f32 %v1211_v2, %v298_v58 }
  0x1d   : > { %1089 = vmatprep.mubr.msk.f32.mxu0 %vm382_vm1, %v353_v35  ;;  %v366_v8 = vmax.f32 %v334_v61, 0.0  ;;  %v367_v9 = vmax.f32 %v335_v62, 0.0  ;;  %v328_v13 = vadd.f32 %v1211_v2, %v289_v49  ;;  %v329_v14 = vadd.f32 %v1211_v2, %v290_v56 }
  0x1e   : > { %v291_v15 = vmul.f32 %v1199_v1, %v252_v0  ;;  %v292_v16 = vmul.f32 %v1199_v1, %v253_v3  ;;  %1107 = vmatprep.mubr.msk.f32.mxu1 %vm382_vm1, %v365_v7  ;;  %v358_v17 = vmax.f32 %v326_v55, 0.0  ;;  %v368_v19 = vmax.f32 %v336_v4, 0.0 }
  0x1f   : > { %1108 = vmatmul.mubr.msk.f32.vlgmr.msra.gmra.mrb[0].mxu1 %vm382_vm1, %v366_v8  ;;  %v338_v20 = vadd.f32 %v1211_v2, %v299_v5  ;;  %v301_v21 = vmul.f32 %v1199_v1, %v262_v11  ;;  %v359_v22 = vmax.f32 %v327_v59, 0.0  ;;  %v369_v23 = vmax.f32 %v337_v10, 0.0  ;;  %v270_v59 = vld [vmem:[%s1206_s28 + $0xf8] sm:$0xff] }
  0x20   : > { %1090 = vmatmul.mubr.msk.f32.gmra.mrb[4].mxu0 %vm382_vm1, %v354_v45  ;;  %1110 = vmatprep.mubr.msk.f32.mxu1 %vm382_vm1, %v367_v9  ;;  %v339_v24 = vadd.f32 %v1211_v2, %v300_v6  ;;  %v302_v25 = vmul.f32 %v1199_v1, %v263_v12  ;;  %v330_v28 = vadd.f32 %v1211_v2, %v291_v15  ;;  %v360_v31 = vmax.f32 %v328_v13, 0.0 }
  0x21   : > { %1092 = vmatprep.mubr.msk.f32.mxu0 %vm382_vm1, %v355_v46  ;;  %v331_v29 = vadd.f32 %v1211_v2, %v292_v16  ;;  %v293_v30 = vmul.f32 %v1199_v1, %v254_v18  ;;  %v370_v32 = vmax.f32 %v338_v20, 0.0  ;;  %v340_v33 = vadd.f32 %v1211_v2, %v301_v21 }
  0x22   : > { %v303_v34 = vmul.f32 %v1199_v1, %v264_v26  ;;  %v361_v35 = vmax.f32 %v329_v14, 0.0  ;;  %v371_v36 = vmax.f32 %v339_v24, 0.0  ;;  %v341_v37 = vadd.f32 %v1211_v2, %v302_v25 }
  0x23   : > { %1111 = vmatmul.mubr.msk.f32.gmra.mrb[2].mxu1 %vm382_vm1, %v368_v19  ;;  %v304_v38 = vmul.f32 %v1199_v1, %v265_v27  ;;  %v362_v41 = vmax.f32 %v330_v28, 0.0  ;;  %v332_v42 = vadd.f32 %v1211_v2, %v293_v30  ;;  %v372_v43 = vmax.f32 %v340_v33, 0.0 }
  0x24   : > { %1093 = vmatmul.mubr.msk.f32.gmra.mrb[6].mxu0 %vm382_vm1, %v356_v47  ;;  %1113 = vmatprep.mubr.msk.f32.mxu1 %vm382_vm1, %v369_v23  ;;  %v342_v44 = vadd.f32 %v1211_v2, %v303_v34  ;;  %v305_v45 = vmul.f32 %v1199_v1, %v266_v39  ;;  %v363_v46 = vmax.f32 %v331_v29, 0.0  ;;  %v373_v47 = vmax.f32 %v341_v37, 0.0 }
  0x25   : > { %1095 = vmatprep.mubr.msk.f32.mxu0 %vm382_vm1, %v357_v63  ;;  %v343_v48 = vadd.f32 %v1211_v2, %v304_v38  ;;  %v306_v49 = vmul.f32 %v1199_v1, %v267_v40  ;;  %v364_v52 = vmax.f32 %v332_v42, 0.0  ;;  %v307_v55 = vmul.f32 %v1199_v1, %v268_v50 }
  0x26   : > { %v374_v53 = vmax.f32 %v342_v44, 0.0  ;;  %v344_v54 = vadd.f32 %v1211_v2, %v305_v45  ;;  %v308_v58 = vmul.f32 %v1199_v1, %v269_v51  ;;  %v309_v62 = vmul.f32 %v1199_v1, %v270_v59 }
  0x27   : > { %1114 = vmatmul.mubr.msk.f32.gmra.mrb[4].mxu1 %vm382_vm1, %v370_v32  ;;  %v375_v56 = vmax.f32 %v343_v48, 0.0  ;;  %v345_v57 = vadd.f32 %v1211_v2, %v306_v49  ;;  %v346_v61 = vadd.f32 %v1211_v2, %v307_v55 }
  0x28   : > { %1096 = vmatmul.mubr.msk.f32.gmra.mrb[8].mxu0 %vm382_vm1, %v358_v17  ;;  %1116 = vmatprep.mubr.msk.f32.mxu1 %vm382_vm1, %v371_v36  ;;  %v376_v60 = vmax.f32 %v344_v54, 0.0  ;;  %v347_v0 = vadd.f32 %v1211_v2, %v308_v58  ;;  %v348_v4 = vadd.f32 %v1211_v2, %v309_v62 }
  0x29   : > { %1098 = vmatprep.mubr.msk.f32.mxu0 %vm382_vm1, %v359_v22  ;;  %v377_v63 = vmax.f32 %v345_v57, 0.0  ;;  %v378_v3 = vmax.f32 %v346_v61, 0.0 }
  0x2a   : > { %v379_v5 = vmax.f32 %v347_v0, 0.0  ;;  %v380_v6 = vmax.f32 %v348_v4, 0.0 }
  0x2b   : > { %1117 = vmatmul.mubr.msk.f32.gmra.mrb[6].mxu1 %vm382_vm1, %v372_v43 }
  0x2c   : > { %1099 = vmatmul.mubr.msk.f32.gmra.mrb[10].mxu0 %vm382_vm1, %v360_v31  ;;  %1119 = vmatprep.mubr.msk.f32.mxu1 %vm382_vm1, %v373_v47 }
  0x2d   : > { %1101 = vmatprep.mubr.msk.f32.mxu0 %vm382_vm1, %v361_v35 }
  0x2f   : > { %1120 = vmatmul.mubr.msk.f32.gmra.mrb[8].mxu1 %vm382_vm1, %v374_v53 }
  0x30   : > { %1102 = vmatmul.mubr.msk.f32.gmra.mrb[12].mxu0 %vm382_vm1, %v362_v41  ;;  %1122 = vmatprep.mubr.msk.f32.mxu1 %vm382_vm1, %v375_v56 }
  0x31   : > { %1104 = vmatprep.mubr.msk.f32.mxu0 %vm382_vm1, %v363_v46 }
  0x33   : > { %1123 = vmatmul.mubr.msk.f32.gmra.mrb[10].mxu1 %vm382_vm1, %v376_v60 }
  0x34   : > { %1105 = vmatmul.mubr.msk.f32.gmra.mrb[14].mxu0 %vm382_vm1, %v364_v52  ;;  %1125 = vmatprep.mubr.msk.f32.mxu1 %vm382_vm1, %v377_v63 }
  0x37   : > { %1126 = vmatmul.mubr.msk.f32.gmra.mrb[12].mxu1 %vm382_vm1, %v378_v3 }
  0x38   : > { %1128 = vmatprep.mubr.msk.f32.mxu1 %vm382_vm1, %v379_v5 }
  0x3b   : > { %1129 = vmatmul.mubr.msk.f32.gmra.mrb[14].mxu1 %vm382_vm1, %v380_v6 }
  0xeb   : > { %v1085_v1 = vpop.f32.mrb[0].mxu0 }
  0xec   : > { %710 = vst.msk [vmem:[%s1346_s8 + $0x8] sm:$0xff] %vm708_vm2, %v1085_v1  ;;  %v742_v2 = vsel %vm708_vm2, %v1085_v1, 0.0  ;;  %v813_v7 = vmul.f32 %v1085_v1, %v1085_v1  ;;  %v549_v8 = vpop.f32.mrb[1].mxu0 }
  0xed   : > { %709 = vst.msk [vmem:[%s1346_s8] sm:$0xff] %vm708_vm2, %v549_v8  ;;  %v741_v9 = vsel %vm708_vm2, %v549_v8, 0.0  ;;  %v812_v10 = vmul.f32 %v549_v8, %v549_v8 }
  0xee   : > { %v845_v11 = vsel %vm708_vm2, %v813_v7, 0.0  ;;  %v743_v12 = vadd.f32 %v742_v2, %v741_v9 }
  0xef   : > { %v844_v13 = vsel %vm708_vm2, %v812_v10, 0.0  ;;  %v1088_v14 = vpop.f32.mrb[2].mxu0 }
  0xf0   : > { %v846_v15 = vadd.f32 %v845_v11, %v844_v13  ;;  %712 = vst.msk [vmem:[%s1346_s8 + $0x18] sm:$0xff] %vm708_vm2, %v1088_v14  ;;  %v559_v16 = vpop.f32.mrb[3].mxu0  ;;  %v815_v17 = vmul.f32 %v1088_v14, %v1088_v14  ;;  %v746_v21 = vsel %vm708_vm2, %v1088_v14, 0.0 }
  0xf1   : > { %711 = vst.msk [vmem:[%s1346_s8 + $0x10] sm:$0xff] %vm708_vm2, %v559_v16  ;;  %v744_v18 = vsel %vm708_vm2, %v559_v16, 0.0  ;;  %v814_v19 = vmul.f32 %v559_v16, %v559_v16 }
  0xf2   : > { %v745_v20 = vadd.f32 %v744_v18, %v743_v12  ;;  %v849_v27 = vsel %vm708_vm2, %v815_v17, 0.0  ;;  %v1371_v36 = vpop.f32.mrb[0].mxu1 }
  0xf3   : > { %v847_v22 = vsel %vm708_vm2, %v814_v19, 0.0  ;;  %v1091_v23 = vpop.f32.mrb[4].mxu0  ;;  %726 = vst.msk [vmem:[%s1346_s8 + $0x88] sm:$0xff] %vm708_vm2, %v1371_v36  ;;  %v1378_v40 = vpop.f32.mrb[1].mxu1 }
  0xf4   : > { %v848_v24 = vadd.f32 %v847_v22, %v846_v15  ;;  %714 = vst.msk [vmem:[%s1346_s8 + $0x28] sm:$0xff] %vm708_vm2, %v1091_v23  ;;  %v569_v25 = vpop.f32.mrb[5].mxu0  ;;  %v747_v26 = vadd.f32 %v746_v21, %v745_v20  ;;  %v817_v28 = vmul.f32 %v1091_v23, %v1091_v23  ;;  %v750_v33 = vsel %vm708_vm2, %v1091_v23, 0.0  ;;  %725 = vst.msk [vmem:[%s1346_s8 + $0x80] sm:$0xff] %vm708_vm2, %v1378_v40 }
  0xf5   : > { %713 = vst.msk [vmem:[%s1346_s8 + $0x20] sm:$0xff] %vm708_vm2, %v569_v25  ;;  %v748_v29 = vsel %vm708_vm2, %v569_v25, 0.0  ;;  %v816_v30 = vmul.f32 %v569_v25, %v569_v25 }
  0xf6   : > { %v749_v31 = vadd.f32 %v748_v29, %v747_v26  ;;  %v850_v32 = vadd.f32 %v849_v27, %v848_v24  ;;  %v853_v41 = vsel %vm708_vm2, %v817_v28, 0.0  ;;  %v1389_v50 = vpop.f32.mrb[2].mxu1 }
  0xf7   : > { %v851_v34 = vsel %vm708_vm2, %v816_v30, 0.0  ;;  %v1094_v35 = vpop.f32.mrb[6].mxu0  ;;  %728 = vst.msk [vmem:[%s1346_s8 + $0x98] sm:$0xff] %vm708_vm2, %v1389_v50  ;;  %v1396_v54 = vpop.f32.mrb[3].mxu1 }
  0xf8   : > { %v852_v37 = vadd.f32 %v851_v34, %v850_v32  ;;  %716 = vst.msk [vmem:[%s1346_s8 + $0x38] sm:$0xff] %vm708_vm2, %v1094_v35  ;;  %v579_v38 = vpop.f32.mrb[7].mxu0  ;;  %v751_v39 = vadd.f32 %v750_v33, %v749_v31  ;;  %v819_v42 = vmul.f32 %v1094_v35, %v1094_v35  ;;  %v754_v47 = vsel %vm708_vm2, %v1094_v35, 0.0  ;;  %727 = vst.msk [vmem:[%s1346_s8 + $0x90] sm:$0xff] %vm708_vm2, %v1396_v54 }
  0xf9   : > { %715 = vst.msk [vmem:[%s1346_s8 + $0x30] sm:$0xff] %vm708_vm2, %v579_v38  ;;  %v752_v43 = vsel %vm708_vm2, %v579_v38, 0.0  ;;  %v818_v44 = vmul.f32 %v579_v38, %v579_v38  ;;  %v828_v32 = vmul.f32 %v1378_v40, %v1378_v40 }
  0xfa   : > { %v753_v45 = vadd.f32 %v752_v43, %v751_v39  ;;  %v854_v46 = vadd.f32 %v853_v41, %v852_v37  ;;  %v857_v55 = vsel %vm708_vm2, %v819_v42, 0.0  ;;  %v1407_v0 = vpop.f32.mrb[4].mxu1 }
  0xfb   : > { %v855_v48 = vsel %vm708_vm2, %v818_v44, 0.0  ;;  %v1097_v49 = vpop.f32.mrb[8].mxu0  ;;  %730 = vst.msk [vmem:[%s1346_s8 + $0xa8] sm:$0xff] %vm708_vm2, %v1407_v0  ;;  %v1414_v6 = vpop.f32.mrb[5].mxu1  ;;  %v772_v44 = vsel %vm708_vm2, %v1378_v40, 0.0  ;;  %v830_v40 = vmul.f32 %v1396_v54, %v1396_v54 }
  0xfc   : > { %v856_v51 = vadd.f32 %v855_v48, %v854_v46  ;;  %718 = vst.msk [vmem:[%s1346_s8 + $0x48] sm:$0xff] %vm708_vm2, %v1097_v49  ;;  %v589_v52 = vpop.f32.mrb[9].mxu0  ;;  %v755_v53 = vadd.f32 %v754_v47, %v753_v45  ;;  %v821_v56 = vmul.f32 %v1097_v49, %v1097_v49  ;;  %v758_v61 = vsel %vm708_vm2, %v1097_v49, 0.0  ;;  %729 = vst.msk [vmem:[%s1346_s8 + $0xa0] sm:$0xff] %vm708_vm2, %v1414_v6 }
  0xfd   : > { %717 = vst.msk [vmem:[%s1346_s8 + $0x40] sm:$0xff] %vm708_vm2, %v589_v52  ;;  %v756_v57 = vsel %vm708_vm2, %v589_v52, 0.0  ;;  %v820_v58 = vmul.f32 %v589_v52, %v589_v52  ;;  %v875_v52 = vsel %vm708_vm2, %v828_v32, 0.0 }
  0xfe   : > { %v757_v59 = vadd.f32 %v756_v57, %v755_v53  ;;  %v858_v60 = vadd.f32 %v857_v55, %v856_v51  ;;  %v861_v1 = vsel %vm708_vm2, %v821_v56, 0.0  ;;  %v1425_v14 = vpop.f32.mrb[6].mxu1  ;;  %v829_v51 = vmul.f32 %v1371_v36, %v1371_v36 }
  0xff   : > { %v859_v62 = vsel %vm708_vm2, %v820_v58, 0.0  ;;  %v1100_v63 = vpop.f32.mrb[10].mxu0  ;;  %732 = vst.msk [vmem:[%s1346_s8 + $0xb8] sm:$0xff] %vm708_vm2, %v1425_v14  ;;  %v1432_v18 = vpop.f32.mrb[7].mxu1  ;;  %v774_v56 = vsel %vm708_vm2, %v1371_v36, 0.0  ;;  %v776_v57 = vsel %vm708_vm2, %v1396_v54, 0.0  ;;  %v832_v36 = vmul.f32 %v1414_v6, %v1414_v6 }
 0x100   : > { %v860_v3 = vadd.f32 %v859_v62, %v858_v60  ;;  %720 = vst.msk [vmem:[%s1346_s8 + $0x58] sm:$0xff] %vm708_vm2, %v1100_v63  ;;  %v599_v4 = vpop.f32.mrb[11].mxu0  ;;  %v759_v5 = vadd.f32 %v758_v61, %v757_v59  ;;  %v823_v2 = vmul.f32 %v1100_v63, %v1100_v63  ;;  %v762_v11 = vsel %vm708_vm2, %v1100_v63, 0.0  ;;  %731 = vst.msk [vmem:[%s1346_s8 + $0xb0] sm:$0xff] %vm708_vm2, %v1432_v18 }
 0x101   : > { %719 = vst.msk [vmem:[%s1346_s8 + $0x50] sm:$0xff] %vm708_vm2, %v599_v4  ;;  %v760_v7 = vsel %vm708_vm2, %v599_v4, 0.0  ;;  %v822_v8 = vmul.f32 %v599_v4, %v599_v4  ;;  %v877_v62 = vsel %vm708_vm2, %v829_v51, 0.0  ;;  %v831_v63 = vmul.f32 %v1389_v50, %v1389_v50 }
 0x102   : > { %v761_v9 = vadd.f32 %v760_v7, %v759_v5  ;;  %v862_v10 = vadd.f32 %v861_v1, %v860_v3  ;;  %v865_v19 = vsel %vm708_vm2, %v823_v2, 0.0  ;;  %v1443_v28 = vpop.f32.mrb[8].mxu1  ;;  %v879_v3 = vsel %vm708_vm2, %v830_v40, 0.0 }
 0x103   : > { %v863_v12 = vsel %vm708_vm2, %v822_v8, 0.0  ;;  %v1103_v13 = vpop.f32.mrb[12].mxu0  ;;  %734 = vst.msk [vmem:[%s1346_s8 + $0xc8] sm:$0xff] %vm708_vm2, %v1443_v28  ;;  %v1452_v33 = vpop.f32.mrb[9].mxu1  ;;  %v778_v5 = vsel %vm708_vm2, %v1389_v50, 0.0  ;;  %v780_v1 = vsel %vm708_vm2, %v1414_v6, 0.0  ;;  %v834_v50 = vmul.f32 %v1432_v18, %v1432_v18 }
 0x104   : > { %v864_v15 = vadd.f32 %v863_v12, %v862_v10  ;;  %722 = vst.msk [vmem:[%s1346_s8 + $0x68] sm:$0xff] %vm708_vm2, %v1103_v13  ;;  %v609_v16 = vpop.f32.mrb[13].mxu0  ;;  %v763_v17 = vadd.f32 %v762_v11, %v761_v9  ;;  %v825_v20 = vmul.f32 %v1103_v13, %v1103_v13  ;;  %v766_v25 = vsel %vm708_vm2, %v1103_v13, 0.0  ;;  %733 = vst.msk [vmem:[%s1346_s8 + $0xc0] sm:$0xff] %vm708_vm2, %v1452_v33 }
 0x105   : > { %721 = vst.msk [vmem:[%s1346_s8 + $0x60] sm:$0xff] %vm708_vm2, %v609_v16  ;;  %v764_v21 = vsel %vm708_vm2, %v609_v16, 0.0  ;;  %v824_v22 = vmul.f32 %v609_v16, %v609_v16  ;;  %v881_v11 = vsel %vm708_vm2, %v831_v63, 0.0  ;;  %v833_v12 = vmul.f32 %v1407_v0, %v1407_v0 }
 0x106   : > { %v765_v23 = vadd.f32 %v764_v21, %v763_v17  ;;  %v866_v24 = vadd.f32 %v865_v19, %v864_v15  ;;  %v869_v34 = vsel %vm708_vm2, %v825_v20, 0.0  ;;  %v1465_v45 = vpop.f32.mrb[10].mxu1  ;;  %v883_v13 = vsel %vm708_vm2, %v832_v36, 0.0 }
 0x107   : > { %v867_v26 = vsel %vm708_vm2, %v824_v22, 0.0  ;;  %v1106_v27 = vpop.f32.mrb[14].mxu0  ;;  %736 = vst.msk [vmem:[%s1346_s8 + $0xd8] sm:$0xff] %vm708_vm2, %v1465_v45  ;;  %v679_v48 = vpop.f32.mrb[11].mxu1  ;;  %v782_v17 = vsel %vm708_vm2, %v1407_v0, 0.0  ;;  %v784_v19 = vsel %vm708_vm2, %v1432_v18, 0.0  ;;  %v837_v32 = vmul.f32 %v1443_v28, %v1443_v28 }
 0x108   : > { %v868_v29 = vadd.f32 %v867_v26, %v866_v24  ;;  %724 = vst.msk [vmem:[%s1346_s8 + $0x78] sm:$0xff] %vm708_vm2, %v1106_v27  ;;  %v619_v30 = vpop.f32.mrb[15].mxu0  ;;  %v767_v31 = vadd.f32 %v766_v25, %v765_v23  ;;  %v827_v35 = vmul.f32 %v1106_v27, %v1106_v27  ;;  %v770_v42 = vsel %vm708_vm2, %v1106_v27, 0.0  ;;  %735 = vst.msk [vmem:[%s1346_s8 + $0xd0] sm:$0xff] %vm708_vm2, %v679_v48 }
 0x109   : > { %723 = vst.msk [vmem:[%s1346_s8 + $0x70] sm:$0xff] %vm708_vm2, %v619_v30  ;;  %v768_v37 = vsel %vm708_vm2, %v619_v30, 0.0  ;;  %v826_v38 = vmul.f32 %v619_v30, %v619_v30  ;;  %v885_v22 = vsel %vm708_vm2, %v833_v12, 0.0  ;;  %v835_v23 = vmul.f32 %v1425_v14, %v1425_v14 }
 0x10a   : > { %v769_v39 = vadd.f32 %v768_v37, %v767_v31  ;;  %v870_v41 = vadd.f32 %v869_v34, %v868_v29  ;;  %v873_v49 = vsel %vm708_vm2, %v827_v35, 0.0  ;;  %v1482_v58 = vpop.f32.mrb[12].mxu1  ;;  %v887_v24 = vsel %vm708_vm2, %v834_v50, 0.0 }
 0x10b   : > { %v871_v43 = vsel %vm708_vm2, %v826_v38, 0.0  ;;  %738 = vst.msk [vmem:[%s1346_s8 + $0xe8] sm:$0xff] %vm708_vm2, %v1482_v58  ;;  %v689_v61 = vpop.f32.mrb[13].mxu1  ;;  %v836_v25 = vmul.f32 %v1452_v33, %v1452_v33  ;;  %v786_v0 = vsel %vm708_vm2, %v1425_v14, 0.0  ;;  %v788_v18 = vsel %vm708_vm2, %v1452_v33, 0.0 }
 0x10c   : > { %v771_v46 = vadd.f32 %v770_v42, %v769_v39  ;;  %v872_v47 = vadd.f32 %v871_v43, %v870_v41  ;;  %737 = vst.msk [vmem:[%s1346_s8 + $0xe0] sm:$0xff] %vm708_vm2, %v689_v61  ;;  %v889_v31 = vsel %vm708_vm2, %v835_v23, 0.0  ;;  %v838_v35 = vmul.f32 %v679_v48, %v679_v48 }
 0x10d   : > { %v891_v34 = vsel %vm708_vm2, %v836_v25, 0.0  ;;  %v790_v39 = vsel %vm708_vm2, %v1443_v28, 0.0  ;;  %v792_v14 = vsel %vm708_vm2, %v679_v48, 0.0  ;;  %v893_v33 = vsel %vm708_vm2, %v837_v32, 0.0 }
 0x10e   : > { %v874_v53 = vadd.f32 %v873_v49, %v872_v47  ;;  %v773_v55 = vadd.f32 %v772_v44, %v771_v46  ;;  %v1130_v2 = vpop.f32.mrb[14].mxu1  ;;  %v839_v43 = vmul.f32 %v1465_v45, %v1465_v45  ;;  %v895_v44 = vsel %vm708_vm2, %v838_v35, 0.0 }
 0x10f   : > { %740 = vst.msk [vmem:[%s1346_s8 + $0xf8] sm:$0xff] %vm708_vm2, %v1130_v2  ;;  %v843_v9 = vmul.f32 %v1130_v2, %v1130_v2  ;;  %v699_v10 = vpop.f32.mrb[15].mxu1  ;;  %v840_v46 = vmul.f32 %v689_v61, %v689_v61  ;;  %v794_v51 = vsel %vm708_vm2, %v1465_v45, 0.0 }
 0x110   : > { %v876_v59 = vadd.f32 %v875_v52, %v874_v53  ;;  %v775_v60 = vadd.f32 %v774_v56, %v773_v55  ;;  %739 = vst.msk [vmem:[%s1346_s8 + $0xf0] sm:$0xff] %vm708_vm2, %v699_v10  ;;  %v796_v52 = vsel %vm708_vm2, %v689_v61, 0.0  ;;  %v897_v48 = vsel %vm708_vm2, %v839_v43, 0.0 }
 0x111   : > { %v905_v16 = vsel %vm708_vm2, %v843_v9, 0.0  ;;  %v841_v53 = vmul.f32 %v1482_v58, %v1482_v58  ;;  %v899_v55 = vsel %vm708_vm2, %v840_v46, 0.0  ;;  %v842_v56 = vmul.f32 %v699_v10, %v699_v10 }
 0x112   : > { %v777_v54 = vadd.f32 %v776_v57, %v775_v60  ;;  %v878_v4 = vadd.f32 %v877_v62, %v876_v59  ;;  %v798_v60 = vsel %vm708_vm2, %v1482_v58, 0.0  ;;  %v800_v45 = vsel %vm708_vm2, %v699_v10, 0.0 }
 0x113   : > { %v901_v63 = vsel %vm708_vm2, %v841_v53, 0.0 }
 0x114   : > { %v880_v7 = vadd.f32 %v879_v3, %v878_v4  ;;  %v779_v8 = vadd.f32 %v778_v5, %v777_v54  ;;  %v903_v3 = vsel %vm708_vm2, %v842_v56, 0.0  ;;  %v802_v4 = vsel %vm708_vm2, %v1130_v2, 0.0 }
 0x116   : > { %v781_v6 = vadd.f32 %v780_v1, %v779_v8  ;;  %v882_v15 = vadd.f32 %v881_v11, %v880_v7 }
 0x118   : > { %v884_v20 = vadd.f32 %v883_v13, %v882_v15  ;;  %v783_v21 = vadd.f32 %v782_v17, %v781_v6 }
 0x11a   : > { %v785_v26 = vadd.f32 %v784_v19, %v783_v21  ;;  %v886_v27 = vadd.f32 %v885_v22, %v884_v20 }
 0x11c   : > { %v888_v29 = vadd.f32 %v887_v24, %v886_v27  ;;  %v787_v30 = vadd.f32 %v786_v0, %v785_v26 }
 0x11e   : > { %v789_v37 = vadd.f32 %v788_v18, %v787_v30  ;;  %v890_v38 = vadd.f32 %v889_v31, %v888_v29 }
 0x120   : > { %v892_v41 = vadd.f32 %v891_v34, %v890_v38  ;;  %v791_v42 = vadd.f32 %v790_v39, %v789_v37 }
 0x122   : > { %v793_v47 = vadd.f32 %v792_v14, %v791_v42  ;;  %v894_v49 = vadd.f32 %v893_v33, %v892_v41 }
 0x124   : > { %v896_v28 = vadd.f32 %v895_v44, %v894_v49  ;;  %v795_v40 = vadd.f32 %v794_v51, %v793_v47 }
 0x126   : > { %v797_v57 = vadd.f32 %v796_v52, %v795_v40  ;;  %v898_v59 = vadd.f32 %v897_v48, %v896_v28 }
 0x128   : > { %v900_v61 = vadd.f32 %v899_v55, %v898_v59  ;;  %v799_v62 = vadd.f32 %v798_v60, %v797_v57 }
 0x12a   : > { %v801_v36 = vadd.f32 %v800_v45, %v799_v62  ;;  %v902_v54 = vadd.f32 %v901_v63, %v900_v61 }
 0x12c   : > { %v803_v5 = vadd.f32 %v802_v4, %v801_v36  ;;  %v904_v1 = vadd.f32 %v903_v3, %v902_v54 }
 0x12e   : > { %v804_v7 = vrot.slane %v803_v5, 4  ;;  %v906_v8 = vadd.f32 %v905_v16, %v904_v1 }
 0x130   : > { %v805_v9 = vadd.f32 %v804_v7, %v803_v5  ;;  %v907_v58 = vrot.slane %v906_v8, 4 }
 0x132   : > { %v806_v11 = vrot.slane %v805_v9, 2  ;;  %v908_v10 = vadd.f32 %v907_v58, %v906_v8 }
 0x134   : > { %v807_v12 = vadd.f32 %v806_v11, %v805_v9  ;;  %v909_v13 = vrot.slane %v908_v10, 2 }
 0x136   : > { %v808_v50 = vrot.slane %v807_v12, 1  ;;  %v910_v6 = vadd.f32 %v909_v13, %v908_v10 }
 0x138   : > { %v809_v2 = vadd.f32 %v808_v50, %v807_v12  ;;  %v911_v15 = vrot.slane %v910_v6, 1 }
 0x13a   : > { %811 = vst.msk [vmem:[%s238_s12] sm:$0x1] %vm810_vm3, %v809_v2  ;;  %v912_v17 = vadd.f32 %v911_v15, %v910_v6 }
 0x13c   : > { %913 = vst.msk [vmem:[%s238_s12 + $0x1] sm:$0x1] %vm810_vm3, %v912_v17 }
 0x13d PF: > { %s16_s18 = sadd.s32 1, %s1147_s18  }
 0x13e   : > { %p13_p5 = scmp.ge.s32.totalorder %s16_s18, 4  }
 0x140   :  { %15 = sbr.rel (!%p13_p5) target bundleno = 1 (0x1), region = 78 }

// kernel: bottleneck.7
= control target key start
LH: loop header
LB: loop body
LE: loop exit
PB: predicated region body
PF: predicated region fallthrough
CT: control target
= control target key end

     0   :  { %s413_s15 = smov 0   ;;  %s439_s0 = inlined_call_operand.vmem [shape: f32[32,256], index: 0, kind: input, shape index: {}]   ;;  %s440_s1 = inlined_call_operand.vmem [shape: f32[32,256], index: 1, kind: input, shape index: {}]   ;;  %s441_s2 = inlined_call_operand.vmem [shape: f32[1,256], index: 2, kind: input, shape index: {}]   ;;  %s442_s3 = inlined_call_operand.vmem [shape: f32[1,256], index: 3, kind: input, shape index: {}]   ;;  %s443_s4 = inlined_call_operand.vmem [shape: f32[32,256], index: 4, kind: output, shape index: {}]  }
   0x1 LB: > { %s353_s16 = sadd.s32 4294967295, %s386_s15   ;;  %p357_p0 = scmp.ge.s32.totalorder %s386_s15, 1  ;;  %s386_s15 = sphi %s413_s15, %s14_s15  }
   0x2   : > { %p176_p1 = scmp.lt.s32.totalorder %s386_s15, 3 }
   0x4   : > { %p177_p2 = pnand %p357_p0, %p176_p1 }
   0x5   : > { %s358_s17 = sshll.u32 (!%p177_p2), %s353_s16, 1  ;;  %v237_v0 = vlaneseq (!%p177_p2)  ;;  %v235_v2 = vld [vmem:[%s441_s2] sm:$0x3] (!%p177_p2) }
   0x6   : > { %180 = sbr.rel (%p177_p2) target bundleno = 27 (0x1b), region = 36  ;;  %p211_p3 = scmp.lt.s32.totalorder (!%p177_p2), %s358_s17, 3  ;;  %v251_v3 = vld [vmem:[%s442_s3] sm:$0x3] (!%p177_p2) }
   0x7   : > { %v238_v1 = vshrl.u32 (!%p177_p2), %v237_v0, 7 }
   0x9   : > { %v239_v4 = vsub.s32 (!%p177_p2), 0, %v238_v1  ;;  %v243_v5 = vsub.s32 (!%p177_p2), 1, %v238_v1 }
   0xb   : > { %v240_v6 = vrot.slane (!%p177_p2), %v235_v2, %v239_v4  ;;  %v256_v7 = vrot.slane (!%p177_p2), %v251_v3, %v239_v4  ;;  %v244_v8 = vrot.slane (!%p177_p2), %v235_v2, %v243_v5  ;;  %v260_v9 = vrot.slane (!%p177_p2), %v251_v3, %v243_v5 }
   0xd   : > { %s445_s17 = smov (!%p211_p3, %s358_s17), 3 }
   0xe   : > { %s369_s22 = sshll.u32 %s445_s17, 4 }
   0xf   : > { %s215_s25 = scalar_lea.vmem %s439_s0, %s369_s22  ;;  %s222_s28 = scalar_lea.vmem %s440_s1, %s369_s22 }
  0x10   : > { %v231_v10 = vld [vmem:[%s215_s25] sm:$0xff]  ;;  %v232_v11 = vld [vmem:[%s215_s25 + $0x8] sm:$0xff]  ;;  %v233_v14 = vld [vmem:[%s215_s25 + $0x10] sm:$0xff]  ;;  %s229_s5 = scalar_lea.vmem %s443_s4, %s369_s22 }
  0x11   : > { %v247_v12 = vmul.f32 %v240_v6, %v231_v10  ;;  %v248_v13 = vmul.f32 %v244_v8, %v232_v11  ;;  %v267_v15 = vld [vmem:[%s222_s28] sm:$0xff]  ;;  %v268_v16 = vld [vmem:[%s222_s28 + $0x8] sm:$0xff]  ;;  %v249_v17 = vmul.f32 %v240_v6, %v233_v14  ;;  %v234_v18 = vld [vmem:[%s215_s25 + $0x18] sm:$0xff] }
  0x12   : > { %v269_v21 = vld [vmem:[%s222_s28 + $0x10] sm:$0xff]  ;;  %v250_v22 = vmul.f32 %v244_v8, %v234_v18  ;;  %v270_v24 = vld [vmem:[%s222_s28 + $0x18] sm:$0xff] }
  0x13   : > { %v263_v19 = vadd.f32 %v256_v7, %v247_v12  ;;  %v264_v20 = vadd.f32 %v260_v9, %v248_v13  ;;  %v265_v23 = vadd.f32 %v256_v7, %v249_v17 }
  0x14   : > { %v266_v27 = vadd.f32 %v260_v9, %v250_v22 }
  0x15   : > { %v271_v25 = vadd.f32 %v267_v15, %v263_v19  ;;  %v272_v26 = vadd.f32 %v268_v16, %v264_v20  ;;  %v273_v28 = vadd.f32 %v269_v21, %v265_v23 }
  0x16   : > { %v274_v31 = vadd.f32 %v270_v24, %v266_v27 }
  0x17   : > { %v275_v29 = vmax.f32 %v271_v25, 0.0  ;;  %v276_v30 = vmax.f32 %v272_v26, 0.0  ;;  %v277_v32 = vmax.f32 %v273_v28, 0.0 }
  0x18   : > { %v278_v33 = vmax.f32 %v274_v31, 0.0 }
  0x19   : > { %279 = vst [vmem:[%s229_s5] sm:$0xff] %v275_v29  ;;  %280 = vst [vmem:[%s229_s5 + $0x8] sm:$0xff] %v276_v30 }
  0x1a   : > { %281 = vst [vmem:[%s229_s5 + $0x10] sm:$0xff] %v277_v32  ;;  %282 = vst [vmem:[%s229_s5 + $0x18] sm:$0xff] %v278_v33 }
  0x1b PF: > { %s14_s15 = sadd.s32 1, %s386_s15  }
  0x1c   : > { %p11_p4 = scmp.ge.s32.totalorder %s14_s15, 4  }
  0x1e   :  { %13 = sbr.rel (!%p11_p4) target bundleno = 1 (0x1), region = 69 }

// kernel: bottleneck.5
= control target key start
LH: loop header
LB: loop body
LE: loop exit
PB: predicated region body
PF: predicated region fallthrough
CT: control target
= control target key end

     0   :  { %s2939_s18 = smov 0   ;;  %s4112_s0 = inlined_call_operand.vmem [shape: f32[2,16,16,4], index: 0, kind: input, shape index: {}]   ;;  %s4113_s1 = inlined_call_operand.vmem [shape: f32[1,4], index: 1, kind: input, shape index: {}]   ;;  %s4114_s2 = inlined_call_operand.vmem [shape: f32[1,4], index: 2, kind: input, shape index: {}]   ;;  %s4115_s3 = inlined_call_operand.vmem [shape: f32[36,4], index: 3, kind: input, shape index: {}]   ;;  %s4116_s4 = inlined_call_operand.vmem [shape: f32[2,16,16,4], index: 4, kind: output, shape index: {0}]   ;;  %s4117_s5 = inlined_call_operand.vmem [shape: f32[2,2,4], index: 5, kind: output, shape index: {1}]  }
   0x1 LB: > { %s2715_s19 = sadd.s32 4294967295, %s2898_s18   ;;  %p2719_p0 = scmp.ge.s32.totalorder %s2898_s18, 1  ;;  %s2898_s18 = sphi %s2939_s18, %s16_s18  }
   0x2   : > { %p190_p1 = scmp.lt.s32.totalorder %s2898_s18, 3 }
   0x4   : > { %p191_p2 = pnand %p2719_p0, %p190_p1 }
   0x5   : > { %vm378_vm0 = vcmask (!%p191_p2), 31744   ;;  %vm381_vm1 = vcmask (!%p191_p2), 25600   ;;  %p2949_p3 = scmp.lt.s32.totalorder (!%p191_p2), %s2715_s19, 1  ;;  %vm388_vm2 = vcmask (!%p191_p2), 24576   ;;  %v2900_v0 = vmov (!%p191_p2), 0.0   ;;  %s2901_s29 = smov (!%p191_p2), 4  }
   0x6   : > { %194 = sbr.rel (%p191_p2) target bundleno = 897 (0x381), region = 36  ;;  %379 = vst.msk [vmem:[#allocation2] sm:$0xff] (!%p191_p2), %vm378_vm0, %v2900_v0  ;;  %380 = vst.msk [vmem:[#allocation2 + $0x8] sm:$0xff] (!%p191_p2), %vm378_vm0, %v2900_v0  ;;  %v2999_v1 = vld [vmem:[%s4113_s1] ss:$0 sm:$0xff] (!%p191_p2)  ;;  %s2902_s30 = smov (!%p191_p2), 8  }
   0x7   : > { %384 = vst.msk [vmem:[#allocation2 + $0x198] sm:$0xff] (!%p191_p2), %vm378_vm0, %v2900_v0  ;;  %385 = vst.msk [vmem:[#allocation2 + $0x1a0] sm:$0xff] (!%p191_p2), %vm378_vm0, %v2900_v0  ;;  %v3011_v2 = vld [vmem:[%s4114_s2] ss:$0 sm:$0xff] (!%p191_p2)  ;;  %vm677_vm3 = vcmask (!%p191_p2), 64544   ;;  %s2903_s6 = smov (!%p191_p2), 12  }
   0x8   : > { %382 = vst.msk [vmem:[#allocation2 + $0x10] sm:$0x3] (!%p191_p2), %vm381_vm1, %v2900_v0  ;;  %386 = vst.msk [vmem:[#allocation2 + $0x1a8] sm:$0x3] (!%p191_p2), %vm381_vm1, %v2900_v0  ;;  %s2904_s7 = smov (!%p191_p2), 16   ;;  %s2905_s8 = smov (!%p191_p2), 20  }
   0x9   : > { %405 = vst.msk [vmem:[#allocation2 + $0x29] sm:$0x1] (!%p191_p2), %vm388_vm2, %v2900_v0  ;;  %389 = vst.msk [vmem:[#allocation2 + $0x18] sm:$0x1] (!%p191_p2), %vm388_vm2, %v2900_v0  ;;  %s2906_s9 = smov (!%p191_p2), 24   ;;  %s2907_s20 = smov (!%p191_p2), 28  }
   0xa   : > { %390 = vst.msk [vmem:[#allocation2 + $0x30] sm:$0x1] (!%p191_p2), %vm388_vm2, %v2900_v0  ;;  %391 = vst.msk [vmem:[#allocation2 + $0x48] sm:$0x1] (!%p191_p2), %vm388_vm2, %v2900_v0  ;;  %s2908_s22 = smov (!%p191_p2), 32   ;;  %vm2196_vm4 = vcmask (!%p191_p2), 1043456  }
   0xb   : > { %392 = vst.msk [vmem:[#allocation2 + $0x60] sm:$0x1] (!%p191_p2), %vm388_vm2, %v2900_v0  ;;  %393 = vst.msk [vmem:[#allocation2 + $0x78] sm:$0x1] (!%p191_p2), %vm388_vm2, %v2900_v0  ;;  %vm870_vm5 = vcmask (!%p191_p2), 97344   ;;  %vm1063_vm6 = vcmask (!%p191_p2), 130144  }
   0xc   : > { %394 = vst.msk [vmem:[#allocation2 + $0x90] sm:$0x1] (!%p191_p2), %vm388_vm2, %v2900_v0  ;;  %395 = vst.msk [vmem:[#allocation2 + $0xa8] sm:$0x1] (!%p191_p2), %vm388_vm2, %v2900_v0  ;;  %vm1256_vm7 = vcmask (!%p191_p2), 162944   ;;  %vm1449_vm8 = vcmask (!%p191_p2), 195744  }
   0xd   : > { %396 = vst.msk [vmem:[#allocation2 + $0xc0] sm:$0x1] %vm388_vm2, %v2900_v0  ;;  %397 = vst.msk [vmem:[#allocation2 + $0xd8] sm:$0x1] %vm388_vm2, %v2900_v0  ;;  %s4120_s19 = smov (!%p2949_p3, %s2715_s19), 1  ;;  %v517_v12 = vld [vmem:[#allocation2 + $0x1] sm:$0xff] }
   0xe   : > { %398 = vst.msk [vmem:[#allocation2 + $0xf0] sm:$0x1] %vm388_vm2, %v2900_v0  ;;  %399 = vst.msk [vmem:[#allocation2 + $0x108] sm:$0x1] %vm388_vm2, %v2900_v0  ;;  %s2762_s21 = sshll.u32 %s4120_s19, 8  ;;  %581 = vrot.lane.b32.xlu0 %v517_v12, %s2901_s29  ;;  %vm1643_vm9 = vcmask 228544  }
   0xf   : > { %400 = vst.msk [vmem:[#allocation2 + $0x120] sm:$0x1] %vm388_vm2, %v2900_v0  ;;  %401 = vst.msk [vmem:[#allocation2 + $0x138] sm:$0x1] %vm388_vm2, %v2900_v0  ;;  %s3006_s26 = scalar_lea.vmem %s4112_s0, %s2762_s21  ;;  %v518_v17 = vld [vmem:[#allocation2 + $0x9] sm:$0xff]  ;;  %vm1836_vm10 = vcmask 261344  }
  0x10   : > { %402 = vst.msk [vmem:[#allocation2 + $0x150] sm:$0x1] %vm388_vm2, %v2900_v0  ;;  %403 = vst.msk [vmem:[#allocation2 + $0x168] sm:$0x1] %vm388_vm2, %v2900_v0  ;;  %v236_v3 = vld [vmem:[%s3006_s26] sm:$0xff]  ;;  %v238_v4 = vld [vmem:[%s3006_s26 + $0x10] sm:$0xff] }
  0x11   : > { %404 = vst.msk [vmem:[#allocation2 + $0x180] sm:$0x1] %vm388_vm2, %v2900_v0  ;;  %406 = vst.msk [vmem:[#allocation2 + $0x41] sm:$0x1] %vm388_vm2, %v2900_v0  ;;  %v237_v5 = vld [vmem:[%s3006_s26 + $0x8] sm:$0xff]  ;;  %v275_v6 = vmul.f32 %v2999_v1, %v236_v3  ;;  %v277_v7 = vmul.f32 %v2999_v1, %v238_v4  ;;  %v240_v9 = vld [vmem:[%s3006_s26 + $0x20] sm:$0xff] }
  0x12   : > { %407 = vst.msk [vmem:[#allocation2 + $0x59] sm:$0x1] %vm388_vm2, %v2900_v0  ;;  %408 = vst.msk [vmem:[#allocation2 + $0x71] sm:$0x1] %vm388_vm2, %v2900_v0  ;;  %v276_v8 = vmul.f32 %v2999_v1, %v237_v5  ;;  %v239_v10 = vld [vmem:[%s3006_s26 + $0x18] sm:$0xff]  ;;  %v242_v11 = vld [vmem:[%s3006_s26 + $0x30] sm:$0xff]  ;;  %v279_v13 = vmul.f32 %v2999_v1, %v240_v9  ;;  %583 = vrot.lane.b32.xlu0 %v518_v17, %s2901_s29 }
  0x13   : > { %409 = vst.msk [vmem:[#allocation2 + $0x89] sm:$0x1] %vm388_vm2, %v2900_v0  ;;  %410 = vst.msk [vmem:[#allocation2 + $0xa1] sm:$0x1] %vm388_vm2, %v2900_v0  ;;  %v278_v14 = vmul.f32 %v2999_v1, %v239_v10  ;;  %v281_v15 = vmul.f32 %v2999_v1, %v242_v11  ;;  %v241_v16 = vld [vmem:[%s3006_s26 + $0x28] sm:$0xff]  ;;  %v314_v18 = vadd.f32 %v3011_v2, %v275_v6  ;;  %v244_v22 = vld [vmem:[%s3006_s26 + $0x40] sm:$0xff] }
  0x14   : > { %411 = vst.msk [vmem:[#allocation2 + $0xb9] sm:$0x1] %vm388_vm2, %v2900_v0  ;;  %412 = vst.msk [vmem:[#allocation2 + $0xd1] sm:$0x1] %vm388_vm2, %v2900_v0  ;;  %v316_v19 = vadd.f32 %v3011_v2, %v277_v7  ;;  %v315_v20 = vadd.f32 %v3011_v2, %v276_v8  ;;  %v280_v21 = vmul.f32 %v2999_v1, %v241_v16  ;;  %v243_v27 = vld [vmem:[%s3006_s26 + $0x38] sm:$0xff]  ;;  %v246_v28 = vld [vmem:[%s3006_s26 + $0x50] sm:$0xff] }
  0x15   : > { %413 = vst.msk [vmem:[#allocation2 + $0xe9] sm:$0x1] %vm388_vm2, %v2900_v0  ;;  %414 = vst.msk [vmem:[#allocation2 + $0x101] sm:$0x1] %vm388_vm2, %v2900_v0  ;;  %v318_v23 = vadd.f32 %v3011_v2, %v279_v13  ;;  %v317_v24 = vadd.f32 %v3011_v2, %v278_v14  ;;  %v320_v25 = vadd.f32 %v3011_v2, %v281_v15  ;;  %v245_v29 = vld [vmem:[%s3006_s26 + $0x48] sm:$0xff]  ;;  %v346_v30 = vmax.f32 %v314_v18, 0.0 }
  0x16   : > { %415 = vst.msk [vmem:[#allocation2 + $0x119] sm:$0x1] %vm388_vm2, %v2900_v0  ;;  %416 = vst.msk [vmem:[#allocation2 + $0x131] sm:$0x1] %vm388_vm2, %v2900_v0  ;;  %v283_v26 = vmul.f32 %v2999_v1, %v244_v22  ;;  %v348_v31 = vmax.f32 %v316_v19, 0.0  ;;  %v347_v32 = vmax.f32 %v315_v20, 0.0  ;;  %v319_v33 = vadd.f32 %v3011_v2, %v280_v21 }
  0x17   : > { %417 = vst.msk [vmem:[#allocation2 + $0x149] sm:$0x1] %vm388_vm2, %v2900_v0  ;;  %418 = vst.msk [vmem:[#allocation2 + $0x161] sm:$0x1] %vm388_vm2, %v2900_v0  ;;  %v248_v34 = vld [vmem:[%s3006_s26 + $0x60] sm:$0xff]  ;;  %v247_v35 = vld [vmem:[%s3006_s26 + $0x58] sm:$0xff]  ;;  %v282_v43 = vmul.f32 %v2999_v1, %v243_v27  ;;  %v285_v44 = vmul.f32 %v2999_v1, %v246_v28  ;;  %v284_v45 = vmul.f32 %v2999_v1, %v245_v29 }
  0x18   : > { %419 = vst.msk [vmem:[#allocation2 + $0x179] sm:$0x1] %vm388_vm2, %v2900_v0  ;;  %420 = vst.msk [vmem:[#allocation2 + $0x191] sm:$0x1] %vm388_vm2, %v2900_v0  ;;  %v250_v36 = vld [vmem:[%s3006_s26 + $0x70] sm:$0xff]  ;;  %v350_v37 = vmax.f32 %v318_v23, 0.0  ;;  %v322_v40 = vadd.f32 %v3011_v2, %v283_v26  ;;  %v287_v48 = vmul.f32 %v2999_v1, %v248_v34  ;;  %v286_v49 = vmul.f32 %v2999_v1, %v247_v35 }
  0x19   : > { %v349_v38 = vmax.f32 %v317_v24, 0.0  ;;  %v352_v39 = vmax.f32 %v320_v25, 0.0  ;;  %v249_v41 = vld [vmem:[%s3006_s26 + $0x68] sm:$0xff]  ;;  %421 = vst.msk [vmem:[#allocation2 + $0x19] sm:$0xff] %vm378_vm0, %v346_v30  ;;  %423 = vst.msk [vmem:[#allocation2 + $0x31] sm:$0xff] %vm378_vm0, %v348_v31  ;;  %v351_v42 = vmax.f32 %v319_v33, 0.0  ;;  %v289_v50 = vmul.f32 %v2999_v1, %v250_v36 }
  0x1a   : > { %422 = vst.msk [vmem:[#allocation2 + $0x21] sm:$0xff] %vm378_vm0, %v347_v32  ;;  %v252_v46 = vld [vmem:[%s3006_s26 + $0x80] sm:$0xff]  ;;  %425 = vst.msk [vmem:[#allocation2 + $0x49] sm:$0xff] %vm378_vm0, %v350_v37  ;;  %v354_v47 = vmax.f32 %v322_v40, 0.0  ;;  %v321_v51 = vadd.f32 %v3011_v2, %v282_v43  ;;  %v324_v52 = vadd.f32 %v3011_v2, %v285_v44  ;;  %v323_v53 = vadd.f32 %v3011_v2, %v284_v45  ;;  %v251_v55 = vld [vmem:[%s3006_s26 + $0x78] sm:$0xff] }
  0x1b   : > { %424 = vst.msk [vmem:[#allocation2 + $0x39] sm:$0xff] %vm378_vm0, %v349_v38  ;;  %427 = vst.msk [vmem:[#allocation2 + $0x61] sm:$0xff] %vm378_vm0, %v352_v39  ;;  %v288_v54 = vmul.f32 %v2999_v1, %v249_v41  ;;  %v254_v56 = vld [vmem:[%s3006_s26 + $0x90] sm:$0xff]  ;;  %v326_v57 = vadd.f32 %v3011_v2, %v287_v48  ;;  %v325_v58 = vadd.f32 %v3011_v2, %v286_v49  ;;  %v253_v61 = vld [vmem:[%s3006_s26 + $0x88] sm:$0xff]  ;;  %vm2029_vm11 = vcmask 294144  }
  0x1c   : > { %426 = vst.msk [vmem:[#allocation2 + $0x51] sm:$0xff] %vm378_vm0, %v351_v42  ;;  %429 = vst.msk [vmem:[#allocation2 + $0x79] sm:$0xff] %vm378_vm0, %v354_v47  ;;  %v328_v59 = vadd.f32 %v3011_v2, %v289_v50  ;;  %v291_v60 = vmul.f32 %v2999_v1, %v252_v46  ;;  %v256_v62 = vld [vmem:[%s3006_s26 + $0xa0] sm:$0xff]  ;;  %v255_v63 = vld [vmem:[%s3006_s26 + $0x98] sm:$0xff]  ;;  %v353_v0 = vmax.f32 %v321_v51, 0.0  ;;  %v356_v3 = vmax.f32 %v324_v52, 0.0 }
  0x1d   : > { %v355_v4 = vmax.f32 %v323_v53, 0.0  ;;  %v327_v5 = vadd.f32 %v3011_v2, %v288_v54  ;;  %v258_v6 = vld [vmem:[%s3006_s26 + $0xb0] sm:$0xff]  ;;  %v453_v7 = vld [vmem:[#allocation2] sm:$0xff]  ;;  %v454_v8 = vld [vmem:[#allocation2 + $0x8] sm:$0xff]  ;;  %v358_v9 = vmax.f32 %v326_v57, 0.0  ;;  %v357_v10 = vmax.f32 %v325_v58, 0.0 }
  0x1e   : > { %v360_v11 = vmax.f32 %v328_v59, 0.0  ;;  %v330_v12 = vadd.f32 %v3011_v2, %v291_v60  ;;  %485 = vst.msk [vmem:[#allocation3] sm:$0xff] %vm378_vm0, %v453_v7  ;;  %486 = vst.msk [vmem:[#allocation3 + $0x8] sm:$0xff] %vm378_vm0, %v454_v8  ;;  %v290_v14 = vmul.f32 %v2999_v1, %v251_v55  ;;  %v293_v15 = vmul.f32 %v2999_v1, %v254_v56  ;;  %v257_v17 = vld [vmem:[%s3006_s26 + $0xa8] sm:$0xff]  ;;  %v260_v24 = vld [vmem:[%s3006_s26 + $0xc0] sm:$0xff] }
  0x1f   : > { %428 = vst.msk [vmem:[#allocation2 + $0x69] sm:$0xff] %vm378_vm0, %v353_v0  ;;  %431 = vst.msk [vmem:[#allocation2 + $0x91] sm:$0xff] %vm378_vm0, %v356_v3  ;;  %v359_v13 = vmax.f32 %v327_v5, 0.0  ;;  %v292_v16 = vmul.f32 %v2999_v1, %v253_v61  ;;  %v295_v21 = vmul.f32 %v2999_v1, %v256_v62  ;;  %v294_v22 = vmul.f32 %v2999_v1, %v255_v63  ;;  %v259_v28 = vld [vmem:[%s3006_s26 + $0xb8] sm:$0xff]  ;;  %v262_v35 = vld [vmem:[%s3006_s26 + $0xd0] sm:$0xff] }
  0x20   : > { %430 = vst.msk [vmem:[#allocation2 + $0x81] sm:$0xff] %vm378_vm0, %v355_v4  ;;  %v3086_v18 = vld [vmem:[#allocation2 + $0x19] sm:$0xff]  ;;  %v3088_v19 = vld [vmem:[#allocation2 + $0x31] sm:$0xff]  ;;  %433 = vst.msk [vmem:[#allocation2 + $0xa9] sm:$0xff] %vm378_vm0, %v358_v9  ;;  %v362_v20 = vmax.f32 %v330_v12, 0.0  ;;  %v297_v23 = vmul.f32 %v2999_v1, %v258_v6  ;;  %v329_v25 = vadd.f32 %v3011_v2, %v290_v14  ;;  %v332_v26 = vadd.f32 %v3011_v2, %v293_v15 }
  0x21   : > { %432 = vst.msk [vmem:[#allocation2 + $0x99] sm:$0xff] %vm378_vm0, %v357_v10  ;;  %435 = vst.msk [vmem:[#allocation2 + $0xc1] sm:$0xff] %vm378_vm0, %v360_v11  ;;  %585 = vrot.lane.b32.xlu1 %v3086_v18, %s2901_s29  ;;  %589 = vrot.lane.b32.xlu0 %v3088_v19, %s2901_s29  ;;  %v331_v27 = vadd.f32 %v3011_v2, %v292_v16  ;;  %v3106_v29 = vld [vmem:[#allocation2 + $0x21] sm:$0xff]  ;;  %v3108_v30 = vld [vmem:[#allocation2 + $0x49] sm:$0xff]  ;;  %v334_v31 = vadd.f32 %v3011_v2, %v295_v21  ;;  %vm2099_vm12 = vcmask 293888  }
  0x22   : > { %434 = vst.msk [vmem:[#allocation2 + $0xb1] sm:$0xff] %vm378_vm0, %v359_v13  ;;  %437 = vst.msk [vmem:[#allocation2 + $0xd9] sm:$0xff] %vm378_vm0, %v362_v20  ;;  %v333_v32 = vadd.f32 %v3011_v2, %v294_v22  ;;  %v336_v33 = vadd.f32 %v3011_v2, %v297_v23  ;;  %v296_v34 = vmul.f32 %v2999_v1, %v257_v17  ;;  %v361_v36 = vmax.f32 %v329_v25, 0.0  ;;  %v261_v40 = vld [vmem:[%s3006_s26 + $0xc8] sm:$0xff]  ;;  %v264_v41 = vld [vmem:[%s3006_s26 + $0xe0] sm:$0xff] }
  0x23   : > { %v364_v37 = vmax.f32 %v332_v26, 0.0  ;;  %v363_v38 = vmax.f32 %v331_v27, 0.0  ;;  %v299_v39 = vmul.f32 %v2999_v1, %v260_v24  ;;  %v263_v42 = vld [vmem:[%s3006_s26 + $0xd8] sm:$0xff]  ;;  %v366_v43 = vmax.f32 %v334_v31, 0.0  ;;  %v265_v47 = vld [vmem:[%s3006_s26 + $0xe8] sm:$0xff]  ;;  %v3136_v52 = vld [vmem:[#allocation2 + $0x30] sm:$0xff] }
  0x24   : > { %v365_v44 = vmax.f32 %v333_v32, 0.0  ;;  %v368_v45 = vmax.f32 %v336_v33, 0.0  ;;  %v335_v46 = vadd.f32 %v3011_v2, %v296_v34  ;;  %v3122_v48 = vld [vmem:[#allocation2 + $0x18] sm:$0xff]  ;;  %436 = vst.msk [vmem:[#allocation2 + $0xc9] sm:$0xff] %vm378_vm0, %v361_v36  ;;  %v298_v50 = vmul.f32 %v2999_v1, %v259_v28  ;;  %v3138_v53 = vld [vmem:[#allocation2 + $0x20] sm:$0xff]  ;;  %v3140_v54 = vld [vmem:[#allocation2 + $0x48] sm:$0xff] }
  0x25   : > { %587 = vrot.lane.b32.xlu1 %v3106_v29, %s2901_s29  ;;  %593 = vrot.lane.b32.xlu0 %v3108_v30, %s2901_s29  ;;  %439 = vst.msk [vmem:[#allocation2 + $0xf1] sm:$0xff] %vm378_vm0, %v364_v37  ;;  %438 = vst.msk [vmem:[#allocation2 + $0xe1] sm:$0xff] %vm378_vm0, %v363_v38  ;;  %v338_v49 = vadd.f32 %v3011_v2, %v299_v39  ;;  %v301_v51 = vmul.f32 %v2999_v1, %v262_v35  ;;  %v3142_v55 = vld [vmem:[#allocation2 + $0x39] sm:$0xff]  ;;  %v3144_v56 = vld [vmem:[#allocation2 + $0x61] sm:$0xff] }
  0x26   : > { %487 = vst.msk [vmem:[#allocation3 + $0x10] sm:$0xff] %vm378_vm0, %v3122_v48  ;;  %441 = vst.msk [vmem:[#allocation2 + $0x109] sm:$0xff] %vm378_vm0, %v366_v43  ;;  %v367_v57 = vmax.f32 %v335_v46, 0.0  ;;  %v300_v58 = vmul.f32 %v2999_v1, %v261_v40  ;;  %v303_v59 = vmul.f32 %v2999_v1, %v264_v41  ;;  %v302_v60 = vmul.f32 %v2999_v1, %v263_v42  ;;  %v3171_v8 = vld [vmem:[#allocation2 + $0x51] sm:$0xff]  ;;  %v527_v9 = vld [vmem:[#allocation2 + $0x79] sm:$0xff] }
  0x27   : > { %440 = vst.msk [vmem:[#allocation2 + $0xf9] sm:$0xff] %vm378_vm0, %v365_v44  ;;  %443 = vst.msk [vmem:[#allocation2 + $0x121] sm:$0xff] %vm378_vm0, %v368_v45  ;;  %v370_v61 = vmax.f32 %v338_v49, 0.0  ;;  %v337_v62 = vadd.f32 %v3011_v2, %v298_v50  ;;  %v340_v63 = vadd.f32 %v3011_v2, %v301_v51  ;;  %v304_v0 = vmul.f32 %v2999_v1, %v265_v47  ;;  %v3175_v14 = vld [vmem:[#allocation2 + $0x38] sm:$0xff]  ;;  %v3177_v15 = vld [vmem:[#allocation2 + $0x60] sm:$0xff] }
  0x28   : > { %489 = vst.msk [vmem:[#allocation3 + $0x20] sm:$0xff] %vm378_vm0, %v3136_v52  ;;  %488 = vst.msk [vmem:[#allocation3 + $0x18] sm:$0xff] %vm378_vm0, %v3138_v53  ;;  %v339_v3 = vadd.f32 %v3011_v2, %v300_v58  ;;  %v342_v4 = vadd.f32 %v3011_v2, %v303_v59  ;;  %v341_v5 = vadd.f32 %v3011_v2, %v302_v60  ;;  %v529_v16 = vld [vmem:[#allocation2 + $0x91] sm:$0xff]  ;;  %v528_v21 = vld [vmem:[#allocation2 + $0x81] sm:$0xff] }
  0x29   : > { %491 = vst.msk [vmem:[#allocation3 + $0x30] sm:$0xff] %vm378_vm0, %v3140_v54  ;;  %442 = vst.msk [vmem:[#allocation2 + $0x111] sm:$0xff] %vm378_vm0, %v367_v57  ;;  %591 = vrot.lane.b32.xlu1 %v3142_v55, %s2901_s29  ;;  %597 = vrot.lane.b32.xlu0 %v3144_v56, %s2901_s29  ;;  %v369_v6 = vmax.f32 %v337_v62, 0.0  ;;  %v372_v7 = vmax.f32 %v340_v63, 0.0  ;;  %v343_v1 = vadd.f32 %v3011_v2, %v304_v0  ;;  %v3190_v2 = vld [vmem:[#allocation2 + $0x69] sm:$0xff]  ;;  %v3197_v20 = vld [vmem:[#allocation2 + $0x78] sm:$0xff] }
  0x2a   : > { %445 = vst.msk [vmem:[#allocation2 + $0x139] sm:$0xff] %vm378_vm0, %v370_v61  ;;  %v371_v10 = vmax.f32 %v339_v3, 0.0  ;;  %v374_v11 = vmax.f32 %v342_v4, 0.0  ;;  %v373_v12 = vmax.f32 %v341_v5, 0.0  ;;  %490 = vst.msk [vmem:[#allocation3 + $0x28] sm:$0xff] %vm378_vm0, %v3175_v14  ;;  %v3195_v17 = vld [vmem:[#allocation2 + $0x50] sm:$0xff] }
  0x2b   : > { %444 = vst.msk [vmem:[#allocation2 + $0x129] sm:$0xff] %vm378_vm0, %v369_v6  ;;  %447 = vst.msk [vmem:[#allocation2 + $0x151] sm:$0xff] %vm378_vm0, %v372_v7  ;;  %v375_v13 = vmax.f32 %v343_v1, 0.0  ;;  %v531_v22 = vld [vmem:[#allocation2 + $0xa9] sm:$0xff]  ;;  %v530_v23 = vld [vmem:[#allocation2 + $0x99] sm:$0xff] }
  0x2c   : > { %446 = vst.msk [vmem:[#allocation2 + $0x141] sm:$0xff] %vm378_vm0, %v371_v10  ;;  %449 = vst.msk [vmem:[#allocation2 + $0x169] sm:$0xff] %vm378_vm0, %v374_v11  ;;  %v533_v24 = vld [vmem:[#allocation2 + $0xc1] sm:$0xff]  ;;  %v3209_v26 = vld [vmem:[#allocation2 + $0x90] sm:$0xff] }
  0x2d   : > { %448 = vst.msk [vmem:[#allocation2 + $0x159] sm:$0xff] %vm378_vm0, %v373_v12  ;;  %493 = vst.msk [vmem:[#allocation3 + $0x40] sm:$0xff] %vm378_vm0, %v3177_v15  ;;  %595 = vrot.lane.b32.xlu1 %v3171_v8, %s2901_s29  ;;  %601 = vrot.lane.b32.xlu0 %v527_v9, %s2901_s29  ;;  %v3205_v25 = vld [vmem:[#allocation2 + $0x68] sm:$0xff]  ;;  %v3211_v27 = vld [vmem:[#allocation2 + $0x80] sm:$0xff] }
  0x2e   : > { %450 = vst.msk [vmem:[#allocation2 + $0x171] sm:$0xff] %vm378_vm0, %v375_v13  ;;  %492 = vst.msk [vmem:[#allocation3 + $0x38] sm:$0xff] %vm378_vm0, %v3195_v17  ;;  %v3213_v28 = vld [vmem:[#allocation2 + $0xa8] sm:$0xff]  ;;  %v532_v31 = vld [vmem:[#allocation2 + $0xb1] sm:$0xff] }
  0x2f   : > { %495 = vst.msk [vmem:[#allocation3 + $0x50] sm:$0xff] %vm378_vm0, %v3197_v20  ;;  %494 = vst.msk [vmem:[#allocation3 + $0x48] sm:$0xff] %vm378_vm0, %v3205_v25  ;;  %v535_v32 = vld [vmem:[#allocation2 + $0xd9] sm:$0xff]  ;;  %v3225_v35 = vld [vmem:[#allocation2 + $0xb0] sm:$0xff] }
  0x30   : > { %497 = vst.msk [vmem:[#allocation3 + $0x60] sm:$0xff] %vm378_vm0, %v3209_v26  ;;  %496 = vst.msk [vmem:[#allocation3 + $0x58] sm:$0xff] %vm378_vm0, %v3211_v27  ;;  %v3221_v33 = vld [vmem:[#allocation2 + $0x98] sm:$0xff]  ;;  %v3223_v34 = vld [vmem:[#allocation2 + $0xc0] sm:$0xff] }
  0x31   : > { %599 = vrot.lane.b32.xlu1 %v3190_v2, %s2901_s29  ;;  %605 = vrot.lane.b32.xlu0 %v529_v16, %s2901_s29  ;;  %499 = vst.msk [vmem:[#allocation3 + $0x70] sm:$0xff] %vm378_vm0, %v3213_v28  ;;  %498 = vst.msk [vmem:[#allocation3 + $0x68] sm:$0xff] %vm378_vm0, %v3221_v33  ;;  %v3235_v36 = vld [vmem:[#allocation2 + $0xd8] sm:$0xff]  ;;  %v3237_v37 = vld [vmem:[#allocation2 + $0xc8] sm:$0xff] }
  0x32   : > { %501 = vst.msk [vmem:[#allocation3 + $0x80] sm:$0xff] %vm378_vm0, %v3223_v34  ;;  %500 = vst.msk [vmem:[#allocation3 + $0x78] sm:$0xff] %vm378_vm0, %v3225_v35  ;;  %v3239_v38 = vld [vmem:[#allocation2 + $0xf0] sm:$0xff]  ;;  %v3247_v39 = vld [vmem:[#allocation2 + $0xe0] sm:$0xff] }
  0x33   : > { %503 = vst.msk [vmem:[#allocation3 + $0x90] sm:$0xff] %vm378_vm0, %v3235_v36  ;;  %502 = vst.msk [vmem:[#allocation3 + $0x88] sm:$0xff] %vm378_vm0, %v3237_v37  ;;  %v3249_v40 = vld [vmem:[#allocation2 + $0x108] sm:$0xff]  ;;  %v3251_v41 = vld [vmem:[#allocation2 + $0xf8] sm:$0xff] }
  0x34   : > { %505 = vst.msk [vmem:[#allocation3 + $0xa0] sm:$0xff] %vm378_vm0, %v3239_v38  ;;  %504 = vst.msk [vmem:[#allocation3 + $0x98] sm:$0xff] %vm378_vm0, %v3247_v39  ;;  %v3259_v42 = vld [vmem:[#allocation2 + $0x120] sm:$0xff]  ;;  %v3265_v43 = vld [vmem:[#allocation2 + $0x110] sm:$0xff] }
  0x35   : > { %603 = vrot.lane.b32.xlu1 %v528_v21, %s2901_s29  ;;  %609 = vrot.lane.b32.xlu0 %v531_v22, %s2901_s29  ;;  %507 = vst.msk [vmem:[#allocation3 + $0xb0] sm:$0xff] %vm378_vm0, %v3249_v40  ;;  %506 = vst.msk [vmem:[#allocation3 + $0xa8] sm:$0xff] %vm378_vm0, %v3251_v41  ;;  %v534_v44 = vld [vmem:[#allocation2 + $0xc9] sm:$0xff]  ;;  %v537_v45 = vld [vmem:[#allocation2 + $0xf1] sm:$0xff] }
  0x36   : > { %509 = vst.msk [vmem:[#allocation3 + $0xc0] sm:$0xff] %vm378_vm0, %v3259_v42  ;;  %508 = vst.msk [vmem:[#allocation3 + $0xb8] sm:$0xff] %vm378_vm0, %v3265_v43  ;;  %v479_v46 = vld [vmem:[#allocation2 + $0x138] sm:$0xff]  ;;  %v3272_v47 = vld [vmem:[#allocation2 + $0x128] sm:$0xff] }
  0x37   : > { %511 = vst.msk [vmem:[#allocation3 + $0xd0] sm:$0xff] %vm378_vm0, %v479_v46  ;;  %v536_v49 = vld [vmem:[#allocation2 + $0xe1] sm:$0xff]  ;;  %v539_v50 = vld [vmem:[#allocation2 + $0x109] sm:$0xff]  ;;  %510 = vst.msk [vmem:[#allocation3 + $0xc8] sm:$0xff] %vm378_vm0, %v3272_v47 }
  0x38   : > { %v481_v51 = vld [vmem:[#allocation2 + $0x150] sm:$0xff]  ;;  %v480_v57 = vld [vmem:[#allocation2 + $0x140] sm:$0xff]  ;;  %v483_v60 = vld [vmem:[#allocation2 + $0x168] sm:$0xff] }
  0x39   : > { %607 = vrot.lane.b32.xlu1 %v530_v23, %s2901_s29  ;;  %613 = vrot.lane.b32.xlu0 %v533_v24, %s2901_s29  ;;  %513 = vst.msk [vmem:[#allocation3 + $0xe0] sm:$0xff] %vm378_vm0, %v481_v51  ;;  %v538_v58 = vld [vmem:[#allocation2 + $0xf9] sm:$0xff]  ;;  %v541_v59 = vld [vmem:[#allocation2 + $0x121] sm:$0xff]  ;;  %512 = vst.msk [vmem:[#allocation3 + $0xd8] sm:$0xff] %vm378_vm0, %v480_v57 }
  0x3a   : > { %515 = vst.msk [vmem:[#allocation3 + $0xf0] sm:$0xff] %vm378_vm0, %v483_v60  ;;  %v482_v61 = vld [vmem:[#allocation2 + $0x158] sm:$0xff]  ;;  %v484_v0 = vld [vmem:[#allocation2 + $0x170] sm:$0xff]  ;;  %v544_v5 = vld [vmem:[#allocation2 + $0x141] sm:$0xff] }
  0x3b   : > { %v540_v62 = vld [vmem:[#allocation2 + $0x111] sm:$0xff]  ;;  %v543_v63 = vld [vmem:[#allocation2 + $0x139] sm:$0xff]  ;;  %514 = vst.msk [vmem:[#allocation3 + $0xe8] sm:$0xff] %vm378_vm0, %v482_v61  ;;  %v542_v3 = vld [vmem:[#allocation2 + $0x129] sm:$0xff] }
  0x3c   : > { %v545_v4 = vld [vmem:[#allocation2 + $0x151] sm:$0xff]  ;;  %516 = vst.msk [vmem:[#allocation3 + $0xf8] sm:$0xff] %vm378_vm0, %v484_v0  ;;  %v547_v6 = vld [vmem:[#allocation2 + $0x169] sm:$0xff]  ;;  %v546_v7 = vld [vmem:[#allocation2 + $0x159] sm:$0xff] }
  0x3d   : > { %611 = vrot.lane.b32.xlu1 %v532_v31, %s2901_s29  ;;  %617 = vrot.lane.b32.xlu0 %v535_v32, %s2901_s29  ;;  %v710_v1 = vld [vmem:[#allocation2 + $0x2] sm:$0xff]  ;;  %v548_v9 = vld [vmem:[#allocation2 + $0x171] sm:$0xff]  ;;  %v3293_v10 = vld [vmem:[#allocation2 + $0x1a] sm:$0xff] }
  0x3e   : > { %v711_v11 = vld [vmem:[#allocation2 + $0xa] sm:$0xff]  ;;  %v3298_v12 = vld [vmem:[#allocation2 + $0x32] sm:$0xff]  ;;  %v3303_v13 = vld [vmem:[#allocation2 + $0x22] sm:$0xff] }
  0x3f   : > { %v3305_v16 = vld [vmem:[#allocation2 + $0x4a] sm:$0xff]  ;;  %v3311_v21 = vld [vmem:[#allocation2 + $0x3a] sm:$0xff]  ;;  %v3313_v22 = vld [vmem:[#allocation2 + $0x62] sm:$0xff] }
  0x40   : > { %v3319_v23 = vld [vmem:[#allocation2 + $0x52] sm:$0xff]  ;;  %v3321_v24 = vld [vmem:[#allocation2 + $0x7a] sm:$0xff]  ;;  %v3327_v31 = vld [vmem:[#allocation2 + $0x6a] sm:$0xff] }
  0x41   : > { %615 = vrot.lane.b32.xlu1 %v534_v44, %s2901_s29  ;;  %621 = vrot.lane.b32.xlu0 %v537_v45, %s2901_s29  ;;  %v3329_v32 = vld [vmem:[#allocation2 + $0x92] sm:$0xff]  ;;  %v3335_v44 = vld [vmem:[#allocation2 + $0x82] sm:$0xff]  ;;  %v3337_v45 = vld [vmem:[#allocation2 + $0xaa] sm:$0xff] }
  0x42   : > { %v3343_v46 = vld [vmem:[#allocation2 + $0x9a] sm:$0xff]  ;;  %v3356_v57 = vld [vmem:[#allocation2 + $0xca] sm:$0xff]  ;;  %v733_v0 = vld [vmem:[#allocation2 + $0x112] sm:$0xff] }
  0x43   : > { %v728_v51 = vld [vmem:[#allocation2 + $0xda] sm:$0xff]  ;;  %v732_v60 = vld [vmem:[#allocation2 + $0x10a] sm:$0xff] }
  0x44   : > { %v731_v61 = vld [vmem:[#allocation2 + $0xfa] sm:$0xff] }
  0x45   : > { %619 = vrot.lane.b32.xlu1 %v536_v49, %s2901_s29  ;;  %625 = vrot.lane.b32.xlu0 %v539_v50, %s2901_s29  ;;  %v3345_v49 = vld [vmem:[#allocation2 + $0xc2] sm:$0xff]  ;;  %v3351_v50 = vld [vmem:[#allocation2 + $0xb2] sm:$0xff] }
  0x49   : > { %623 = vrot.lane.b32.xlu1 %v538_v58, %s2901_s29  ;;  %629 = vrot.lane.b32.xlu0 %v541_v59, %s2901_s29  ;;  %v730_v58 = vld [vmem:[#allocation2 + $0xf2] sm:$0xff]  ;;  %v729_v59 = vld [vmem:[#allocation2 + $0xe2] sm:$0xff] }
  0x4d   : > { %627 = vrot.lane.b32.xlu1 %v540_v62, %s2901_s29  ;;  %633 = vrot.lane.b32.xlu0 %v543_v63, %s2901_s29  ;;  %v734_v62 = vld [vmem:[#allocation2 + $0x122] sm:$0xff] }
  0x51   : > { %631 = vrot.lane.b32.xlu1 %v542_v3, %s2901_s29  ;;  %637 = vrot.lane.b32.xlu0 %v545_v4, %s2901_s29  ;;  %v736_v3 = vld [vmem:[#allocation2 + $0x13a] sm:$0xff] }
  0x55   : > { %635 = vrot.lane.b32.xlu1 %v544_v5, %s2901_s29  ;;  %641 = vrot.lane.b32.xlu0 %v547_v6, %s2901_s29  ;;  %v735_v5 = vld [vmem:[#allocation2 + $0x12a] sm:$0xff]  ;;  %v738_v6 = vld [vmem:[#allocation2 + $0x152] sm:$0xff] }
  0x59   : > { %639 = vrot.lane.b32.xlu1 %v546_v7, %s2901_s29  ;;  %774 = vrot.lane.b32.xlu0 %v710_v1, %s2902_s30  ;;  %v737_v7 = vld [vmem:[#allocation2 + $0x142] sm:$0xff]  ;;  %v740_v1 = vld [vmem:[#allocation2 + $0x16a] sm:$0xff] }
  0x5d   : > { %643 = vrot.lane.b32.xlu1 %v548_v9, %s2901_s29  ;;  %778 = vrot.lane.b32.xlu0 %v3293_v10, %s2902_s30 }
  0x61   : > { %776 = vrot.lane.b32.xlu1 %v711_v11, %s2902_s30  ;;  %782 = vrot.lane.b32.xlu0 %v3298_v12, %s2902_s30 }
  0x65   : > { %780 = vrot.lane.b32.xlu1 %v3303_v13, %s2902_s30  ;;  %786 = vrot.lane.b32.xlu0 %v3305_v16, %s2902_s30 }
  0x69   : > { %784 = vrot.lane.b32.xlu1 %v3311_v21, %s2902_s30  ;;  %790 = vrot.lane.b32.xlu0 %v3313_v22, %s2902_s30 }
  0x6d   : > { %788 = vrot.lane.b32.xlu1 %v3319_v23, %s2902_s30  ;;  %794 = vrot.lane.b32.xlu0 %v3321_v24, %s2902_s30 }
  0x71   : > { %792 = vrot.lane.b32.xlu1 %v3327_v31, %s2902_s30  ;;  %798 = vrot.lane.b32.xlu0 %v3329_v32, %s2902_s30 }
  0x75   : > { %796 = vrot.lane.b32.xlu1 %v3335_v44, %s2902_s30  ;;  %802 = vrot.lane.b32.xlu0 %v3337_v45, %s2902_s30 }
  0x79   : > { %800 = vrot.lane.b32.xlu1 %v3343_v46, %s2902_s30  ;;  %806 = vrot.lane.b32.xlu0 %v3345_v49, %s2902_s30 }
  0x7d   : > { %804 = vrot.lane.b32.xlu1 %v3351_v50, %s2902_s30  ;;  %810 = vrot.lane.b32.xlu0 %v728_v51, %s2902_s30  ;;  %v739_v51 = vld [vmem:[#allocation2 + $0x15a] sm:$0xff] }
  0x80   : > { %v582_v63 = vpop.permute.xlu0 %581 }
  0x81   : > { %808 = vrot.lane.b32.xlu1 %v3356_v57, %s2902_s30  ;;  %814 = vrot.lane.b32.xlu0 %v730_v58, %s2902_s30  ;;  %678 = vst.msk [vmem:[#allocation3] sm:$0xff] %vm677_vm3, %v582_v63 }
  0x84   : > { %v584_v4 = vpop.permute.xlu0 %583 }
  0x85   : > { %812 = vrot.lane.b32.xlu1 %v729_v59, %s2902_s30  ;;  %818 = vrot.lane.b32.xlu0 %v732_v60, %s2902_s30  ;;  %679 = vst.msk [vmem:[#allocation3 + $0x8] sm:$0xff] %vm677_vm3, %v584_v4  ;;  %v741_v60 = vld [vmem:[#allocation2 + $0x172] sm:$0xff] }
  0x89   : > { %816 = vrot.lane.b32.xlu1 %v731_v61, %s2902_s30  ;;  %822 = vrot.lane.b32.xlu0 %v734_v62, %s2902_s30 }
  0x8d   : > { %820 = vrot.lane.b32.xlu1 %v733_v0, %s2902_s30  ;;  %826 = vrot.lane.b32.xlu0 %v736_v3, %s2902_s30 }
  0x91   : > { %824 = vrot.lane.b32.xlu1 %v735_v5, %s2902_s30  ;;  %830 = vrot.lane.b32.xlu0 %v738_v6, %s2902_s30 }
  0x93   : > { %v586_v9 = vpop.permute.xlu1 %585  ;;  %v590_v11 = vpop.permute.xlu0 %589 }
  0x94   : > { %680 = vst.msk [vmem:[#allocation3 + $0x10] sm:$0xff] %vm677_vm3, %v586_v9  ;;  %682 = vst.msk [vmem:[#allocation3 + $0x20] sm:$0xff] %vm677_vm3, %v590_v11 }
  0x95   : > { %828 = vrot.lane.b32.xlu1 %v737_v7, %s2902_s30  ;;  %834 = vrot.lane.b32.xlu0 %v740_v1, %s2902_s30 }
  0x97   : > { %v588_v58 = vpop.permute.xlu1 %587  ;;  %v594_v59 = vpop.permute.xlu0 %593 }
  0x98   : > { %681 = vst.msk [vmem:[#allocation3 + $0x18] sm:$0xff] %vm677_vm3, %v588_v58  ;;  %684 = vst.msk [vmem:[#allocation3 + $0x30] sm:$0xff] %vm677_vm3, %v594_v59 }
  0x99   : > { %832 = vrot.lane.b32.xlu1 %v739_v51, %s2902_s30  ;;  %967 = vrot.lane.b32.xlu0 %v3122_v48, %s2903_s6 }
  0x9b   : > { %v592_v61 = vpop.permute.xlu1 %591  ;;  %v598_v62 = vpop.permute.xlu0 %597 }
  0x9c   : > { %683 = vst.msk [vmem:[#allocation3 + $0x28] sm:$0xff] %vm677_vm3, %v592_v61  ;;  %686 = vst.msk [vmem:[#allocation3 + $0x40] sm:$0xff] %vm677_vm3, %v598_v62  ;;  %v2096_v61 = vld [vmem:[%s4115_s3 + $0x10] sm:$0xff]  ;;  %v2097_v62 = vld [vmem:[%s4115_s3 + $0x18] sm:$0xff] }
  0x9d   : > { %836 = vrot.lane.b32.xlu1 %v741_v60, %s2902_s30  ;;  %971 = vrot.lane.b32.xlu0 %v3136_v52, %s2903_s6 }
  0x9f   : > { %v596_v63 = vpop.permute.xlu1 %595  ;;  %v602_v0 = vpop.permute.xlu0 %601 }
  0xa0   : > { %685 = vst.msk [vmem:[#allocation3 + $0x38] sm:$0xff] %vm677_vm3, %v596_v63  ;;  %688 = vst.msk [vmem:[#allocation3 + $0x50] sm:$0xff] %vm677_vm3, %v602_v0 }
  0xa1   : > { %969 = vrot.lane.b32.xlu1 %v3138_v53, %s2903_s6  ;;  %975 = vrot.lane.b32.xlu0 %v3140_v54, %s2903_s6 }
  0xa3   : > { %v600_v48 = vpop.permute.xlu1 %599  ;;  %v606_v3 = vpop.permute.xlu0 %605 }
  0xa4   : > { %687 = vst.msk [vmem:[#allocation3 + $0x48] sm:$0xff] %vm677_vm3, %v600_v48  ;;  %690 = vst.msk [vmem:[#allocation3 + $0x60] sm:$0xff] %vm677_vm3, %v606_v3 }
  0xa5   : > { %973 = vrot.lane.b32.xlu1 %v3175_v14, %s2903_s6  ;;  %979 = vrot.lane.b32.xlu0 %v3177_v15, %s2903_s6 }
  0xa7   : > { %v604_v4 = vpop.permute.xlu1 %603  ;;  %v610_v5 = vpop.permute.xlu0 %609 }
  0xa8   : > { %689 = vst.msk [vmem:[#allocation3 + $0x58] sm:$0xff] %vm677_vm3, %v604_v4  ;;  %692 = vst.msk [vmem:[#allocation3 + $0x70] sm:$0xff] %vm677_vm3, %v610_v5 }
  0xa9   : > { %977 = vrot.lane.b32.xlu1 %v3195_v17, %s2903_s6  ;;  %983 = vrot.lane.b32.xlu0 %v3197_v20, %s2903_s6 }
  0xab   : > { %v608_v53 = vpop.permute.xlu1 %607  ;;  %v614_v6 = vpop.permute.xlu0 %613 }
  0xac   : > { %691 = vst.msk [vmem:[#allocation3 + $0x68] sm:$0xff] %vm677_vm3, %v608_v53  ;;  %694 = vst.msk [vmem:[#allocation3 + $0x80] sm:$0xff] %vm677_vm3, %v614_v6 }
  0xad   : > { %981 = vrot.lane.b32.xlu1 %v3205_v25, %s2903_s6  ;;  %987 = vrot.lane.b32.xlu0 %v3209_v26, %s2903_s6 }
  0xaf   : > { %v612_v7 = vpop.permute.xlu1 %611  ;;  %v618_v1 = vpop.permute.xlu0 %617 }
  0xb0   : > { %693 = vst.msk [vmem:[#allocation3 + $0x78] sm:$0xff] %vm677_vm3, %v612_v7  ;;  %696 = vst.msk [vmem:[#allocation3 + $0x90] sm:$0xff] %vm677_vm3, %v618_v1 }
  0xb1   : > { %985 = vrot.lane.b32.xlu1 %v3211_v27, %s2903_s6  ;;  %1162 = vrot.lane.b32.xlu0 %v3106_v29, %s2904_s7 }
  0xb3   : > { %v616_v9 = vpop.permute.xlu1 %615  ;;  %v622_v11 = vpop.permute.xlu0 %621 }
  0xb4   : > { %695 = vst.msk [vmem:[#allocation3 + $0x88] sm:$0xff] %vm677_vm3, %v616_v9  ;;  %698 = vst.msk [vmem:[#allocation3 + $0xa0] sm:$0xff] %vm677_vm3, %v622_v11 }
  0xb5   : > { %1160 = vrot.lane.b32.xlu1 %v3086_v18, %s2904_s7  ;;  %1355 = vrot.lane.b32.xlu0 %v3303_v13, %s2905_s8  ;;  %v2094_v18 = vld [vmem:[%s4115_s3] sm:$0xff]  ;;  %v2095_v13 = vld [vmem:[%s4115_s3 + $0x8] sm:$0xff] }
  0xb6   : > { %v2859_v60 = vpack.c.bf16 %v2095_v13, %v2094_v18 }
  0xb7   : > { %v620_v51 = vpop.permute.xlu1 %619  ;;  %v626_v58 = vpop.permute.xlu0 %625 }
  0xb8   : > { %697 = vst.msk [vmem:[#allocation3 + $0x98] sm:$0xff] %vm677_vm3, %v620_v51  ;;  %700 = vst.msk [vmem:[#allocation3 + $0xb0] sm:$0xff] %vm677_vm3, %v626_v58  ;;  %2860 = vmatprep.subr.bf16.mxu0 %v2859_v60  ;;  %2867 = vmatprep.subr.bf16.mxu1 %v2859_v60 }
  0xb9   : > { %1353 = vrot.lane.b32.xlu1 %v3293_v10, %s2905_s8  ;;  %1549 = vrot.lane.b32.xlu0 %v3175_v14, %s2906_s9 }
  0xba   : > { %2862 = vmatpush3.bf16.msra.mxu0 %v2859_v60  ;;  %2870 = vmatpush3.bf16.msra.mxu1 %v2859_v60 }
  0xbb   : > { %v624_v29 = vpop.permute.xlu1 %623  ;;  %v630_v59 = vpop.permute.xlu0 %629 }
  0xbc   : > { %699 = vst.msk [vmem:[#allocation3 + $0xa8] sm:$0xff] %vm677_vm3, %v624_v29  ;;  %702 = vst.msk [vmem:[#allocation3 + $0xc0] sm:$0xff] %vm677_vm3, %v630_v59 }
  0xbd   : > { %1547 = vrot.lane.b32.xlu1 %v3136_v52, %s2906_s9  ;;  %1164 = vrot.lane.b32.xlu0 %v3088_v19, %s2904_s7  ;;  %v2863_v52 = vpack.c.bf16 %v2097_v62, %v2096_v61  ;;  %v1684_v62 = vld [vmem:[#allocation2 + $0x91] sm:$0xff] }
  0xbf   : > { %v628_v14 = vpop.permute.xlu1 %627  ;;  %v634_v10 = vpop.permute.xlu0 %633  ;;  %2864 = vmatprep.subr.bf16.mxu0 %v2863_v52  ;;  %2868 = vmatprep.subr.bf16.mxu1 %v2863_v52 }
  0xc0   : > { %701 = vst.msk [vmem:[#allocation3 + $0xb8] sm:$0xff] %vm677_vm3, %v628_v14  ;;  %704 = vst.msk [vmem:[#allocation3 + $0xd0] sm:$0xff] %vm677_vm3, %v634_v10  ;;  %2866 = vmatpush3.bf16.msra.mxu0 %v2863_v52  ;;  %2871 = vmatpush3.bf16.msra.mxu1 %v2863_v52  ;;  %v1685_v52 = vld [vmem:[#allocation2 + $0x99] sm:$0xff] }
  0xc1   : > { %1740 = vrot.lane.b32.xlu1 %v3088_v19, %s2907_s20  ;;  %1933 = vrot.lane.b32.xlu0 %v3298_v12, %s2908_s22  ;;  %v2098_v19 = vld [vmem:[%s4115_s3 + $0x20] sm:$0xf] }
  0xc2   : > { %2809 = vmatprep.subr.msk.mxu0 %vm2196_vm4, %v2098_v19  ;;  %2869 = vmatprep.subr.msk.mxu1 %vm2196_vm4, %v2098_v19 }
  0xc3   : > { %v632_v63 = vpop.permute.xlu1 %631  ;;  %v638_v0 = vpop.permute.xlu0 %637 }
  0xc4   : > { %703 = vst.msk [vmem:[#allocation3 + $0xc8] sm:$0xff] %vm677_vm3, %v632_v63  ;;  %706 = vst.msk [vmem:[#allocation3 + $0xe0] sm:$0xff] %vm677_vm3, %v638_v0  ;;  %2810 = vmatpush3.msk.msra.mxu0 %vm2196_vm4, %v2098_v19  ;;  %2872 = vmatpush3.msk.msra.mxu1 %vm2196_vm4, %v2098_v19 }
  0xc5   : > { %1742 = vrot.lane.b32.xlu1 %v3142_v55, %s2907_s20  ;;  %1357 = vrot.lane.b32.xlu0 %v3298_v12, %s2905_s8 }
  0xc7   : > { %v636_v48 = vpop.permute.xlu1 %635  ;;  %v642_v3 = vpop.permute.xlu0 %641 }
  0xc8   : > { %705 = vst.msk [vmem:[#allocation3 + $0xd8] sm:$0xff] %vm677_vm3, %v636_v48  ;;  %708 = vst.msk [vmem:[#allocation3 + $0xf0] sm:$0xff] %vm677_vm3, %v642_v3 }
  0xc9   : > { %1166 = vrot.lane.b32.xlu1 %v3142_v55, %s2904_s7  ;;  %1359 = vrot.lane.b32.xlu0 %v3311_v21, %s2905_s8 }
  0xcb   : > { %v640_v12 = vpop.permute.xlu1 %639  ;;  %v775_v4 = vpop.permute.xlu0 %774 }
  0xcc   : > { %707 = vst.msk [vmem:[#allocation3 + $0xe8] sm:$0xff] %vm677_vm3, %v640_v12 }
  0xcd   : > { %871 = vst.msk [vmem:[#allocation3] sm:$0xff] %vm870_vm5, %v775_v4  ;;  %1935 = vrot.lane.b32.xlu1 %v3311_v21, %s2908_s22  ;;  %1553 = vrot.lane.b32.xlu0 %v3195_v17, %s2906_s9 }
  0xcf   : > { %v644_v5 = vpop.permute.xlu1 %643  ;;  %v779_v53 = vpop.permute.xlu0 %778 }
  0xd0   : > { %709 = vst.msk [vmem:[#allocation3 + $0xf8] sm:$0xff] %vm677_vm3, %v644_v5 }
  0xd1   : > { %873 = vst.msk [vmem:[#allocation3 + $0x10] sm:$0xff] %vm870_vm5, %v779_v53  ;;  %1551 = vrot.lane.b32.xlu1 %v3140_v54, %s2906_s9  ;;  %1168 = vrot.lane.b32.xlu0 %v3108_v30, %s2904_s7 }
  0xd3   : > { %v777_v55 = vpop.permute.xlu1 %776  ;;  %v783_v6 = vpop.permute.xlu0 %782 }
  0xd4   : > { %872 = vst.msk [vmem:[#allocation3 + $0x8] sm:$0xff] %vm870_vm5, %v777_v55  ;;  %875 = vst.msk [vmem:[#allocation3 + $0x20] sm:$0xff] %vm870_vm5, %v783_v6  ;;  %v1687_v55 = vld [vmem:[#allocation2 + $0xb1] sm:$0xff] }
  0xd5   : > { %1744 = vrot.lane.b32.xlu1 %v3108_v30, %s2907_s20  ;;  %1937 = vrot.lane.b32.xlu0 %v3305_v16, %s2908_s22 }
  0xd7   : > { %v781_v17 = vpop.permute.xlu1 %780  ;;  %v787_v21 = vpop.permute.xlu0 %786 }
  0xd8   : > { %874 = vst.msk [vmem:[#allocation3 + $0x18] sm:$0xff] %vm870_vm5, %v781_v17  ;;  %877 = vst.msk [vmem:[#allocation3 + $0x30] sm:$0xff] %vm870_vm5, %v787_v21 }
  0xd9   : > { %1746 = vrot.lane.b32.xlu1 %v3171_v8, %s2907_s20  ;;  %1361 = vrot.lane.b32.xlu0 %v3305_v16, %s2905_s8 }
  0xdb   : > { %v785_v54 = vpop.permute.xlu1 %784  ;;  %v791_v7 = vpop.permute.xlu0 %790 }
  0xdc   : > { %876 = vst.msk [vmem:[#allocation3 + $0x28] sm:$0xff] %vm870_vm5, %v785_v54  ;;  %879 = vst.msk [vmem:[#allocation3 + $0x40] sm:$0xff] %vm870_vm5, %v791_v7 }
  0xdd   : > { %1170 = vrot.lane.b32.xlu1 %v3171_v8, %s2904_s7  ;;  %1363 = vrot.lane.b32.xlu0 %v3319_v23, %s2905_s8 }
  0xdf   : > { %v789_v30 = vpop.permute.xlu1 %788  ;;  %v795_v1 = vpop.permute.xlu0 %794 }
  0xe0   : > { %878 = vst.msk [vmem:[#allocation3 + $0x38] sm:$0xff] %vm870_vm5, %v789_v30  ;;  %881 = vst.msk [vmem:[#allocation3 + $0x50] sm:$0xff] %vm870_vm5, %v795_v1 }
  0xe1   : > { %1939 = vrot.lane.b32.xlu1 %v3319_v23, %s2908_s22  ;;  %1557 = vrot.lane.b32.xlu0 %v3205_v25, %s2906_s9 }
  0xe3   : > { %v793_v16 = vpop.permute.xlu1 %792  ;;  %v799_v9 = vpop.permute.xlu0 %798 }
  0xe4   : > { %880 = vst.msk [vmem:[#allocation3 + $0x48] sm:$0xff] %vm870_vm5, %v793_v16  ;;  %883 = vst.msk [vmem:[#allocation3 + $0x60] sm:$0xff] %vm870_vm5, %v799_v9 }
  0xe5   : > { %1555 = vrot.lane.b32.xlu1 %v3177_v15, %s2906_s9  ;;  %1172 = vrot.lane.b32.xlu0 %v3144_v56, %s2904_s7 }
  0xe7   : > { %v797_v8 = vpop.permute.xlu1 %796  ;;  %v803_v11 = vpop.permute.xlu0 %802 }
  0xe8   : > { %882 = vst.msk [vmem:[#allocation3 + $0x58] sm:$0xff] %vm870_vm5, %v797_v8  ;;  %885 = vst.msk [vmem:[#allocation3 + $0x70] sm:$0xff] %vm870_vm5, %v803_v11  ;;  %v1688_v8 = vld [vmem:[#allocation2 + $0xc1] sm:$0xff]  ;;  %v1689_v11 = vld [vmem:[#allocation2 + $0xc9] sm:$0xff] }
  0xe9   : > { %1748 = vrot.lane.b32.xlu1 %v3144_v56, %s2907_s20  ;;  %1941 = vrot.lane.b32.xlu0 %v3313_v22, %s2908_s22 }
  0xeb   : > { %v801_v25 = vpop.permute.xlu1 %800  ;;  %v807_v23 = vpop.permute.xlu0 %806 }
  0xec   : > { %884 = vst.msk [vmem:[#allocation3 + $0x68] sm:$0xff] %vm870_vm5, %v801_v25  ;;  %887 = vst.msk [vmem:[#allocation3 + $0x80] sm:$0xff] %vm870_vm5, %v807_v23 }
  0xed   : > { %1750 = vrot.lane.b32.xlu1 %v3190_v2, %s2907_s20  ;;  %1365 = vrot.lane.b32.xlu0 %v3313_v22, %s2905_s8  ;;  %v1104_v22 = vld [vmem:[#allocation2 + $0x79] sm:$0xff] }
  0xef   : > { %v805_v15 = vpop.permute.xlu1 %804  ;;  %v811_v51 = vpop.permute.xlu0 %810 }
  0xf0   : > { %886 = vst.msk [vmem:[#allocation3 + $0x78] sm:$0xff] %vm870_vm5, %v805_v15  ;;  %889 = vst.msk [vmem:[#allocation3 + $0x90] sm:$0xff] %vm870_vm5, %v811_v51 }
  0xf1   : > { %1174 = vrot.lane.b32.xlu1 %v3190_v2, %s2904_s7  ;;  %1367 = vrot.lane.b32.xlu0 %v3327_v31, %s2905_s8 }
  0xf3   : > { %v809_v56 = vpop.permute.xlu1 %808  ;;  %v815_v58 = vpop.permute.xlu0 %814 }
  0xf4   : > { %888 = vst.msk [vmem:[#allocation3 + $0x88] sm:$0xff] %vm870_vm5, %v809_v56  ;;  %891 = vst.msk [vmem:[#allocation3 + $0xa0] sm:$0xff] %vm870_vm5, %v815_v58 }
  0xf5   : > { %1943 = vrot.lane.b32.xlu1 %v3327_v31, %s2908_s22  ;;  %1561 = vrot.lane.b32.xlu0 %v3211_v27, %s2906_s9  ;;  %v1683_v27 = vld [vmem:[#allocation2 + $0x81] sm:$0xff] }
  0xf7   : > { %v813_v29 = vpop.permute.xlu1 %812  ;;  %v819_v59 = vpop.permute.xlu0 %818 }
  0xf8   : > { %890 = vst.msk [vmem:[#allocation3 + $0x98] sm:$0xff] %vm870_vm5, %v813_v29  ;;  %893 = vst.msk [vmem:[#allocation3 + $0xb0] sm:$0xff] %vm870_vm5, %v819_v59 }
  0xf9   : > { %1559 = vrot.lane.b32.xlu1 %v3197_v20, %s2906_s9  ;;  %1176 = vrot.lane.b32.xlu0 %v1104_v22, %s2904_s7 }
  0xfb   : > { %v817_v2 = vpop.permute.xlu1 %816  ;;  %v823_v18 = vpop.permute.xlu0 %822 }
  0xfc   : > { %892 = vst.msk [vmem:[#allocation3 + $0xa8] sm:$0xff] %vm870_vm5, %v817_v2  ;;  %895 = vst.msk [vmem:[#allocation3 + $0xc0] sm:$0xff] %vm870_vm5, %v823_v18  ;;  %v1690_v18 = vld [vmem:[#allocation2 + $0xd9] sm:$0xff] }
  0xfd   : > { %1752 = vrot.lane.b32.xlu1 %v1104_v22, %s2907_s20  ;;  %1945 = vrot.lane.b32.xlu0 %v3321_v24, %s2908_s22 }
  0xff   : > { %v821_v31 = vpop.permute.xlu1 %820  ;;  %v827_v13 = vpop.permute.xlu0 %826 }
 0x100   : > { %894 = vst.msk [vmem:[#allocation3 + $0xb8] sm:$0xff] %vm870_vm5, %v821_v31  ;;  %897 = vst.msk [vmem:[#allocation3 + $0xd0] sm:$0xff] %vm870_vm5, %v827_v13 }
 0x101   : > { %1754 = vrot.lane.b32.xlu1 %v1683_v27, %s2907_s20  ;;  %1369 = vrot.lane.b32.xlu0 %v3321_v24, %s2905_s8 }
 0x103   : > { %v825_v20 = vpop.permute.xlu1 %824  ;;  %v831_v60 = vpop.permute.xlu0 %830 }
 0x104   : > { %896 = vst.msk [vmem:[#allocation3 + $0xc8] sm:$0xff] %vm870_vm5, %v825_v20  ;;  %899 = vst.msk [vmem:[#allocation3 + $0xe0] sm:$0xff] %vm870_vm5, %v831_v60 }
 0x105   : > { %1178 = vrot.lane.b32.xlu1 %v1683_v27, %s2904_s7  ;;  %1371 = vrot.lane.b32.xlu0 %v3335_v44, %s2905_s8  ;;  %v1691_v27 = vld [vmem:[#allocation2 + $0xe1] sm:$0xff] }
 0x107   : > { %v829_v14 = vpop.permute.xlu1 %828  ;;  %v835_v10 = vpop.permute.xlu0 %834 }
 0x108   : > { %898 = vst.msk [vmem:[#allocation3 + $0xd8] sm:$0xff] %vm870_vm5, %v829_v14  ;;  %901 = vst.msk [vmem:[#allocation3 + $0xf0] sm:$0xff] %vm870_vm5, %v835_v10 }
 0x109   : > { %1947 = vrot.lane.b32.xlu1 %v3335_v44, %s2908_s22  ;;  %1565 = vrot.lane.b32.xlu0 %v3221_v33, %s2906_s9 }
 0x10b   : > { %v833_v24 = vpop.permute.xlu1 %832  ;;  %v968_v61 = vpop.permute.xlu0 %967 }
 0x10c   : > { %900 = vst.msk [vmem:[#allocation3 + $0xe8] sm:$0xff] %vm870_vm5, %v833_v24 }
 0x10d   : > { %1064 = vst.msk [vmem:[#allocation3] sm:$0xff] %vm1063_vm6, %v968_v61  ;;  %1563 = vrot.lane.b32.xlu1 %v3209_v26, %s2906_s9  ;;  %989 = vrot.lane.b32.xlu0 %v3221_v33, %s2903_s6 }
 0x10f   : > { %v837_v63 = vpop.permute.xlu1 %836  ;;  %v972_v44 = vpop.permute.xlu0 %971 }
 0x110   : > { %902 = vst.msk [vmem:[#allocation3 + $0xf8] sm:$0xff] %vm870_vm5, %v837_v63 }
 0x111   : > { %1066 = vst.msk [vmem:[#allocation3 + $0x10] sm:$0xff] %vm1063_vm6, %v972_v44  ;;  %1756 = vrot.lane.b32.xlu1 %v1684_v62, %s2907_s20  ;;  %1758 = vrot.lane.b32.xlu0 %v1685_v52, %s2907_s20  ;;  %v266_v44 = vld [vmem:[%s3006_s26 + $0xf0] sm:$0xff] }
 0x113   : > { %v970_v0 = vpop.permute.xlu1 %969  ;;  %v976_v19 = vpop.permute.xlu0 %975 }
 0x114   : > { %1065 = vst.msk [vmem:[#allocation3 + $0x8] sm:$0xff] %vm1063_vm6, %v970_v0  ;;  %1068 = vst.msk [vmem:[#allocation3 + $0x20] sm:$0xff] %vm1063_vm6, %v976_v19  ;;  %v2890_v0 = vld [vmem:[%s4113_s1] ss:$0 sm:$0xff] }
 0x115   : > { %1180 = vrot.lane.b32.xlu1 %v1684_v62, %s2904_s7  ;;  %1182 = vrot.lane.b32.xlu0 %v1685_v52, %s2904_s7  ;;  %v305_v19 = vmul.f32 %v2890_v0, %v266_v44 }
 0x117   : > { %v974_v26 = vpop.permute.xlu1 %973  ;;  %v980_v33 = vpop.permute.xlu0 %979 }
 0x118   : > { %1067 = vst.msk [vmem:[#allocation3 + $0x18] sm:$0xff] %vm1063_vm6, %v974_v26  ;;  %1070 = vst.msk [vmem:[#allocation3 + $0x30] sm:$0xff] %vm1063_vm6, %v980_v33  ;;  %v2891_v26 = vld [vmem:[%s4114_s2] ss:$0 sm:$0xff] }
 0x119   : > { %1949 = vrot.lane.b32.xlu1 %v3329_v32, %s2908_s22  ;;  %1951 = vrot.lane.b32.xlu0 %v3343_v46, %s2908_s22  ;;  %v344_v33 = vadd.f32 %v2891_v26, %v305_v19  ;;  %v1506_v19 = vld [vmem:[#allocation2 + $0x140] sm:$0xff] }
 0x11b   : > { %v978_v48 = vpop.permute.xlu1 %977  ;;  %v984_v3 = vpop.permute.xlu0 %983 }
 0x11c   : > { %1069 = vst.msk [vmem:[#allocation3 + $0x28] sm:$0xff] %vm1063_vm6, %v978_v48  ;;  %1072 = vst.msk [vmem:[#allocation3 + $0x40] sm:$0xff] %vm1063_vm6, %v984_v3 }
 0x11d   : > { %1373 = vrot.lane.b32.xlu1 %v3329_v32, %s2905_s8  ;;  %1567 = vrot.lane.b32.xlu0 %v3213_v28, %s2906_s9  ;;  %v1686_v32 = vld [vmem:[#allocation2 + $0xa9] sm:$0xff] }
 0x11f   : > { %v982_v12 = vpop.permute.xlu1 %981  ;;  %v988_v4 = vpop.permute.xlu0 %987 }
 0x120   : > { %1071 = vst.msk [vmem:[#allocation3 + $0x38] sm:$0xff] %vm1063_vm6, %v982_v12  ;;  %1074 = vst.msk [vmem:[#allocation3 + $0x50] sm:$0xff] %vm1063_vm6, %v988_v4  ;;  %v267_v12 = vld [vmem:[%s3006_s26 + $0xf8] sm:$0xff]  ;;  %v376_v4 = vmax.f32 %v344_v33, 0.0 }
 0x121   : > { %1375 = vrot.lane.b32.xlu1 %v3343_v46, %s2905_s8  ;;  %1569 = vrot.lane.b32.xlu0 %v3225_v35, %s2906_s9 }
 0x122   : > { %451 = vst.msk [vmem:[#allocation2 + $0x181] sm:$0xff] %vm378_vm0, %v376_v4  ;;  %v1699_v4 = vld [vmem:[#allocation2 + $0x141] sm:$0xff] }
 0x123   : > { %v986_v5 = vpop.permute.xlu1 %985  ;;  %v1163_v53 = vpop.permute.xlu0 %1162 }
 0x124   : > { %1073 = vst.msk [vmem:[#allocation3 + $0x48] sm:$0xff] %vm1063_vm6, %v986_v5  ;;  %v306_v5 = vmul.f32 %v2890_v0, %v267_v12 }
 0x125   : > { %1258 = vst.msk [vmem:[#allocation3 + $0x8] sm:$0xff] %vm1256_vm7, %v1163_v53  ;;  %991 = vrot.lane.b32.xlu1 %v3213_v28, %s2903_s6  ;;  %993 = vrot.lane.b32.xlu0 %v3225_v35, %s2903_s6  ;;  %v1692_v53 = vld [vmem:[#allocation2 + $0xf1] sm:$0xff] }
 0x127   : > { %v1161_v6 = vpop.permute.xlu1 %1160  ;;  %v1356_v46 = vpop.permute.xlu0 %1355 }
 0x128   : > { %1257 = vst.msk [vmem:[#allocation3] sm:$0xff] %vm1256_vm7, %v1161_v6 }
 0x129   : > { %1451 = vst.msk [vmem:[#allocation3 + $0x8] sm:$0xff] %vm1449_vm8, %v1356_v46  ;;  %1760 = vrot.lane.b32.xlu1 %v1686_v32, %s2907_s20  ;;  %1762 = vrot.lane.b32.xlu0 %v1687_v55, %s2907_s20 }
 0x12b   : > { %v1354_v17 = vpop.permute.xlu1 %1353  ;;  %v1550_v21 = vpop.permute.xlu0 %1549 }
 0x12c   : > { %1450 = vst.msk [vmem:[#allocation3] sm:$0xff] %vm1449_vm8, %v1354_v17 }
 0x12d   : > { %1645 = vst.msk [vmem:[#allocation3 + $0x8] sm:$0xff] %vm1643_vm9, %v1550_v21  ;;  %1184 = vrot.lane.b32.xlu1 %v1686_v32, %s2904_s7  ;;  %1186 = vrot.lane.b32.xlu0 %v1687_v55, %s2904_s7  ;;  %v1693_v32 = vld [vmem:[#allocation2 + $0xf9] sm:$0xff]  ;;  %v345_v55 = vadd.f32 %v2891_v26, %v306_v5 }
 0x12f   : > { %v1548_v28 = vpop.permute.xlu1 %1547  ;;  %v1165_v35 = vpop.permute.xlu0 %1164  ;;  %v377_v21 = vmax.f32 %v345_v55, 0.0 }
 0x130   : > { %1644 = vst.msk [vmem:[#allocation3] sm:$0xff] %vm1643_vm9, %v1548_v28  ;;  %v1885_v28 = vld [vmem:[#allocation2 + $0xf2] sm:$0xff] }
 0x131   : > { %1259 = vst.msk [vmem:[#allocation3 + $0x10] sm:$0xff] %vm1256_vm7, %v1165_v35  ;;  %1953 = vrot.lane.b32.xlu1 %v3337_v45, %s2908_s22  ;;  %1955 = vrot.lane.b32.xlu0 %v3351_v50, %s2908_s22  ;;  %v1886_v35 = vld [vmem:[#allocation2 + $0xfa] sm:$0xff] }
 0x132   : > { %452 = vst.msk [vmem:[#allocation2 + $0x189] sm:$0xff] %vm378_vm0, %v377_v21 }
 0x133   : > { %v1741_v54 = vpop.permute.xlu1 %1740  ;;  %v1934_v7 = vpop.permute.xlu0 %1933 }
 0x134   : > { %1837 = vst.msk [vmem:[#allocation3] sm:$0xff] %vm1836_vm10, %v1741_v54 }
 0x135   : > { %2030 = vst.msk [vmem:[#allocation3] sm:$0xff] %vm2029_vm11, %v1934_v7  ;;  %1377 = vrot.lane.b32.xlu1 %v3337_v45, %s2905_s8  ;;  %1571 = vrot.lane.b32.xlu0 %v3223_v34, %s2906_s9 }
 0x137   : > { %v1743_v30 = vpop.permute.xlu1 %1742  ;;  %v1358_v1 = vpop.permute.xlu0 %1357 }
 0x138   : > { %1838 = vst.msk [vmem:[#allocation3 + $0x8] sm:$0xff] %vm1836_vm10, %v1743_v30 }
 0x139   : > { %1452 = vst.msk [vmem:[#allocation3 + $0x10] sm:$0xff] %vm1449_vm8, %v1358_v1  ;;  %1379 = vrot.lane.b32.xlu1 %v3351_v50, %s2905_s8  ;;  %1573 = vrot.lane.b32.xlu0 %v3237_v37, %s2906_s9 }
 0x13b   : > { %v1167_v16 = vpop.permute.xlu1 %1166  ;;  %v1360_v9 = vpop.permute.xlu0 %1359 }
 0x13c   : > { %1260 = vst.msk [vmem:[#allocation3 + $0x18] sm:$0xff] %vm1256_vm7, %v1167_v16  ;;  %v2062_v45 = vld [vmem:[#allocation3] sm:$0xff] }
 0x13d   : > { %1453 = vst.msk [vmem:[#allocation3 + $0x18] sm:$0xff] %vm1449_vm8, %v1360_v9  ;;  %995 = vrot.lane.b32.xlu1 %v3223_v34, %s2903_s6  ;;  %997 = vrot.lane.b32.xlu0 %v3237_v37, %s2903_s6 }
 0x13e   : > { %2811 = vmatprep.mubr.msk.f32.mxu0 %vm2099_vm12, %v2062_v45 }
 0x13f   : > { %v1936_v50 = vpop.permute.xlu1 %1935  ;;  %v1554_v25 = vpop.permute.xlu0 %1553 }
 0x140   : > { %2031 = vst.msk [vmem:[#allocation3 + $0x8] sm:$0xff] %vm2029_vm11, %v1936_v50 }
 0x141   : > { %1647 = vst.msk [vmem:[#allocation3 + $0x18] sm:$0xff] %vm1643_vm9, %v1554_v25  ;;  %1764 = vrot.lane.b32.xlu1 %v1688_v8, %s2907_s20  ;;  %1766 = vrot.lane.b32.xlu0 %v1689_v11, %s2907_s20  ;;  %v1694_v25 = vld [vmem:[#allocation2 + $0x109] sm:$0xff] }
 0x143   : > { %v1552_v23 = vpop.permute.xlu1 %1551  ;;  %v1169_v15 = vpop.permute.xlu0 %1168 }
 0x144   : > { %1646 = vst.msk [vmem:[#allocation3 + $0x10] sm:$0xff] %vm1643_vm9, %v1552_v23  ;;  %v1695_v23 = vld [vmem:[#allocation2 + $0x111] sm:$0xff] }
 0x145   : > { %1261 = vst.msk [vmem:[#allocation3 + $0x20] sm:$0xff] %vm1256_vm7, %v1169_v15  ;;  %1188 = vrot.lane.b32.xlu1 %v1688_v8, %s2904_s7  ;;  %1190 = vrot.lane.b32.xlu0 %v1689_v11, %s2904_s7 }
 0x147   : > { %v1745_v34 = vpop.permute.xlu1 %1744  ;;  %v1938_v37 = vpop.permute.xlu0 %1937  ;;  %v2063_v51 = vld [vmem:[#allocation3 + $0x8] sm:$0xff] }
 0x148   : > { %1839 = vst.msk [vmem:[#allocation3 + $0x10] sm:$0xff] %vm1836_vm10, %v1745_v34  ;;  %2812 = vmatmul.mubr.msk.f32.vlgmr.msra.gmra.mrb[0].mxu0 %vm2099_vm12, %v2063_v51 }
 0x149   : > { %2032 = vst.msk [vmem:[#allocation3 + $0x10] sm:$0xff] %vm2029_vm11, %v1938_v37  ;;  %1957 = vrot.lane.b32.xlu1 %v3345_v49, %s2908_s22  ;;  %1959 = vrot.lane.b32.xlu0 %v3356_v57, %s2908_s22 }
 0x14b   : > { %v1747_v56 = vpop.permute.xlu1 %1746  ;;  %v1362_v58 = vpop.permute.xlu0 %1361 }
 0x14c   : > { %1840 = vst.msk [vmem:[#allocation3 + $0x18] sm:$0xff] %vm1836_vm10, %v1747_v56 }
 0x14d   : > { %1454 = vst.msk [vmem:[#allocation3 + $0x20] sm:$0xff] %vm1449_vm8, %v1362_v58  ;;  %1381 = vrot.lane.b32.xlu1 %v3345_v49, %s2905_s8  ;;  %1575 = vrot.lane.b32.xlu0 %v3235_v36, %s2906_s9 }
 0x14f   : > { %v1171_v22 = vpop.permute.xlu1 %1170  ;;  %v1364_v29 = vpop.permute.xlu0 %1363 }
 0x150   : > { %1262 = vst.msk [vmem:[#allocation3 + $0x28] sm:$0xff] %vm1256_vm7, %v1171_v22  ;;  %v2064_v59 = vld [vmem:[#allocation3 + $0x10] sm:$0xff] }
 0x151   : > { %1455 = vst.msk [vmem:[#allocation3 + $0x28] sm:$0xff] %vm1449_vm8, %v1364_v29  ;;  %1383 = vrot.lane.b32.xlu1 %v3356_v57, %s2905_s8  ;;  %1577 = vrot.lane.b32.xlu0 %v3247_v39, %s2906_s9 }
 0x152   : > { %2814 = vmatprep.mubr.msk.f32.mxu0 %vm2099_vm12, %v2064_v59 }
 0x153   : > { %v1940_v2 = vpop.permute.xlu1 %1939  ;;  %v1558_v49 = vpop.permute.xlu0 %1557 }
 0x154   : > { %2033 = vst.msk [vmem:[#allocation3 + $0x18] sm:$0xff] %vm2029_vm11, %v1940_v2 }
 0x155   : > { %1649 = vst.msk [vmem:[#allocation3 + $0x28] sm:$0xff] %vm1643_vm9, %v1558_v49  ;;  %999 = vrot.lane.b32.xlu1 %v3235_v36, %s2903_s6  ;;  %1001 = vrot.lane.b32.xlu0 %v3247_v39, %s2903_s6  ;;  %v1883_v36 = vld [vmem:[#allocation2 + $0xda] sm:$0xff]  ;;  %v1884_v39 = vld [vmem:[#allocation2 + $0xe2] sm:$0xff] }
 0x157   : > { %v1556_v57 = vpop.permute.xlu1 %1555  ;;  %v1173_v31 = vpop.permute.xlu0 %1172 }
 0x158   : > { %1648 = vst.msk [vmem:[#allocation3 + $0x20] sm:$0xff] %vm1643_vm9, %v1556_v57 }
 0x159   : > { %1263 = vst.msk [vmem:[#allocation3 + $0x30] sm:$0xff] %vm1256_vm7, %v1173_v31  ;;  %1768 = vrot.lane.b32.xlu1 %v1690_v18, %s2907_s20  ;;  %1770 = vrot.lane.b32.xlu0 %v1691_v27, %s2907_s20  ;;  %v1696_v31 = vld [vmem:[#allocation2 + $0x121] sm:$0xff] }
 0x15b   : > { %v1749_v13 = vpop.permute.xlu1 %1748  ;;  %v1942_v20 = vpop.permute.xlu0 %1941  ;;  %v2065_v60 = vld [vmem:[#allocation3 + $0x18] sm:$0xff] }
 0x15c   : > { %1841 = vst.msk [vmem:[#allocation3 + $0x20] sm:$0xff] %vm1836_vm10, %v1749_v13  ;;  %2815 = vmatmul.mubr.msk.f32.gmra.mrb[2].mxu0 %vm2099_vm12, %v2065_v60  ;;  %v1697_v60 = vld [vmem:[#allocation2 + $0x129] sm:$0xff] }
 0x15d   : > { %2034 = vst.msk [vmem:[#allocation3 + $0x20] sm:$0xff] %vm2029_vm11, %v1942_v20  ;;  %1192 = vrot.lane.b32.xlu1 %v1690_v18, %s2904_s7  ;;  %1194 = vrot.lane.b32.xlu0 %v1691_v27, %s2904_s7 }
 0x15f   : > { %v1751_v14 = vpop.permute.xlu1 %1750  ;;  %v1366_v10 = vpop.permute.xlu0 %1365 }
 0x160   : > { %1842 = vst.msk [vmem:[#allocation3 + $0x28] sm:$0xff] %vm1836_vm10, %v1751_v14 }
 0x161   : > { %1456 = vst.msk [vmem:[#allocation3 + $0x30] sm:$0xff] %vm1449_vm8, %v1366_v10  ;;  %1961 = vrot.lane.b32.xlu1 %v1883_v36, %s2908_s22  ;;  %1963 = vrot.lane.b32.xlu0 %v1884_v39, %s2908_s22  ;;  %v1890_v10 = vld [vmem:[#allocation2 + $0x12a] sm:$0xff] }
 0x163   : > { %v1175_v24 = vpop.permute.xlu1 %1174  ;;  %v1368_v61 = vpop.permute.xlu0 %1367 }
 0x164   : > { %1264 = vst.msk [vmem:[#allocation3 + $0x38] sm:$0xff] %vm1256_vm7, %v1175_v24  ;;  %v2066_v62 = vld [vmem:[#allocation3 + $0x20] sm:$0xff] }
 0x165   : > { %1457 = vst.msk [vmem:[#allocation3 + $0x38] sm:$0xff] %vm1449_vm8, %v1368_v61  ;;  %1385 = vrot.lane.b32.xlu1 %v1883_v36, %s2905_s8  ;;  %1579 = vrot.lane.b32.xlu0 %v3239_v38, %s2906_s9 }
 0x166   : > { %2817 = vmatprep.mubr.msk.f32.mxu0 %vm2099_vm12, %v2066_v62 }
 0x167   : > { %v1944_v52 = vpop.permute.xlu1 %1943  ;;  %v1562_v63 = vpop.permute.xlu0 %1561 }
 0x168   : > { %2035 = vst.msk [vmem:[#allocation3 + $0x28] sm:$0xff] %vm2029_vm11, %v1944_v52 }
 0x169   : > { %1651 = vst.msk [vmem:[#allocation3 + $0x38] sm:$0xff] %vm1643_vm9, %v1562_v63  ;;  %1387 = vrot.lane.b32.xlu1 %v1884_v39, %s2905_s8  ;;  %1581 = vrot.lane.b32.xlu0 %v3251_v41, %s2906_s9  ;;  %v1505_v63 = vld [vmem:[#allocation2 + $0x138] sm:$0xff] }
 0x16b   : > { %v1560_v48 = vpop.permute.xlu1 %1559  ;;  %v1177_v3 = vpop.permute.xlu0 %1176 }
 0x16c   : > { %1650 = vst.msk [vmem:[#allocation3 + $0x30] sm:$0xff] %vm1643_vm9, %v1560_v48  ;;  %v1698_v48 = vld [vmem:[#allocation2 + $0x139] sm:$0xff] }
 0x16d   : > { %1265 = vst.msk [vmem:[#allocation3 + $0x40] sm:$0xff] %vm1256_vm7, %v1177_v3  ;;  %1003 = vrot.lane.b32.xlu1 %v3239_v38, %s2903_s6  ;;  %1005 = vrot.lane.b32.xlu0 %v3251_v41, %s2903_s6 }
 0x16f   : > { %v1753_v6 = vpop.permute.xlu1 %1752  ;;  %v1946_v46 = vpop.permute.xlu0 %1945  ;;  %v2067_v17 = vld [vmem:[#allocation3 + $0x28] sm:$0xff] }
 0x170   : > { %1843 = vst.msk [vmem:[#allocation3 + $0x30] sm:$0xff] %vm1836_vm10, %v1753_v6  ;;  %2818 = vmatmul.mubr.msk.f32.gmra.mrb[4].mxu0 %vm2099_vm12, %v2067_v17 }
 0x171   : > { %2036 = vst.msk [vmem:[#allocation3 + $0x30] sm:$0xff] %vm2029_vm11, %v1946_v46  ;;  %1772 = vrot.lane.b32.xlu1 %v1692_v53, %s2907_s20  ;;  %1774 = vrot.lane.b32.xlu0 %v1693_v32, %s2907_s20  ;;  %v1892_v46 = vld [vmem:[#allocation2 + $0x142] sm:$0xff] }
 0x173   : > { %v1755_v38 = vpop.permute.xlu1 %1754  ;;  %v1370_v41 = vpop.permute.xlu0 %1369 }
 0x174   : > { %1844 = vst.msk [vmem:[#allocation3 + $0x38] sm:$0xff] %vm1836_vm10, %v1755_v38 }
 0x175   : > { %1458 = vst.msk [vmem:[#allocation3 + $0x40] sm:$0xff] %vm1449_vm8, %v1370_v41  ;;  %1196 = vrot.lane.b32.xlu1 %v1692_v53, %s2904_s7  ;;  %1198 = vrot.lane.b32.xlu0 %v1693_v32, %s2904_s7  ;;  %v1891_v32 = vld [vmem:[#allocation2 + $0x13a] sm:$0xff] }
 0x177   : > { %v1179_v54 = vpop.permute.xlu1 %1178  ;;  %v1372_v7 = vpop.permute.xlu0 %1371 }
 0x178   : > { %1266 = vst.msk [vmem:[#allocation3 + $0x48] sm:$0xff] %vm1256_vm7, %v1179_v54  ;;  %v2068_v30 = vld [vmem:[#allocation3 + $0x30] sm:$0xff] }
 0x179   : > { %1459 = vst.msk [vmem:[#allocation3 + $0x48] sm:$0xff] %vm1449_vm8, %v1372_v7  ;;  %1965 = vrot.lane.b32.xlu1 %v1885_v28, %s2908_s22  ;;  %1967 = vrot.lane.b32.xlu0 %v1886_v35, %s2908_s22  ;;  %v1508_v7 = vld [vmem:[#allocation2 + $0x158] sm:$0xff] }
 0x17a   : > { %2820 = vmatprep.mubr.msk.f32.mxu0 %vm2099_vm12, %v2068_v30 }
 0x17b   : > { %v1948_v1 = vpop.permute.xlu1 %1947  ;;  %v1566_v16 = vpop.permute.xlu0 %1565 }
 0x17c   : > { %2037 = vst.msk [vmem:[#allocation3 + $0x38] sm:$0xff] %vm2029_vm11, %v1948_v1 }
 0x17d   : > { %1653 = vst.msk [vmem:[#allocation3 + $0x48] sm:$0xff] %vm1643_vm9, %v1566_v16  ;;  %1389 = vrot.lane.b32.xlu1 %v1885_v28, %s2905_s8  ;;  %1583 = vrot.lane.b32.xlu0 %v3249_v40, %s2906_s9  ;;  %v1507_v28 = vld [vmem:[#allocation2 + $0x150] sm:$0xff] }
 0x17e   : > { %v1700_v16 = vld [vmem:[#allocation2 + $0x151] sm:$0xff] }
 0x17f   : > { %v1564_v9 = vpop.permute.xlu1 %1563  ;;  %v990_v45 = vpop.permute.xlu0 %989 }
 0x180   : > { %1652 = vst.msk [vmem:[#allocation3 + $0x40] sm:$0xff] %vm1643_vm9, %v1564_v9 }
 0x181   : > { %1075 = vst.msk [vmem:[#allocation3 + $0x58] sm:$0xff] %vm1063_vm6, %v990_v45  ;;  %1391 = vrot.lane.b32.xlu1 %v1886_v35, %s2905_s8  ;;  %1585 = vrot.lane.b32.xlu0 %v3265_v43, %s2906_s9 }
 0x183   : > { %v1757_v8 = vpop.permute.xlu1 %1756  ;;  %v1759_v11 = vpop.permute.xlu0 %1758  ;;  %v2069_v50 = vld [vmem:[#allocation3 + $0x38] sm:$0xff] }
 0x184   : > { %1845 = vst.msk [vmem:[#allocation3 + $0x40] sm:$0xff] %vm1836_vm10, %v1757_v8  ;;  %1846 = vst.msk [vmem:[#allocation3 + $0x48] sm:$0xff] %vm1836_vm10, %v1759_v11  ;;  %2821 = vmatmul.mubr.msk.f32.gmra.mrb[6].mxu0 %vm2099_vm12, %v2069_v50  ;;  %v1701_v8 = vld [vmem:[#allocation2 + $0x159] sm:$0xff] }
 0x185   : > { %1007 = vrot.lane.b32.xlu1 %v3249_v40, %s2903_s6  ;;  %1009 = vrot.lane.b32.xlu0 %v3265_v43, %s2903_s6  ;;  %v1887_v40 = vld [vmem:[#allocation2 + $0x10a] sm:$0xff]  ;;  %v1888_v43 = vld [vmem:[#allocation2 + $0x112] sm:$0xff] }
 0x187   : > { %v1181_v15 = vpop.permute.xlu1 %1180  ;;  %v1183_v34 = vpop.permute.xlu0 %1182 }
 0x188   : > { %1267 = vst.msk [vmem:[#allocation3 + $0x50] sm:$0xff] %vm1256_vm7, %v1181_v15  ;;  %1268 = vst.msk [vmem:[#allocation3 + $0x58] sm:$0xff] %vm1256_vm7, %v1183_v34  ;;  %v1894_v34 = vld [vmem:[#allocation2 + $0x15a] sm:$0xff] }
 0x189   : > { %1776 = vrot.lane.b32.xlu1 %v1694_v25, %s2907_s20  ;;  %1778 = vrot.lane.b32.xlu0 %v1695_v23, %s2907_s20 }
 0x18b   : > { %v1950_v37 = vpop.permute.xlu1 %1949  ;;  %v1952_v51 = vpop.permute.xlu0 %1951 }
 0x18c   : > { %2038 = vst.msk [vmem:[#allocation3 + $0x40] sm:$0xff] %vm2029_vm11, %v1950_v37  ;;  %2039 = vst.msk [vmem:[#allocation3 + $0x48] sm:$0xff] %vm2029_vm11, %v1952_v51 }
 0x18d   : > { %1200 = vrot.lane.b32.xlu1 %v1694_v25, %s2904_s7  ;;  %1202 = vrot.lane.b32.xlu0 %v1695_v23, %s2904_s7  ;;  %v1893_v25 = vld [vmem:[#allocation2 + $0x152] sm:$0xff] }
 0x18f   : > { %v1374_v56 = vpop.permute.xlu1 %1373  ;;  %v1568_v58 = vpop.permute.xlu0 %1567 }
 0x190   : > { %1460 = vst.msk [vmem:[#allocation3 + $0x50] sm:$0xff] %vm1449_vm8, %v1374_v56  ;;  %v1509_v56 = vld [vmem:[#allocation2 + $0x168] sm:$0xff] }
 0x191   : > { %1654 = vst.msk [vmem:[#allocation3 + $0x50] sm:$0xff] %vm1643_vm9, %v1568_v58  ;;  %1969 = vrot.lane.b32.xlu1 %v1887_v40, %s2908_s22  ;;  %1971 = vrot.lane.b32.xlu0 %v1888_v43, %s2908_s22 }
 0x193   : > { %v1376_v22 = vpop.permute.xlu1 %1375  ;;  %v1570_v29 = vpop.permute.xlu0 %1569  ;;  %v2070_v59 = vld [vmem:[#allocation3 + $0x40] sm:$0xff]  ;;  %v2071_v2 = vld [vmem:[#allocation3 + $0x48] sm:$0xff] }
 0x194   : > { %1461 = vst.msk [vmem:[#allocation3 + $0x58] sm:$0xff] %vm1449_vm8, %v1376_v22  ;;  %2823 = vmatprep.mubr.msk.f32.mxu0 %vm2099_vm12, %v2070_v59 }
 0x195   : > { %1655 = vst.msk [vmem:[#allocation3 + $0x58] sm:$0xff] %vm1643_vm9, %v1570_v29  ;;  %1393 = vrot.lane.b32.xlu1 %v1887_v40, %s2905_s8  ;;  %2824 = vmatmul.mubr.msk.f32.gmra.mrb[8].mxu0 %vm2099_vm12, %v2071_v2  ;;  %v1510_v29 = vld [vmem:[#allocation2 + $0x170] sm:$0xff] }
 0x196   : > { %1587 = vrot.lane.b32.xlu0 %v3259_v42, %s2906_s9 }
 0x197   : > { %v992_v49 = vpop.permute.xlu1 %991  ;;  %v994_v18 = vpop.permute.xlu0 %993 }
 0x198   : > { %1076 = vst.msk [vmem:[#allocation3 + $0x60] sm:$0xff] %vm1063_vm6, %v992_v49  ;;  %1077 = vst.msk [vmem:[#allocation3 + $0x68] sm:$0xff] %vm1063_vm6, %v994_v18  ;;  %v1702_v49 = vld [vmem:[#allocation2 + $0x169] sm:$0xff] }
 0x199   : > { %1395 = vrot.lane.b32.xlu1 %v1888_v43, %s2905_s8 }
 0x19a   : > { %1589 = vrot.lane.b32.xlu0 %v3272_v47, %s2906_s9 }
 0x19b   : > { %v1761_v27 = vpop.permute.xlu1 %1760  ;;  %v1763_v57 = vpop.permute.xlu0 %1762 }
 0x19c   : > { %1847 = vst.msk [vmem:[#allocation3 + $0x50] sm:$0xff] %vm1836_vm10, %v1761_v27  ;;  %1848 = vst.msk [vmem:[#allocation3 + $0x58] sm:$0xff] %vm1836_vm10, %v1763_v57  ;;  %v1703_v57 = vld [vmem:[#allocation2 + $0x171] sm:$0xff] }
 0x19d   : > { %1011 = vrot.lane.b32.xlu1 %v3259_v42, %s2903_s6  ;;  %v1889_v42 = vld [vmem:[#allocation2 + $0x122] sm:$0xff] }
 0x19e   : > { %1013 = vrot.lane.b32.xlu0 %v3272_v47, %s2903_s6 }
 0x19f   : > { %v1185_v13 = vpop.permute.xlu1 %1184  ;;  %v1187_v20 = vpop.permute.xlu0 %1186 }
 0x1a0   : > { %1269 = vst.msk [vmem:[#allocation3 + $0x60] sm:$0xff] %vm1256_vm7, %v1185_v13  ;;  %1270 = vst.msk [vmem:[#allocation3 + $0x68] sm:$0xff] %vm1256_vm7, %v1187_v20  ;;  %v1895_v20 = vld [vmem:[#allocation2 + $0x16a] sm:$0xff] }
 0x1a1   : > { %1780 = vrot.lane.b32.xlu1 %v1696_v31, %s2907_s20 }
 0x1a2   : > { %1782 = vrot.lane.b32.xlu0 %v1697_v60, %s2907_s20 }
 0x1a3   : > { %v1954_v36 = vpop.permute.xlu1 %1953  ;;  %v1956_v39 = vpop.permute.xlu0 %1955 }
 0x1a4   : > { %2040 = vst.msk [vmem:[#allocation3 + $0x50] sm:$0xff] %vm2029_vm11, %v1954_v36  ;;  %2041 = vst.msk [vmem:[#allocation3 + $0x58] sm:$0xff] %vm2029_vm11, %v1956_v39  ;;  %v1896_v39 = vld [vmem:[#allocation2 + $0x172] sm:$0xff] }
 0x1a5   : > { %1204 = vrot.lane.b32.xlu1 %v1696_v31, %s2904_s7 }
 0x1a6   : > { %1206 = vrot.lane.b32.xlu0 %v1697_v60, %s2904_s7 }
 0x1a7   : > { %v1378_v47 = vpop.permute.xlu1 %1377  ;;  %v1572_v14 = vpop.permute.xlu0 %1571 }
 0x1a8   : > { %1462 = vst.msk [vmem:[#allocation3 + $0x60] sm:$0xff] %vm1449_vm8, %v1378_v47 }
 0x1a9   : > { %1656 = vst.msk [vmem:[#allocation3 + $0x60] sm:$0xff] %vm1643_vm9, %v1572_v14  ;;  %1973 = vrot.lane.b32.xlu1 %v1889_v42, %s2908_s22 }
 0x1aa   : > { %1975 = vrot.lane.b32.xlu0 %v1890_v10, %s2908_s22 }
 0x1ab   : > { %v1380_v24 = vpop.permute.xlu1 %1379  ;;  %v1574_v61 = vpop.permute.xlu0 %1573  ;;  %v2072_v62 = vld [vmem:[#allocation3 + $0x50] sm:$0xff]  ;;  %v2073_v52 = vld [vmem:[#allocation3 + $0x58] sm:$0xff] }
 0x1ac   : > { %1463 = vst.msk [vmem:[#allocation3 + $0x68] sm:$0xff] %vm1449_vm8, %v1380_v24  ;;  %2826 = vmatprep.mubr.msk.f32.mxu0 %vm2099_vm12, %v2072_v62  ;;  %v1511_v24 = vld [vmem:[#allocation2 + $0x180] sm:$0xff] }
 0x1ad   : > { %1657 = vst.msk [vmem:[#allocation3 + $0x68] sm:$0xff] %vm1643_vm9, %v1574_v61  ;;  %1397 = vrot.lane.b32.xlu1 %v1889_v42, %s2905_s8  ;;  %2827 = vmatmul.mubr.msk.f32.gmra.mrb[10].mxu0 %vm2099_vm12, %v2073_v52  ;;  %v1512_v52 = vld [vmem:[#allocation2 + $0x188] sm:$0xff] }
 0x1ae   : > { %1591 = vrot.lane.b32.xlu0 %v1505_v63, %s2906_s9 }
 0x1af   : > { %v996_v44 = vpop.permute.xlu1 %995  ;;  %v998_v0 = vpop.permute.xlu0 %997 }
 0x1b0   : > { %1078 = vst.msk [vmem:[#allocation3 + $0x70] sm:$0xff] %vm1063_vm6, %v996_v44  ;;  %1079 = vst.msk [vmem:[#allocation3 + $0x78] sm:$0xff] %vm1063_vm6, %v998_v0  ;;  %v1704_v0 = vld [vmem:[#allocation2 + $0x181] sm:$0xff] }
 0x1b1   : > { %1399 = vrot.lane.b32.xlu1 %v1890_v10, %s2905_s8 }
 0x1b2   : > { %1593 = vrot.lane.b32.xlu0 %v1506_v19, %s2906_s9 }
 0x1b3   : > { %v1765_v26 = vpop.permute.xlu1 %1764  ;;  %v1767_v33 = vpop.permute.xlu0 %1766 }
 0x1b4   : > { %1849 = vst.msk [vmem:[#allocation3 + $0x60] sm:$0xff] %vm1836_vm10, %v1765_v26  ;;  %1850 = vst.msk [vmem:[#allocation3 + $0x68] sm:$0xff] %vm1836_vm10, %v1767_v33  ;;  %v1705_v33 = vld [vmem:[#allocation2 + $0x189] sm:$0xff] }
 0x1b5   : > { %1015 = vrot.lane.b32.xlu1 %v1505_v63, %s2903_s6 }
 0x1b6   : > { %1017 = vrot.lane.b32.xlu0 %v1506_v19, %s2903_s6 }
 0x1b7   : > { %v1189_v3 = vpop.permute.xlu1 %1188  ;;  %v1191_v12 = vpop.permute.xlu0 %1190 }
 0x1b8   : > { %1271 = vst.msk [vmem:[#allocation3 + $0x70] sm:$0xff] %vm1256_vm7, %v1189_v3  ;;  %1272 = vst.msk [vmem:[#allocation3 + $0x78] sm:$0xff] %vm1256_vm7, %v1191_v12  ;;  %v1897_v12 = vld [vmem:[#allocation2 + $0x182] sm:$0xff] }
 0x1b9   : > { %1784 = vrot.lane.b32.xlu1 %v1698_v48, %s2907_s20 }
 0x1ba   : > { %1786 = vrot.lane.b32.xlu0 %v1699_v4, %s2907_s20 }
 0x1bb   : > { %v1958_v5 = vpop.permute.xlu1 %1957  ;;  %v1960_v53 = vpop.permute.xlu0 %1959 }
 0x1bc   : > { %2042 = vst.msk [vmem:[#allocation3 + $0x60] sm:$0xff] %vm2029_vm11, %v1958_v5  ;;  %2043 = vst.msk [vmem:[#allocation3 + $0x68] sm:$0xff] %vm2029_vm11, %v1960_v53  ;;  %v1898_v5 = vld [vmem:[#allocation2 + $0x18a] sm:$0xff] }
 0x1bd   : > { %1208 = vrot.lane.b32.xlu1 %v1698_v48, %s2904_s7 }
 0x1be   : > { %1210 = vrot.lane.b32.xlu0 %v1699_v4, %s2904_s7 }
 0x1bf   : > { %v1382_v55 = vpop.permute.xlu1 %1381  ;;  %v1576_v6 = vpop.permute.xlu0 %1575 }
 0x1c0   : > { %1464 = vst.msk [vmem:[#allocation3 + $0x70] sm:$0xff] %vm1449_vm8, %v1382_v55 }
 0x1c1   : > { %1658 = vst.msk [vmem:[#allocation3 + $0x70] sm:$0xff] %vm1643_vm9, %v1576_v6  ;;  %1977 = vrot.lane.b32.xlu1 %v1891_v32, %s2908_s22 }
 0x1c2   : > { %1979 = vrot.lane.b32.xlu0 %v1892_v46, %s2908_s22 }
 0x1c3   : > { %v1384_v17 = vpop.permute.xlu1 %1383  ;;  %v1578_v21 = vpop.permute.xlu0 %1577  ;;  %v2074_v38 = vld [vmem:[#allocation3 + $0x60] sm:$0xff]  ;;  %v2075_v41 = vld [vmem:[#allocation3 + $0x68] sm:$0xff] }
 0x1c4   : > { %1465 = vst.msk [vmem:[#allocation3 + $0x78] sm:$0xff] %vm1449_vm8, %v1384_v17  ;;  %2829 = vmatprep.mubr.msk.f32.mxu0 %vm2099_vm12, %v2074_v38  ;;  %v1706_v38 = vld [vmem:[#allocation2 + $0x199] sm:$0xff] }
 0x1c5   : > { %1659 = vst.msk [vmem:[#allocation3 + $0x78] sm:$0xff] %vm1643_vm9, %v1578_v21  ;;  %1401 = vrot.lane.b32.xlu1 %v1891_v32, %s2905_s8  ;;  %2830 = vmatmul.mubr.msk.f32.gmra.mrb[12].mxu0 %vm2099_vm12, %v2075_v41 }
 0x1c6   : > { %1595 = vrot.lane.b32.xlu0 %v1507_v28, %s2906_s9 }
 0x1c7   : > { %v1000_v35 = vpop.permute.xlu1 %999  ;;  %v1002_v54 = vpop.permute.xlu0 %1001 }
 0x1c8   : > { %1080 = vst.msk [vmem:[#allocation3 + $0x80] sm:$0xff] %vm1063_vm6, %v1000_v35  ;;  %1081 = vst.msk [vmem:[#allocation3 + $0x88] sm:$0xff] %vm1063_vm6, %v1002_v54  ;;  %v1899_v54 = vld [vmem:[#allocation2 + $0x19a] sm:$0xff] }
 0x1c9   : > { %1403 = vrot.lane.b32.xlu1 %v1892_v46, %s2905_s8  ;;  %v1513_v46 = vld [vmem:[#allocation2 + $0x198] sm:$0xff] }
 0x1ca   : > { %1597 = vrot.lane.b32.xlu0 %v1508_v7, %s2906_s9 }
 0x1cb   : > { %v1769_v30 = vpop.permute.xlu1 %1768  ;;  %v1771_v1 = vpop.permute.xlu0 %1770 }
 0x1cc   : > { %1851 = vst.msk [vmem:[#allocation3 + $0x70] sm:$0xff] %vm1836_vm10, %v1769_v30  ;;  %1852 = vst.msk [vmem:[#allocation3 + $0x78] sm:$0xff] %vm1836_vm10, %v1771_v1  ;;  %v1707_v30 = vld [vmem:[#allocation2 + $0x1a1] sm:$0xff] }
 0x1cd   : > { %1019 = vrot.lane.b32.xlu1 %v1507_v28, %s2903_s6  ;;  %v1514_v28 = vld [vmem:[#allocation2 + $0x1a0] sm:$0xff] }
 0x1ce   : > { %1021 = vrot.lane.b32.xlu0 %v1508_v7, %s2903_s6 }
 0x1cf   : > { %v1193_v9 = vpop.permute.xlu1 %1192  ;;  %v1195_v45 = vpop.permute.xlu0 %1194 }
 0x1d0   : > { %1273 = vst.msk [vmem:[#allocation3 + $0x80] sm:$0xff] %vm1256_vm7, %v1193_v9  ;;  %1274 = vst.msk [vmem:[#allocation3 + $0x88] sm:$0xff] %vm1256_vm7, %v1195_v45  ;;  %v1900_v9 = vld [vmem:[#allocation2 + $0x1a2] sm:$0xff] }
 0x1d1   : > { %1788 = vrot.lane.b32.xlu1 %v1700_v16, %s2907_s20 }
 0x1d2   : > { %1790 = vrot.lane.b32.xlu0 %v1701_v8, %s2907_s20 }
 0x1d3   : > { %v1962_v11 = vpop.permute.xlu1 %1961  ;;  %v1964_v50 = vpop.permute.xlu0 %1963 }
 0x1d4   : > { %2044 = vst.msk [vmem:[#allocation3 + $0x70] sm:$0xff] %vm2029_vm11, %v1962_v11  ;;  %2045 = vst.msk [vmem:[#allocation3 + $0x78] sm:$0xff] %vm2029_vm11, %v1964_v50 }
 0x1d5   : > { %1212 = vrot.lane.b32.xlu1 %v1700_v16, %s2904_s7 }
 0x1d6   : > { %1214 = vrot.lane.b32.xlu0 %v1701_v8, %s2904_s7 }
 0x1d7   : > { %v1386_v23 = vpop.permute.xlu1 %1385  ;;  %v1580_v15 = vpop.permute.xlu0 %1579 }
 0x1d8   : > { %1466 = vst.msk [vmem:[#allocation3 + $0x80] sm:$0xff] %vm1449_vm8, %v1386_v23 }
 0x1d9   : > { %1660 = vst.msk [vmem:[#allocation3 + $0x80] sm:$0xff] %vm1643_vm9, %v1580_v15  ;;  %1981 = vrot.lane.b32.xlu1 %v1893_v25, %s2908_s22 }
 0x1da   : > { %1983 = vrot.lane.b32.xlu0 %v1894_v34, %s2908_s22 }
 0x1db   : > { %v1388_v37 = vpop.permute.xlu1 %1387  ;;  %v1582_v51 = vpop.permute.xlu0 %1581  ;;  %v2076_v40 = vld [vmem:[#allocation3 + $0x70] sm:$0xff]  ;;  %v2077_v43 = vld [vmem:[#allocation3 + $0x78] sm:$0xff] }
 0x1dc   : > { %1467 = vst.msk [vmem:[#allocation3 + $0x88] sm:$0xff] %vm1449_vm8, %v1388_v37  ;;  %2832 = vmatprep.mubr.msk.f32.mxu0 %vm2099_vm12, %v2076_v40 }
 0x1dd   : > { %1661 = vst.msk [vmem:[#allocation3 + $0x88] sm:$0xff] %vm1643_vm9, %v1582_v51  ;;  %1405 = vrot.lane.b32.xlu1 %v1893_v25, %s2905_s8  ;;  %2833 = vmatmul.mubr.msk.f32.gmra.mrb[14].mxu0 %vm2099_vm12, %v2077_v43 }
 0x1de   : > { %1599 = vrot.lane.b32.xlu0 %v1509_v56, %s2906_s9 }
 0x1df   : > { %v1004_v58 = vpop.permute.xlu1 %1003  ;;  %v1006_v22 = vpop.permute.xlu0 %1005 }
 0x1e0   : > { %1082 = vst.msk [vmem:[#allocation3 + $0x90] sm:$0xff] %vm1063_vm6, %v1004_v58  ;;  %1083 = vst.msk [vmem:[#allocation3 + $0x98] sm:$0xff] %vm1063_vm6, %v1006_v22 }
 0x1e1   : > { %1407 = vrot.lane.b32.xlu1 %v1894_v34, %s2905_s8 }
 0x1e2   : > { %1601 = vrot.lane.b32.xlu0 %v1510_v29, %s2906_s9 }
 0x1e3   : > { %v1773_v59 = vpop.permute.xlu1 %1772  ;;  %v1775_v2 = vpop.permute.xlu0 %1774 }
 0x1e4   : > { %1853 = vst.msk [vmem:[#allocation3 + $0x80] sm:$0xff] %vm1836_vm10, %v1773_v59  ;;  %1854 = vst.msk [vmem:[#allocation3 + $0x88] sm:$0xff] %vm1836_vm10, %v1775_v2 }
 0x1e5   : > { %1023 = vrot.lane.b32.xlu1 %v1509_v56, %s2903_s6 }
 0x1e6   : > { %1025 = vrot.lane.b32.xlu0 %v1510_v29, %s2903_s6 }
 0x1e7   : > { %v1197_v18 = vpop.permute.xlu1 %1196  ;;  %v1199_v27 = vpop.permute.xlu0 %1198 }
 0x1e8   : > { %1275 = vst.msk [vmem:[#allocation3 + $0x90] sm:$0xff] %vm1256_vm7, %v1197_v18  ;;  %1276 = vst.msk [vmem:[#allocation3 + $0x98] sm:$0xff] %vm1256_vm7, %v1199_v27 }
 0x1e9   : > { %1792 = vrot.lane.b32.xlu1 %v1702_v49, %s2907_s20 }
 0x1ea   : > { %1794 = vrot.lane.b32.xlu0 %v1703_v57, %s2907_s20 }
 0x1eb   : > { %v1966_v31 = vpop.permute.xlu1 %1965  ;;  %v1968_v13 = vpop.permute.xlu0 %1967 }
 0x1ec   : > { %2046 = vst.msk [vmem:[#allocation3 + $0x80] sm:$0xff] %vm2029_vm11, %v1966_v31  ;;  %2047 = vst.msk [vmem:[#allocation3 + $0x88] sm:$0xff] %vm2029_vm11, %v1968_v13 }
 0x1ed   : > { %1216 = vrot.lane.b32.xlu1 %v1702_v49, %s2904_s7 }
 0x1ee   : > { %1218 = vrot.lane.b32.xlu0 %v1703_v57, %s2904_s7 }
 0x1ef   : > { %v1390_v60 = vpop.permute.xlu1 %1389  ;;  %v1584_v36 = vpop.permute.xlu0 %1583 }
 0x1f0   : > { %1468 = vst.msk [vmem:[#allocation3 + $0x90] sm:$0xff] %vm1449_vm8, %v1390_v60 }
 0x1f1   : > { %1662 = vst.msk [vmem:[#allocation3 + $0x90] sm:$0xff] %vm1643_vm9, %v1584_v36  ;;  %1985 = vrot.lane.b32.xlu1 %v1895_v20, %s2908_s22 }
 0x1f2   : > { %1987 = vrot.lane.b32.xlu0 %v1896_v39, %s2908_s22 }
 0x1f3   : > { %v1392_v42 = vpop.permute.xlu1 %1391  ;;  %v1586_v47 = vpop.permute.xlu0 %1585  ;;  %v2078_v14 = vld [vmem:[#allocation3 + $0x80] sm:$0xff]  ;;  %v2079_v10 = vld [vmem:[#allocation3 + $0x88] sm:$0xff] }
 0x1f4   : > { %1469 = vst.msk [vmem:[#allocation3 + $0x98] sm:$0xff] %vm1449_vm8, %v1392_v42  ;;  %2835 = vmatprep.mubr.msk.f32.mxu1 %vm2099_vm12, %v2078_v14 }
 0x1f5   : > { %1663 = vst.msk [vmem:[#allocation3 + $0x98] sm:$0xff] %vm1643_vm9, %v1586_v47  ;;  %1409 = vrot.lane.b32.xlu1 %v1895_v20, %s2905_s8  ;;  %2836 = vmatmul.mubr.msk.f32.vlgmr.msra.gmra.mrb[0].mxu1 %vm2099_vm12, %v2079_v10 }
 0x1f6   : > { %1603 = vrot.lane.b32.xlu0 %v1511_v24, %s2906_s9 }
 0x1f7   : > { %v1008_v61 = vpop.permute.xlu1 %1007  ;;  %v1010_v62 = vpop.permute.xlu0 %1009 }
 0x1f8   : > { %1084 = vst.msk [vmem:[#allocation3 + $0xa0] sm:$0xff] %vm1063_vm6, %v1008_v61  ;;  %1085 = vst.msk [vmem:[#allocation3 + $0xa8] sm:$0xff] %vm1063_vm6, %v1010_v62 }
 0x1f9   : > { %1411 = vrot.lane.b32.xlu1 %v1896_v39, %s2905_s8 }
 0x1fa   : > { %1605 = vrot.lane.b32.xlu0 %v1512_v52, %s2906_s9 }
 0x1fb   : > { %v1777_v63 = vpop.permute.xlu1 %1776  ;;  %v1779_v44 = vpop.permute.xlu0 %1778 }
 0x1fc   : > { %1855 = vst.msk [vmem:[#allocation3 + $0x90] sm:$0xff] %vm1836_vm10, %v1777_v63  ;;  %1856 = vst.msk [vmem:[#allocation3 + $0x98] sm:$0xff] %vm1836_vm10, %v1779_v44 }
 0x1fd   : > { %1027 = vrot.lane.b32.xlu1 %v1511_v24, %s2903_s6 }
 0x1fe   : > { %1029 = vrot.lane.b32.xlu0 %v1512_v52, %s2903_s6  ;;  %s3902_s6 = scalar_lea.vmem %s4116_s4, %s2762_s21  ;;  %s2724_s21 = sshll.u32 %s4120_s19, 1 }
 0x1ff   : > { %v1201_v19 = vpop.permute.xlu1 %1200  ;;  %v1203_v26 = vpop.permute.xlu0 %1202 }
 0x200   : > { %1277 = vst.msk [vmem:[#allocation3 + $0xa0] sm:$0xff] %vm1256_vm7, %v1201_v19  ;;  %1278 = vst.msk [vmem:[#allocation3 + $0xa8] sm:$0xff] %vm1256_vm7, %v1203_v26 }
 0x201   : > { %1796 = vrot.lane.b32.xlu1 %v1704_v0, %s2907_s20 }
 0x202   : > { %1798 = vrot.lane.b32.xlu0 %v1705_v33, %s2907_s20 }
 0x203   : > { %v1970_v48 = vpop.permute.xlu1 %1969  ;;  %v1972_v3 = vpop.permute.xlu0 %1971 }
 0x204   : > { %2048 = vst.msk [vmem:[#allocation3 + $0x90] sm:$0xff] %vm2029_vm11, %v1970_v48  ;;  %2049 = vst.msk [vmem:[#allocation3 + $0x98] sm:$0xff] %vm2029_vm11, %v1972_v3 }
 0x205   : > { %1220 = vrot.lane.b32.xlu1 %v1704_v0, %s2904_s7 }
 0x206   : > { %1222 = vrot.lane.b32.xlu0 %v1705_v33, %s2904_s7 }
 0x207   : > { %v1394_v4 = vpop.permute.xlu1 %1393 }
 0x208   : > { %1470 = vst.msk [vmem:[#allocation3 + $0xa0] sm:$0xff] %vm1449_vm8, %v1394_v4  ;;  %v1588_v53 = vpop.permute.xlu0 %1587 }
 0x209   : > { %1664 = vst.msk [vmem:[#allocation3 + $0xa0] sm:$0xff] %vm1643_vm9, %v1588_v53  ;;  %1989 = vrot.lane.b32.xlu1 %v1897_v12, %s2908_s22 }
 0x20a   : > { %1991 = vrot.lane.b32.xlu0 %v1898_v5, %s2908_s22 }
 0x20b   : > { %v1396_v32 = vpop.permute.xlu1 %1395  ;;  %v2080_v55 = vld [vmem:[#allocation3 + $0x90] sm:$0xff]  ;;  %v2081_v6 = vld [vmem:[#allocation3 + $0x98] sm:$0xff] }
 0x20c   : > { %1471 = vst.msk [vmem:[#allocation3 + $0xa8] sm:$0xff] %vm1449_vm8, %v1396_v32  ;;  %v1590_v17 = vpop.permute.xlu0 %1589  ;;  %2838 = vmatprep.mubr.msk.f32.mxu1 %vm2099_vm12, %v2080_v55 }
 0x20d   : > { %1665 = vst.msk [vmem:[#allocation3 + $0xa8] sm:$0xff] %vm1643_vm9, %v1590_v17  ;;  %1413 = vrot.lane.b32.xlu1 %v1897_v12, %s2905_s8  ;;  %2839 = vmatmul.mubr.msk.f32.gmra.mrb[2].mxu1 %vm2099_vm12, %v2081_v6 }
 0x20e   : > { %1607 = vrot.lane.b32.xlu0 %v1513_v46, %s2906_s9 }
 0x20f   : > { %v1012_v21 = vpop.permute.xlu1 %1011 }
 0x210   : > { %1086 = vst.msk [vmem:[#allocation3 + $0xb0] sm:$0xff] %vm1063_vm6, %v1012_v21  ;;  %v1014_v41 = vpop.permute.xlu0 %1013 }
 0x211   : > { %1087 = vst.msk [vmem:[#allocation3 + $0xb8] sm:$0xff] %vm1063_vm6, %v1014_v41  ;;  %1415 = vrot.lane.b32.xlu1 %v1898_v5, %s2905_s8 }
 0x212   : > { %1800 = vrot.lane.b32.xlu0 %v1706_v38, %s2907_s20 }
 0x213   : > { %v1781_v35 = vpop.permute.xlu1 %1780 }
 0x214   : > { %1857 = vst.msk [vmem:[#allocation3 + $0xa0] sm:$0xff] %vm1836_vm10, %v1781_v35  ;;  %v1783_v7 = vpop.permute.xlu0 %1782 }
 0x215   : > { %1858 = vst.msk [vmem:[#allocation3 + $0xa8] sm:$0xff] %vm1836_vm10, %v1783_v7  ;;  %1609 = vrot.lane.b32.xlu1 %v1514_v28, %s2906_s9  ;;  %s235_s9 = scalar_lea.vmem %s4117_s5, %s2724_s21 }
 0x216   : > { %1993 = vrot.lane.b32.xlu0 %v1899_v54, %s2908_s22 }
 0x217   : > { %v1205_v1 = vpop.permute.xlu1 %1204 }
 0x218   : > { %1279 = vst.msk [vmem:[#allocation3 + $0xb0] sm:$0xff] %vm1256_vm7, %v1205_v1  ;;  %v1207_v16 = vpop.permute.xlu0 %1206 }
 0x219   : > { %1280 = vst.msk [vmem:[#allocation3 + $0xb8] sm:$0xff] %vm1256_vm7, %v1207_v16  ;;  %1802 = vrot.lane.b32.xlu1 %v1707_v30, %s2907_s20 }
 0x21b   : > { %v2813_v45 = vpop.f32.mrb[0].mxu0  ;;  %v1974_v8 = vpop.permute.xlu1 %1973 }
 0x21c   : > { %2426 = vst.msk [vmem:[%s3902_s6 + $0x8] sm:$0xff] %vm378_vm0, %v2813_v45  ;;  %v2458_v11 = vsel %vm378_vm0, %v2813_v45, 0.0  ;;  %v2528_v50 = vmul.f32 %v2813_v45, %v2813_v45  ;;  %v1976_v25 = vpop.permute.xlu0 %1975  ;;  %v2266_v23 = vpop.f32.mrb[1].mxu0 }
 0x21d   : > { %2050 = vst.msk [vmem:[#allocation3 + $0xa0] sm:$0xff] %vm2029_vm11, %v1974_v8  ;;  %2051 = vst.msk [vmem:[#allocation3 + $0xa8] sm:$0xff] %vm2029_vm11, %v1976_v25  ;;  %v2457_v15 = vsel %vm378_vm0, %v2266_v23, 0.0  ;;  %v2527_v34 = vmul.f32 %v2266_v23, %v2266_v23  ;;  %1995 = vrot.lane.b32.xlu1 %v1900_v9, %s2908_s22 }
 0x21e   : > { %2425 = vst.msk [vmem:[%s3902_s6] sm:$0xff] %vm378_vm0, %v2266_v23  ;;  %v2560_v37 = vsel %vm378_vm0, %v2528_v50, 0.0  ;;  %v2459_v51 = vadd.f32 %v2458_v11, %v2457_v15 }
 0x21f   : > { %v2559_v40 = vsel %vm378_vm0, %v2527_v34, 0.0  ;;  %v1398_v43 = vpop.permute.xlu1 %1397 }
 0x220   : > { %v2561_v56 = vadd.f32 %v2560_v37, %v2559_v40  ;;  %1472 = vst.msk [vmem:[#allocation3 + $0xb0] sm:$0xff] %vm1449_vm8, %v1398_v43  ;;  %v1592_v58 = vpop.permute.xlu0 %1591 }
 0x221   : > { %1666 = vst.msk [vmem:[#allocation3 + $0xb0] sm:$0xff] %vm1643_vm9, %v1592_v58 }
 0x223   : > { %v1400_v22 = vpop.permute.xlu1 %1399 }
 0x224   : > { %v2082_v29 = vld [vmem:[#allocation3 + $0xa0] sm:$0xff]  ;;  %1473 = vst.msk [vmem:[#allocation3 + $0xb8] sm:$0xff] %vm1449_vm8, %v1400_v22  ;;  %v1594_v59 = vpop.permute.xlu0 %1593  ;;  %v2083_v2 = vld [vmem:[#allocation3 + $0xa8] sm:$0xff] }
 0x225   : > { %2841 = vmatprep.mubr.msk.f32.mxu1 %vm2099_vm12, %v2082_v29  ;;  %1667 = vst.msk [vmem:[#allocation3 + $0xb8] sm:$0xff] %vm1643_vm9, %v1594_v59 }
 0x226   : > { %2842 = vmatmul.mubr.msk.f32.gmra.mrb[4].mxu1 %vm2099_vm12, %v2083_v2 }
 0x227   : > { %v1016_v49 = vpop.permute.xlu1 %1015 }
 0x228   : > { %1088 = vst.msk [vmem:[#allocation3 + $0xc0] sm:$0xff] %vm1063_vm6, %v1016_v49  ;;  %v1018_v18 = vpop.permute.xlu0 %1017 }
 0x229   : > { %1089 = vst.msk [vmem:[#allocation3 + $0xc8] sm:$0xff] %vm1063_vm6, %v1018_v18 }
 0x22b   : > { %v1785_v27 = vpop.permute.xlu1 %1784 }
 0x22c   : > { %1859 = vst.msk [vmem:[#allocation3 + $0xb0] sm:$0xff] %vm1836_vm10, %v1785_v27  ;;  %v1787_v57 = vpop.permute.xlu0 %1786 }
 0x22d   : > { %1860 = vst.msk [vmem:[#allocation3 + $0xb8] sm:$0xff] %vm1836_vm10, %v1787_v57 }
 0x22f   : > { %v1209_v31 = vpop.permute.xlu1 %1208  ;;  %v2816_v13 = vpop.f32.mrb[2].mxu0 }
 0x230   : > { %1281 = vst.msk [vmem:[#allocation3 + $0xc0] sm:$0xff] %vm1256_vm7, %v1209_v31  ;;  %v1211_v20 = vpop.permute.xlu0 %1210  ;;  %v2276_v60 = vpop.f32.mrb[3].mxu0  ;;  %v2530_v36 = vmul.f32 %v2816_v13, %v2816_v13  ;;  %v2462_v14 = vsel %vm378_vm0, %v2816_v13, 0.0 }
 0x231   : > { %2428 = vst.msk [vmem:[%s3902_s6 + $0x18] sm:$0xff] %vm378_vm0, %v2816_v13  ;;  %2427 = vst.msk [vmem:[%s3902_s6 + $0x10] sm:$0xff] %vm378_vm0, %v2276_v60  ;;  %v2460_v39 = vsel %vm378_vm0, %v2276_v60, 0.0  ;;  %v2529_v42 = vmul.f32 %v2276_v60, %v2276_v60 }
 0x232   : > { %1282 = vst.msk [vmem:[#allocation3 + $0xc8] sm:$0xff] %vm1256_vm7, %v1211_v20  ;;  %v2461_v47 = vadd.f32 %v2460_v39, %v2459_v51  ;;  %v2564_v63 = vsel %vm378_vm0, %v2530_v36, 0.0 }
 0x233   : > { %v2562_v10 = vsel %vm378_vm0, %v2529_v42, 0.0  ;;  %v1978_v24 = vpop.permute.xlu1 %1977 }
 0x234   : > { %v2563_v61 = vadd.f32 %v2562_v10, %v2561_v56  ;;  %2052 = vst.msk [vmem:[#allocation3 + $0xb0] sm:$0xff] %vm2029_vm11, %v1978_v24  ;;  %v1980_v62 = vpop.permute.xlu0 %1979  ;;  %v2463_v52 = vadd.f32 %v2462_v14, %v2461_v47 }
 0x235   : > { %2053 = vst.msk [vmem:[#allocation3 + $0xb8] sm:$0xff] %vm2029_vm11, %v1980_v62 }
 0x236   : > { %v2565_v44 = vadd.f32 %v2564_v63, %v2563_v61 }
 0x237   : > { %v1402_v0 = vpop.permute.xlu1 %1401 }
 0x238   : > { %1474 = vst.msk [vmem:[#allocation3 + $0xc0] sm:$0xff] %vm1449_vm8, %v1402_v0  ;;  %v1596_v19 = vpop.permute.xlu0 %1595 }
 0x239   : > { %1668 = vst.msk [vmem:[#allocation3 + $0xc0] sm:$0xff] %vm1643_vm9, %v1596_v19 }
 0x23b   : > { %v1404_v26 = vpop.permute.xlu1 %1403  ;;  %v2084_v33 = vld [vmem:[#allocation3 + $0xb0] sm:$0xff] }
 0x23c   : > { %1475 = vst.msk [vmem:[#allocation3 + $0xc8] sm:$0xff] %vm1449_vm8, %v1404_v26  ;;  %v1598_v48 = vpop.permute.xlu0 %1597  ;;  %2844 = vmatprep.mubr.msk.f32.mxu1 %vm2099_vm12, %v2084_v33  ;;  %v2085_v3 = vld [vmem:[#allocation3 + $0xb8] sm:$0xff] }
 0x23d   : > { %1669 = vst.msk [vmem:[#allocation3 + $0xc8] sm:$0xff] %vm1643_vm9, %v1598_v48  ;;  %2845 = vmatmul.mubr.msk.f32.gmra.mrb[6].mxu1 %vm2099_vm12, %v2085_v3 }
 0x23f   : > { %v1020_v12 = vpop.permute.xlu1 %1019 }
 0x240   : > { %1090 = vst.msk [vmem:[#allocation3 + $0xd0] sm:$0xff] %vm1063_vm6, %v1020_v12  ;;  %v1022_v4 = vpop.permute.xlu0 %1021 }
 0x241   : > { %1091 = vst.msk [vmem:[#allocation3 + $0xd8] sm:$0xff] %vm1063_vm6, %v1022_v4 }
 0x243   : > { %v1789_v5 = vpop.permute.xlu1 %1788  ;;  %v2819_v53 = vpop.f32.mrb[4].mxu0 }
 0x244   : > { %1861 = vst.msk [vmem:[#allocation3 + $0xc0] sm:$0xff] %vm1836_vm10, %v1789_v5  ;;  %v1791_v32 = vpop.permute.xlu0 %1790  ;;  %v2286_v55 = vpop.f32.mrb[5].mxu0  ;;  %v2532_v6 = vmul.f32 %v2819_v53, %v2819_v53  ;;  %v2466_v38 = vsel %vm378_vm0, %v2819_v53, 0.0 }
 0x245   : > { %2430 = vst.msk [vmem:[%s3902_s6 + $0x28] sm:$0xff] %vm378_vm0, %v2819_v53  ;;  %2429 = vst.msk [vmem:[%s3902_s6 + $0x20] sm:$0xff] %vm378_vm0, %v2286_v55  ;;  %v2464_v46 = vsel %vm378_vm0, %v2286_v55, 0.0  ;;  %v2531_v17 = vmul.f32 %v2286_v55, %v2286_v55 }
 0x246   : > { %1862 = vst.msk [vmem:[#allocation3 + $0xc8] sm:$0xff] %vm1836_vm10, %v1791_v32  ;;  %v2465_v21 = vadd.f32 %v2464_v46, %v2463_v52  ;;  %v2568_v30 = vsel %vm378_vm0, %v2532_v6, 0.0 }
 0x247   : > { %v2566_v41 = vsel %vm378_vm0, %v2531_v17, 0.0  ;;  %v1213_v28 = vpop.permute.xlu1 %1212 }
 0x248   : > { %v2567_v35 = vadd.f32 %v2566_v41, %v2565_v44  ;;  %1283 = vst.msk [vmem:[#allocation3 + $0xd0] sm:$0xff] %vm1256_vm7, %v1213_v28  ;;  %v1215_v54 = vpop.permute.xlu0 %1214  ;;  %v2467_v7 = vadd.f32 %v2466_v38, %v2465_v21 }
 0x249   : > { %1284 = vst.msk [vmem:[#allocation3 + $0xd8] sm:$0xff] %vm1256_vm7, %v1215_v54 }
 0x24a   : > { %v2569_v1 = vadd.f32 %v2568_v30, %v2567_v35 }
 0x24b   : > { %v1982_v16 = vpop.permute.xlu1 %1981 }
 0x24c   : > { %2054 = vst.msk [vmem:[#allocation3 + $0xc0] sm:$0xff] %vm2029_vm11, %v1982_v16  ;;  %v1984_v9 = vpop.permute.xlu0 %1983 }
 0x24d   : > { %2055 = vst.msk [vmem:[#allocation3 + $0xc8] sm:$0xff] %vm2029_vm11, %v1984_v9 }
 0x24f   : > { %v1406_v45 = vpop.permute.xlu1 %1405 }
 0x250   : > { %1476 = vst.msk [vmem:[#allocation3 + $0xd0] sm:$0xff] %vm1449_vm8, %v1406_v45  ;;  %v1600_v8 = vpop.permute.xlu0 %1599 }
 0x251   : > { %1670 = vst.msk [vmem:[#allocation3 + $0xd0] sm:$0xff] %vm1643_vm9, %v1600_v8 }
 0x253   : > { %v1408_v11 = vpop.permute.xlu1 %1407  ;;  %v2086_v50 = vld [vmem:[#allocation3 + $0xc0] sm:$0xff] }
 0x254   : > { %1477 = vst.msk [vmem:[#allocation3 + $0xd8] sm:$0xff] %vm1449_vm8, %v1408_v11  ;;  %v1602_v25 = vpop.permute.xlu0 %1601  ;;  %2847 = vmatprep.mubr.msk.f32.mxu1 %vm2099_vm12, %v2086_v50  ;;  %v2087_v23 = vld [vmem:[#allocation3 + $0xc8] sm:$0xff] }
 0x255   : > { %1671 = vst.msk [vmem:[#allocation3 + $0xd8] sm:$0xff] %vm1643_vm9, %v1602_v25  ;;  %2848 = vmatmul.mubr.msk.f32.gmra.mrb[8].mxu1 %vm2099_vm12, %v2087_v23 }
 0x257   : > { %v1024_v15 = vpop.permute.xlu1 %1023  ;;  %v2822_v34 = vpop.f32.mrb[6].mxu0 }
 0x258   : > { %1092 = vst.msk [vmem:[#allocation3 + $0xe0] sm:$0xff] %vm1063_vm6, %v1024_v15  ;;  %v1026_v37 = vpop.permute.xlu0 %1025  ;;  %v2296_v51 = vpop.f32.mrb[7].mxu0  ;;  %v2534_v40 = vmul.f32 %v2822_v34, %v2822_v34  ;;  %v2470_v22 = vsel %vm378_vm0, %v2822_v34, 0.0 }
 0x259   : > { %2432 = vst.msk [vmem:[%s3902_s6 + $0x38] sm:$0xff] %vm378_vm0, %v2822_v34  ;;  %2431 = vst.msk [vmem:[%s3902_s6 + $0x30] sm:$0xff] %vm378_vm0, %v2296_v51  ;;  %v2468_v43 = vsel %vm378_vm0, %v2296_v51, 0.0  ;;  %v2533_v56 = vmul.f32 %v2296_v51, %v2296_v51 }
 0x25a   : > { %1093 = vst.msk [vmem:[#allocation3 + $0xe8] sm:$0xff] %vm1063_vm6, %v1026_v37  ;;  %v2469_v58 = vadd.f32 %v2468_v43, %v2467_v7  ;;  %v2572_v27 = vsel %vm378_vm0, %v2534_v40, 0.0 }
 0x25b   : > { %v2570_v29 = vsel %vm378_vm0, %v2533_v56, 0.0  ;;  %v1793_v59 = vpop.permute.xlu1 %1792 }
 0x25c   : > { %v2571_v2 = vadd.f32 %v2570_v29, %v2569_v1  ;;  %1863 = vst.msk [vmem:[#allocation3 + $0xd0] sm:$0xff] %vm1836_vm10, %v1793_v59  ;;  %v1795_v49 = vpop.permute.xlu0 %1794  ;;  %v2471_v18 = vadd.f32 %v2470_v22, %v2469_v58 }
 0x25d   : > { %1864 = vst.msk [vmem:[#allocation3 + $0xd8] sm:$0xff] %vm1836_vm10, %v1795_v49 }
 0x25e   : > { %v2573_v57 = vadd.f32 %v2572_v27, %v2571_v2 }
 0x25f   : > { %v1217_v31 = vpop.permute.xlu1 %1216 }
 0x260   : > { %1285 = vst.msk [vmem:[#allocation3 + $0xe0] sm:$0xff] %vm1256_vm7, %v1217_v31  ;;  %v1219_v13 = vpop.permute.xlu0 %1218 }
 0x261   : > { %1286 = vst.msk [vmem:[#allocation3 + $0xe8] sm:$0xff] %vm1256_vm7, %v1219_v13 }
 0x263   : > { %v1986_v20 = vpop.permute.xlu1 %1985 }
 0x264   : > { %2056 = vst.msk [vmem:[#allocation3 + $0xd0] sm:$0xff] %vm2029_vm11, %v1986_v20  ;;  %v1988_v60 = vpop.permute.xlu0 %1987 }
 0x265   : > { %2057 = vst.msk [vmem:[#allocation3 + $0xd8] sm:$0xff] %vm2029_vm11, %v1988_v60 }
 0x267   : > { %v1410_v36 = vpop.permute.xlu1 %1409 }
 0x268   : > { %1478 = vst.msk [vmem:[#allocation3 + $0xe0] sm:$0xff] %vm1449_vm8, %v1410_v36  ;;  %v1604_v39 = vpop.permute.xlu0 %1603  ;;  %v2825_v42 = vpop.f32.mrb[8].mxu0 }
 0x269   : > { %1672 = vst.msk [vmem:[#allocation3 + $0xe0] sm:$0xff] %vm1643_vm9, %v1604_v39  ;;  %v2536_v47 = vmul.f32 %v2825_v42, %v2825_v42  ;;  %v2306_v14 = vpop.f32.mrb[9].mxu0  ;;  %v2474_v10 = vsel %vm378_vm0, %v2825_v42, 0.0 }
 0x26a   : > { %2434 = vst.msk [vmem:[%s3902_s6 + $0x48] sm:$0xff] %vm378_vm0, %v2825_v42  ;;  %2433 = vst.msk [vmem:[%s3902_s6 + $0x40] sm:$0xff] %vm378_vm0, %v2306_v14  ;;  %v2472_v24 = vsel %vm378_vm0, %v2306_v14, 0.0  ;;  %v2535_v61 = vmul.f32 %v2306_v14, %v2306_v14 }
 0x26b   : > { %v2473_v62 = vadd.f32 %v2472_v24, %v2471_v18  ;;  %v1412_v52 = vpop.permute.xlu1 %1411  ;;  %v2088_v63 = vld [vmem:[#allocation3 + $0xd0] sm:$0xff]  ;;  %v2576_v44 = vsel %vm378_vm0, %v2536_v47, 0.0 }
 0x26c   : > { %v2574_v0 = vsel %vm378_vm0, %v2535_v61, 0.0  ;;  %1479 = vst.msk [vmem:[#allocation3 + $0xe8] sm:$0xff] %vm1449_vm8, %v1412_v52  ;;  %v1606_v19 = vpop.permute.xlu0 %1605  ;;  %2850 = vmatprep.mubr.msk.f32.mxu1 %vm2099_vm12, %v2088_v63  ;;  %v2089_v26 = vld [vmem:[#allocation3 + $0xd8] sm:$0xff] }
 0x26d   : > { %v2575_v33 = vadd.f32 %v2574_v0, %v2573_v57  ;;  %1673 = vst.msk [vmem:[#allocation3 + $0xe8] sm:$0xff] %vm1643_vm9, %v1606_v19  ;;  %2851 = vmatmul.mubr.msk.f32.gmra.mrb[10].mxu1 %vm2099_vm12, %v2089_v26  ;;  %v2475_v48 = vadd.f32 %v2474_v10, %v2473_v62 }
 0x26f   : > { %v1028_v3 = vpop.permute.xlu1 %1027  ;;  %v2577_v12 = vadd.f32 %v2576_v44, %v2575_v33 }
 0x270   : > { %1094 = vst.msk [vmem:[#allocation3 + $0xf0] sm:$0xff] %vm1063_vm6, %v1028_v3  ;;  %v1030_v4 = vpop.permute.xlu0 %1029 }
 0x271   : > { %1095 = vst.msk [vmem:[#allocation3 + $0xf8] sm:$0xff] %vm1063_vm6, %v1030_v4 }
 0x273   : > { %v1797_v5 = vpop.permute.xlu1 %1796 }
 0x274   : > { %1865 = vst.msk [vmem:[#allocation3 + $0xe0] sm:$0xff] %vm1836_vm10, %v1797_v5  ;;  %v1799_v53 = vpop.permute.xlu0 %1798 }
 0x275   : > { %1866 = vst.msk [vmem:[#allocation3 + $0xe8] sm:$0xff] %vm1836_vm10, %v1799_v53 }
 0x277   : > { %v1221_v32 = vpop.permute.xlu1 %1220 }
 0x278   : > { %1287 = vst.msk [vmem:[#allocation3 + $0xf0] sm:$0xff] %vm1256_vm7, %v1221_v32  ;;  %v1223_v55 = vpop.permute.xlu0 %1222 }
 0x279   : > { %1288 = vst.msk [vmem:[#allocation3 + $0xf8] sm:$0xff] %vm1256_vm7, %v1223_v55 }
 0x27b   : > { %v1990_v6 = vpop.permute.xlu1 %1989 }
 0x27c   : > { %2058 = vst.msk [vmem:[#allocation3 + $0xe0] sm:$0xff] %vm2029_vm11, %v1990_v6  ;;  %v1992_v46 = vpop.permute.xlu0 %1991 }
 0x27d   : > { %2059 = vst.msk [vmem:[#allocation3 + $0xe8] sm:$0xff] %vm2029_vm11, %v1992_v46 }
 0x27f   : > { %v1414_v17 = vpop.permute.xlu1 %1413 }
 0x280   : > { %1480 = vst.msk [vmem:[#allocation3 + $0xf0] sm:$0xff] %vm1449_vm8, %v1414_v17  ;;  %v2828_v21 = vpop.f32.mrb[10].mxu0  ;;  %v1608_v38 = vpop.permute.xlu0 %1607 }
 0x281   : > { %2436 = vst.msk [vmem:[%s3902_s6 + $0x58] sm:$0xff] %vm378_vm0, %v2828_v21  ;;  %v2538_v41 = vmul.f32 %v2828_v21, %v2828_v21  ;;  %v2316_v28 = vpop.f32.mrb[11].mxu0  ;;  %v2478_v35 = vsel %vm378_vm0, %v2828_v21, 0.0 }
 0x282   : > { %1674 = vst.msk [vmem:[#allocation3 + $0xf0] sm:$0xff] %vm1643_vm9, %v1608_v38  ;;  %v2476_v54 = vsel %vm378_vm0, %v2316_v28, 0.0  ;;  %v2537_v7 = vmul.f32 %v2316_v28, %v2316_v28 }
 0x283   : > { %2435 = vst.msk [vmem:[%s3902_s6 + $0x50] sm:$0xff] %vm378_vm0, %v2316_v28  ;;  %v2477_v30 = vadd.f32 %v2476_v54, %v2475_v48  ;;  %v1416_v1 = vpop.permute.xlu1 %1415  ;;  %v2090_v16 = vld [vmem:[#allocation3 + $0xe0] sm:$0xff]  ;;  %v2580_v9 = vsel %vm378_vm0, %v2538_v41, 0.0 }
 0x284   : > { %v2578_v45 = vsel %vm378_vm0, %v2537_v7, 0.0  ;;  %1481 = vst.msk [vmem:[#allocation3 + $0xf8] sm:$0xff] %vm1449_vm8, %v1416_v1  ;;  %2853 = vmatprep.mubr.msk.f32.mxu1 %vm2099_vm12, %v2090_v16  ;;  %v2091_v8 = vld [vmem:[#allocation3 + $0xe8] sm:$0xff]  ;;  %v1801_v11 = vpop.permute.xlu0 %1800 }
 0x285   : > { %v2579_v50 = vadd.f32 %v2578_v45, %v2577_v12  ;;  %2854 = vmatmul.mubr.msk.f32.gmra.mrb[12].mxu1 %vm2099_vm12, %v2091_v8  ;;  %1867 = vst.msk [vmem:[#allocation3 + $0xf0] sm:$0xff] %vm1836_vm10, %v1801_v11  ;;  %v2479_v25 = vadd.f32 %v2478_v35, %v2477_v30 }
 0x287   : > { %v1610_v23 = vpop.permute.xlu1 %1609  ;;  %v2581_v15 = vadd.f32 %v2580_v9, %v2579_v50 }
 0x288   : > { %1675 = vst.msk [vmem:[#allocation3 + $0xf8] sm:$0xff] %vm1643_vm9, %v1610_v23  ;;  %v1994_v34 = vpop.permute.xlu0 %1993 }
 0x289   : > { %2060 = vst.msk [vmem:[#allocation3 + $0xf0] sm:$0xff] %vm2029_vm11, %v1994_v34 }
 0x28b   : > { %v1803_v37 = vpop.permute.xlu1 %1802 }
 0x28c   : > { %1868 = vst.msk [vmem:[#allocation3 + $0xf8] sm:$0xff] %vm1836_vm10, %v1803_v37 }
 0x28f   : > { %v1996_v51 = vpop.permute.xlu1 %1995 }
 0x290   : > { %2061 = vst.msk [vmem:[#allocation3 + $0xf8] sm:$0xff] %vm2029_vm11, %v1996_v51  ;;  %v2092_v40 = vld [vmem:[#allocation3 + $0xf0] sm:$0xff] }
 0x291   : > { %2856 = vmatprep.mubr.msk.f32.mxu1 %vm2099_vm12, %v2092_v40 }
 0x297   : > { %v2093_v43 = vld [vmem:[#allocation3 + $0xf8] sm:$0xff] }
 0x298   : > { %v2831_v56 = vpop.f32.mrb[12].mxu0  ;;  %2857 = vmatmul.mubr.msk.f32.gmra.mrb[14].mxu1 %vm2099_vm12, %v2093_v43 }
 0x299   : > { %2438 = vst.msk [vmem:[%s3902_s6 + $0x68] sm:$0xff] %vm378_vm0, %v2831_v56  ;;  %v2540_v58 = vmul.f32 %v2831_v56, %v2831_v56  ;;  %v2326_v22 = vpop.f32.mrb[13].mxu0  ;;  %v2482_v29 = vsel %vm378_vm0, %v2831_v56, 0.0 }
 0x29a   : > { %2437 = vst.msk [vmem:[%s3902_s6 + $0x60] sm:$0xff] %vm378_vm0, %v2326_v22  ;;  %v2480_v59 = vsel %vm378_vm0, %v2326_v22, 0.0  ;;  %v2539_v2 = vmul.f32 %v2326_v22, %v2326_v22 }
 0x29b   : > { %v2481_v49 = vadd.f32 %v2480_v59, %v2479_v25  ;;  %v2584_v18 = vsel %vm378_vm0, %v2540_v58, 0.0 }
 0x29c   : > { %v2582_v27 = vsel %vm378_vm0, %v2539_v2, 0.0 }
 0x29d   : > { %v2583_v57 = vadd.f32 %v2582_v27, %v2581_v15  ;;  %v2483_v31 = vadd.f32 %v2482_v29, %v2481_v49 }
 0x29f   : > { %v2585_v13 = vadd.f32 %v2584_v18, %v2583_v57 }
 0x2b0   : > { %v2834_v20 = vpop.f32.mrb[14].mxu0 }
 0x2b1   : > { %2440 = vst.msk [vmem:[%s3902_s6 + $0x78] sm:$0xff] %vm378_vm0, %v2834_v20  ;;  %v2542_v60 = vmul.f32 %v2834_v20, %v2834_v20  ;;  %v2336_v36 = vpop.f32.mrb[15].mxu0  ;;  %v2486_v39 = vsel %vm378_vm0, %v2834_v20, 0.0 }
 0x2b2   : > { %2439 = vst.msk [vmem:[%s3902_s6 + $0x70] sm:$0xff] %vm378_vm0, %v2336_v36  ;;  %v2484_v42 = vsel %vm378_vm0, %v2336_v36, 0.0  ;;  %v2541_v47 = vmul.f32 %v2336_v36, %v2336_v36 }
 0x2b3   : > { %v2485_v14 = vadd.f32 %v2484_v42, %v2483_v31  ;;  %v2588_v10 = vsel %vm378_vm0, %v2542_v60, 0.0 }
 0x2b4   : > { %v2586_v24 = vsel %vm378_vm0, %v2541_v47, 0.0 }
 0x2b5   : > { %v2487_v61 = vadd.f32 %v2486_v39, %v2485_v14  ;;  %v2587_v62 = vadd.f32 %v2586_v24, %v2585_v13 }
 0x2b7   : > { %v2589_v52 = vadd.f32 %v2588_v10, %v2587_v62 }
 0x2c8   : > { %v2837_v63 = vpop.f32.mrb[0].mxu1 }
 0x2c9   : > { %2442 = vst.msk [vmem:[%s3902_s6 + $0x88] sm:$0xff] %vm378_vm0, %v2837_v63  ;;  %v2544_v44 = vmul.f32 %v2837_v63, %v2837_v63  ;;  %v2346_v0 = vpop.f32.mrb[1].mxu1  ;;  %v2490_v19 = vsel %vm378_vm0, %v2837_v63, 0.0 }
 0x2ca   : > { %2441 = vst.msk [vmem:[%s3902_s6 + $0x80] sm:$0xff] %vm378_vm0, %v2346_v0  ;;  %v2488_v26 = vsel %vm378_vm0, %v2346_v0, 0.0  ;;  %v2543_v33 = vmul.f32 %v2346_v0, %v2346_v0 }
 0x2cb   : > { %v2489_v48 = vadd.f32 %v2488_v26, %v2487_v61  ;;  %v2592_v3 = vsel %vm378_vm0, %v2544_v44, 0.0 }
 0x2cc   : > { %v2590_v12 = vsel %vm378_vm0, %v2543_v33, 0.0 }
 0x2cd   : > { %v2591_v4 = vadd.f32 %v2590_v12, %v2589_v52  ;;  %v2491_v5 = vadd.f32 %v2490_v19, %v2489_v48 }
 0x2cf   : > { %v2593_v53 = vadd.f32 %v2592_v3, %v2591_v4 }
 0x2e0   : > { %v2840_v32 = vpop.f32.mrb[2].mxu1 }
 0x2e1   : > { %2444 = vst.msk [vmem:[%s3902_s6 + $0x98] sm:$0xff] %vm378_vm0, %v2840_v32  ;;  %v2546_v55 = vmul.f32 %v2840_v32, %v2840_v32  ;;  %v2356_v6 = vpop.f32.mrb[3].mxu1  ;;  %v2494_v46 = vsel %vm378_vm0, %v2840_v32, 0.0 }
 0x2e2   : > { %2443 = vst.msk [vmem:[%s3902_s6 + $0x90] sm:$0xff] %vm378_vm0, %v2356_v6  ;;  %v2492_v17 = vsel %vm378_vm0, %v2356_v6, 0.0  ;;  %v2545_v21 = vmul.f32 %v2356_v6, %v2356_v6 }
 0x2e3   : > { %v2493_v38 = vadd.f32 %v2492_v17, %v2491_v5  ;;  %v2596_v41 = vsel %vm378_vm0, %v2546_v55, 0.0 }
 0x2e4   : > { %v2594_v28 = vsel %vm378_vm0, %v2545_v21, 0.0 }
 0x2e5   : > { %v2595_v35 = vadd.f32 %v2594_v28, %v2593_v53  ;;  %v2495_v54 = vadd.f32 %v2494_v46, %v2493_v38 }
 0x2e7   : > { %v2597_v7 = vadd.f32 %v2596_v41, %v2595_v35 }
 0x2f9   : > { %v2843_v30 = vpop.f32.mrb[4].mxu1 }
 0x2fa   : > { %2446 = vst.msk [vmem:[%s3902_s6 + $0xa8] sm:$0xff] %vm378_vm0, %v2843_v30  ;;  %v2548_v1 = vmul.f32 %v2843_v30, %v2843_v30  ;;  %v2366_v16 = vpop.f32.mrb[5].mxu1  ;;  %v2498_v9 = vsel %vm378_vm0, %v2843_v30, 0.0 }
 0x2fb   : > { %2445 = vst.msk [vmem:[%s3902_s6 + $0xa0] sm:$0xff] %vm378_vm0, %v2366_v16  ;;  %v2496_v45 = vsel %vm378_vm0, %v2366_v16, 0.0  ;;  %v2547_v8 = vmul.f32 %v2366_v16, %v2366_v16 }
 0x2fc   : > { %v2497_v11 = vadd.f32 %v2496_v45, %v2495_v54  ;;  %v2600_v50 = vsel %vm378_vm0, %v2548_v1, 0.0 }
 0x2fd   : > { %v2598_v25 = vsel %vm378_vm0, %v2547_v8, 0.0 }
 0x2fe   : > { %v2599_v23 = vadd.f32 %v2598_v25, %v2597_v7  ;;  %v2499_v15 = vadd.f32 %v2498_v9, %v2497_v11 }
 0x300   : > { %v2601_v34 = vadd.f32 %v2600_v50, %v2599_v23 }
 0x310   : > { %v2846_v37 = vpop.f32.mrb[6].mxu1 }
 0x311   : > { %2448 = vst.msk [vmem:[%s3902_s6 + $0xb8] sm:$0xff] %vm378_vm0, %v2846_v37  ;;  %v2550_v51 = vmul.f32 %v2846_v37, %v2846_v37  ;;  %v2376_v40 = vpop.f32.mrb[7].mxu1  ;;  %v2502_v43 = vsel %vm378_vm0, %v2846_v37, 0.0 }
 0x312   : > { %2447 = vst.msk [vmem:[%s3902_s6 + $0xb0] sm:$0xff] %vm378_vm0, %v2376_v40  ;;  %v2500_v56 = vsel %vm378_vm0, %v2376_v40, 0.0  ;;  %v2549_v58 = vmul.f32 %v2376_v40, %v2376_v40 }
 0x313   : > { %v2501_v22 = vadd.f32 %v2500_v56, %v2499_v15  ;;  %v2604_v29 = vsel %vm378_vm0, %v2550_v51, 0.0 }
 0x314   : > { %v2602_v59 = vsel %vm378_vm0, %v2549_v58, 0.0 }
 0x315   : > { %v2603_v2 = vadd.f32 %v2602_v59, %v2601_v34  ;;  %v2503_v49 = vadd.f32 %v2502_v43, %v2501_v22 }
 0x317   : > { %v2605_v18 = vadd.f32 %v2604_v29, %v2603_v2 }
 0x328   : > { %v2849_v27 = vpop.f32.mrb[8].mxu1 }
 0x329   : > { %2450 = vst.msk [vmem:[%s3902_s6 + $0xc8] sm:$0xff] %vm378_vm0, %v2849_v27  ;;  %v2552_v57 = vmul.f32 %v2849_v27, %v2849_v27  ;;  %v2386_v31 = vpop.f32.mrb[9].mxu1  ;;  %v2506_v13 = vsel %vm378_vm0, %v2849_v27, 0.0 }
 0x32a   : > { %2449 = vst.msk [vmem:[%s3902_s6 + $0xc0] sm:$0xff] %vm378_vm0, %v2386_v31  ;;  %v2504_v20 = vsel %vm378_vm0, %v2386_v31, 0.0  ;;  %v2551_v60 = vmul.f32 %v2386_v31, %v2386_v31 }
 0x32b   : > { %v2505_v36 = vadd.f32 %v2504_v20, %v2503_v49  ;;  %v2608_v39 = vsel %vm378_vm0, %v2552_v57, 0.0 }
 0x32c   : > { %v2606_v42 = vsel %vm378_vm0, %v2551_v60, 0.0 }
 0x32d   : > { %v2607_v47 = vadd.f32 %v2606_v42, %v2605_v18  ;;  %v2507_v14 = vadd.f32 %v2506_v13, %v2505_v36 }
 0x32f   : > { %v2609_v10 = vadd.f32 %v2608_v39, %v2607_v47 }
 0x340   : > { %v2852_v24 = vpop.f32.mrb[10].mxu1 }
 0x341   : > { %2452 = vst.msk [vmem:[%s3902_s6 + $0xd8] sm:$0xff] %vm378_vm0, %v2852_v24  ;;  %v2554_v61 = vmul.f32 %v2852_v24, %v2852_v24  ;;  %v2396_v62 = vpop.f32.mrb[11].mxu1  ;;  %v2510_v52 = vsel %vm378_vm0, %v2852_v24, 0.0 }
 0x342   : > { %2451 = vst.msk [vmem:[%s3902_s6 + $0xd0] sm:$0xff] %vm378_vm0, %v2396_v62  ;;  %v2508_v63 = vsel %vm378_vm0, %v2396_v62, 0.0  ;;  %v2553_v44 = vmul.f32 %v2396_v62, %v2396_v62 }
 0x343   : > { %v2509_v0 = vadd.f32 %v2508_v63, %v2507_v14  ;;  %v2612_v19 = vsel %vm378_vm0, %v2554_v61, 0.0 }
 0x344   : > { %v2610_v26 = vsel %vm378_vm0, %v2553_v44, 0.0 }
 0x345   : > { %v2611_v33 = vadd.f32 %v2610_v26, %v2609_v10  ;;  %v2511_v48 = vadd.f32 %v2510_v52, %v2509_v0 }
 0x347   : > { %v2613_v3 = vadd.f32 %v2612_v19, %v2611_v33 }
 0x358   : > { %v2855_v12 = vpop.f32.mrb[12].mxu1 }
 0x359   : > { %2454 = vst.msk [vmem:[%s3902_s6 + $0xe8] sm:$0xff] %vm378_vm0, %v2855_v12  ;;  %v2556_v4 = vmul.f32 %v2855_v12, %v2855_v12  ;;  %v2406_v5 = vpop.f32.mrb[13].mxu1  ;;  %v2514_v53 = vsel %vm378_vm0, %v2855_v12, 0.0 }
 0x35a   : > { %2453 = vst.msk [vmem:[%s3902_s6 + $0xe0] sm:$0xff] %vm378_vm0, %v2406_v5  ;;  %v2512_v32 = vsel %vm378_vm0, %v2406_v5, 0.0  ;;  %v2555_v55 = vmul.f32 %v2406_v5, %v2406_v5 }
 0x35b   : > { %v2513_v6 = vadd.f32 %v2512_v32, %v2511_v48  ;;  %v2616_v46 = vsel %vm378_vm0, %v2556_v4, 0.0 }
 0x35c   : > { %v2614_v17 = vsel %vm378_vm0, %v2555_v55, 0.0 }
 0x35d   : > { %v2615_v21 = vadd.f32 %v2614_v17, %v2613_v3  ;;  %v2515_v38 = vadd.f32 %v2514_v53, %v2513_v6 }
 0x35f   : > { %v2617_v41 = vadd.f32 %v2616_v46, %v2615_v21 }
 0x36b   : > { %v2858_v28 = vpop.f32.mrb[14].mxu1 }
 0x36c   : > { %2456 = vst.msk [vmem:[%s3902_s6 + $0xf8] sm:$0xff] %vm378_vm0, %v2858_v28  ;;  %v2416_v35 = vpop.f32.mrb[15].mxu1  ;;  %v2558_v54 = vmul.f32 %v2858_v28, %v2858_v28  ;;  %v2518_v16 = vsel %vm378_vm0, %v2858_v28, 0.0 }
 0x36d   : > { %2455 = vst.msk [vmem:[%s3902_s6 + $0xf0] sm:$0xff] %vm378_vm0, %v2416_v35  ;;  %v2516_v7 = vsel %vm378_vm0, %v2416_v35, 0.0  ;;  %v2557_v30 = vmul.f32 %v2416_v35, %v2416_v35 }
 0x36e   : > { %v2517_v1 = vadd.f32 %v2516_v7, %v2515_v38  ;;  %v2620_v11 = vsel %vm378_vm0, %v2558_v54, 0.0 }
 0x36f   : > { %v2618_v9 = vsel %vm378_vm0, %v2557_v30, 0.0 }
 0x370   : > { %v2519_v45 = vadd.f32 %v2518_v16, %v2517_v1  ;;  %v2619_v8 = vadd.f32 %v2618_v9, %v2617_v41 }
 0x372   : > { %v2520_v50 = vrot.slane %v2519_v45, 4  ;;  %v2621_v25 = vadd.f32 %v2620_v11, %v2619_v8 }
 0x374   : > { %v2521_v23 = vadd.f32 %v2520_v50, %v2519_v45  ;;  %v2622_v15 = vrot.slane %v2621_v25, 4 }
 0x376   : > { %v2522_v34 = vrot.slane %v2521_v23, 2  ;;  %v2623_v37 = vadd.f32 %v2622_v15, %v2621_v25 }
 0x378   : > { %v2523_v51 = vadd.f32 %v2522_v34, %v2521_v23  ;;  %v2624_v40 = vrot.slane %v2623_v37, 2 }
 0x37a   : > { %v2524_v43 = vrot.slane %v2523_v51, 1  ;;  %v2625_v56 = vadd.f32 %v2624_v40, %v2623_v37 }
 0x37c   : > { %v2525_v58 = vadd.f32 %v2524_v43, %v2523_v51  ;;  %v2626_v22 = vrot.slane %v2625_v56, 1 }
 0x37e   : > { %2526 = vst.msk [vmem:[%s235_s9] sm:$0x1] %vm388_vm2, %v2525_v58  ;;  %v2627_v29 = vadd.f32 %v2626_v22, %v2625_v56 }
 0x380   : > { %2628 = vst.msk [vmem:[%s235_s9 + $0x1] sm:$0x1] %vm388_vm2, %v2627_v29 }
 0x381 PF: > { %s16_s18 = sadd.s32 1, %s2898_s18  }
 0x382   : > { %p13_p4 = scmp.ge.s32.totalorder %s16_s18, 4  }
 0x384   :  { %15 = sbr.rel (!%p13_p4) target bundleno = 1 (0x1), region = 81 }

</bundles_post_ra>
